<compile_context>
chip_gen: v7x
topology: tpu7x:2x2x1
jax: 0.10.0
libtpu: 0.0.40
codegen_flags: <defaults>
</compile_context>

<pallas_src>
import functools

import jax
import jax.numpy as jnp
from jax.experimental import pallas as pl
from jax.experimental.pallas import tpu as pltpu

_EPS = 1e-5


def _round_up(x, m):
    return (x + m - 1) // m * m


# ---------------------------------------------------------------------------
# Fused BasicBlock kernel: one batch image per grid step.
# ---------------------------------------------------------------------------
def _basic_block_kernel(x_ref, w1_ref, b1_ref, w2_ref, b2_ref, *rest,
                        stride, Ho, Wo, Wm, has_proj, sc_phase, sc_base):
    """Refs (block shapes match the arrays exactly -- no partial blocks):
      x_ref   : (1, s*s, (Ho+3)*Wm, Cin_p) bf16  polyphase input, rows of width Wm=Wo+2
      w1_ref  : (9, Cin_p, Cp) bf16   conv1 weights (BN1 scale folded in)
      w2_ref  : (9, Cp,   Cp)  bf16   conv2 weights (BN2 scale folded in)
      wsc_ref : (Cin_p, Cp)    bf16   1x1 projection weights (only when has_proj)
      b*_ref  : (1, Cp)        f32    BN shifts
      o_ref   : (1, Ho*Wm, Cp) bf16   output in wide-row layout (cols >= Wo are junk)
      mid_ref : ((Ho+3)*Wm, Cp) bf16  conv1 output + zero halo, wide-row layout
      acc_ref : (Ho*Wm, Cp)    f32    reused MXU accumulator
    """
    if has_proj:
        wsc_ref, bsc_ref, o_ref, mid_ref, acc_ref = rest
    else:
        o_ref, mid_ref, acc_ref = rest

    s = stride
    cp = w2_ref.shape[-1]
    m1 = Ho * Wm

    # Valid-column mask: within each width-Wm row, columns >= Wo are junk.
    col = jax.lax.broadcasted_iota(jnp.int32, (m1, 1), 0) % Wm
    valid = col < Wo

    # ---- conv1 (3x3, stride s) + folded BN1 + ReLU: 9 contiguous-slice MXU matmuls ----
    for di in range(3):
        for dj in range(3):
            tap = di * 3 + dj
            phase = (di % s) * s + (dj % s)
            off = (di // s) * Wm + (dj // s)
            patch = x_ref[0, phase, off:off + m1, :]
            contrib = jnp.dot(patch, w1_ref[tap], preferred_element_type=jnp.float32)
            if tap == 0:
                acc_ref[...] = contrib
            else:
                acc_ref[...] += contrib
    out1 = jnp.where(valid, jnp.maximum(acc_ref[...] + b1_ref[...], 0.0), 0.0)
    out1 = out1.astype(jnp.bfloat16)

    # ---- stage conv1 output in the zero-haloed bf16 VMEM scratch (no HBM round trip) --
    # The masked junk columns of `out1` land exactly on the left/right halo columns, so
    # only the two strips the bulk store never touches need explicit zeroing.
    mid_ref[0:Wm + 1, :] = jnp.zeros((Wm + 1, cp), jnp.bfloat16)
    mid_ref[(Ho + 1) * Wm + 1:(Ho + 3) * Wm, :] = jnp.zeros((2 * Wm - 1, cp),
                                                            jnp.bfloat16)
    mid_ref[Wm + 1:Wm + 1 + m1, :] = out1

    # ---- conv2 (3x3, stride 1) + folded BN2 ----
    for di in range(3):
        for dj in range(3):
            tap = di * 3 + dj
            off = di * Wm + dj
            patch = mid_ref[off:off + m1, :]
            contrib = jnp.dot(patch, w2_ref[tap], preferred_element_type=jnp.float32)
            if tap == 0:
                acc_ref[...] = contrib
            else:
                acc_ref[...] += contrib
    acc2 = acc_ref[...] + b2_ref[...]

    # ---- shortcut ----
    xs = x_ref[0, sc_phase, sc_base:sc_base + m1, :]
    if has_proj:      # 1x1 strided projection + folded BN (bf16 MXU matmul)
        acc2 = acc2 + jnp.dot(xs, wsc_ref[...], preferred_element_type=jnp.float32)
        acc2 = acc2 + bsc_ref[...]
    else:             # identity: plain f32 VPU add, no matmul / bias
        acc2 = acc2 + xs.astype(jnp.float32)

    # ---- final ReLU, lane-dense bf16 store ----
    o_ref[0] = jnp.maximum(acc2, 0.0).astype(o_ref.dtype)


# ---------------------------------------------------------------------------
# Wrapper: polyphase packing, BN folding, pallas_call
# ---------------------------------------------------------------------------
def _phase_pack(x_nhwc, stride, Ho, Wo, cin_p):
    """Zero-pad (conv pad=1 + channel pad to cin_p), polyphase-decompose per stride
    phase, pad each phase to (Ho+3, Wo+2) and flatten to rows of width Wm = Wo+2 so
    every conv/shortcut tap is a contiguous row-slice inside the kernel."""
    N, H, W, C = x_nhwc.shape
    s = stride
    Wm = Wo + 2
    PHp = Ho + 3
    xp = jnp.pad(x_nhwc, ((0, 0), (1, 1), (1, 1), (0, cin_p - C)))
    phases = []
    for a in range(s):
        for b in range(s):
            ph = xp[:, a::s, b::s, :]
            ph = jnp.pad(ph, ((0, 0), (0, PHp - ph.shape[1]),
                              (0, Wm - ph.shape[2]), (0, 0)))
            phases.append(ph.reshape(N, PHp * Wm, cin_p))
    xph = jnp.stack(phases, axis=1)                  # (N, s*s, (Ho+3)*Wm, cin_p)
    return xph.astype(jnp.bfloat16)


def _fold_bn(w_oihw, gamma, beta, cin_p, cout_p):
    """(Cout,Cin,kh,kw) -> (kh*kw, Cin_p, Cout_p) bf16 with BN scale folded into the
    output channels (inference-style stats: mean=0, var=1), plus the (1, Cout_p) f32
    shift.  BOTH channel axes are zero-padded so the kernel never reads undefined data."""
    cout, cin, kh, kw = w_oihw.shape
    scale = gamma / jnp.sqrt(1.0 + _EPS)
    wm = jnp.transpose(w_oihw, (2, 3, 1, 0)).reshape(kh * kw, cin, cout)
    wm = wm * scale[None, None, :]
    wm = jnp.pad(wm, ((0, 0), (0, cin_p - cin), (0, cout_p - cout)))
    bb = jnp.pad(beta, (0, cout_p - cout)).reshape(1, cout_p).astype(jnp.float32)
    return wm.astype(jnp.bfloat16), bb


@functools.partial(jax.jit, static_argnums=2)
def basic_block_forward(params, x_nchw, stride):
    x = jnp.transpose(x_nchw, (0, 2, 3, 1)).astype(jnp.float32)       # NHWC
    N, H, W, cin = x.shape
    planes = params["conv1_w"].shape[0]
    s = stride
    Ho = (H - 1) // s + 1
    Wo = (W - 1) // s + 1
    Wm = Wo + 2
    m1 = Ho * Wm
    mx = (Ho + 3) * Wm
    cin_p = _round_up(cin, 128)                      # lane-dense channel padding
    cp = _round_up(planes, 128)

    xph = _phase_pack(x, s, Ho, Wo, cin_p)
    w1, b1 = _fold_bn(params["conv1_w"], params["bn1_gamma"], params["bn1_beta"],
                      cin_p, cp)
    w2, b2 = _fold_bn(params["conv2_w"], params["bn2_gamma"], params["bn2_beta"],
                      cp, cp)

    has_proj = "sc_w" in params
    args = [xph, w1, b1, w2, b2]
    in_specs = [
        pl.BlockSpec((1, s * s, mx, cin_p), lambda n: (n, 0, 0, 0)),
        pl.BlockSpec((9, cin_p, cp), lambda n: (0, 0, 0)),
        pl.BlockSpec((1, cp), lambda n: (0, 0)),
        pl.BlockSpec((9, cp, cp), lambda n: (0, 0, 0)),
        pl.BlockSpec((1, cp), lambda n: (0, 0)),
    ]
    if has_proj:                                     # 1x1 projection + BN
        wsc, bsc = _fold_bn(params["sc_w"], params["sc_gamma"], params["sc_beta"],
                            cin_p, cp)
        args += [wsc[0], bsc]
        in_specs += [pl.BlockSpec((cin_p, cp), lambda n: (0, 0)),
                     pl.BlockSpec((1, cp), lambda n: (0, 0))]
    else:
        assert cin_p == cp                           # identity => in_planes == planes

    # xpad[1 + s*i, 1 + s*j] lives in phase (sc_a, sc_a) at flat offset sc_off*(Wm+1).
    sc_a = 1 % s
    sc_phase = sc_a * s + sc_a
    sc_base = ((1 - sc_a) // s) * (Wm + 1)

    kernel = functools.partial(
        _basic_block_kernel, stride=s, Ho=Ho, Wo=Wo, Wm=Wm,
        has_proj=has_proj, sc_phase=sc_phase, sc_base=sc_base)

    out = pl.pallas_call(
        kernel,
        out_shape=jax.ShapeDtypeStruct((N, m1, cp), jnp.bfloat16),
        grid_spec=pltpu.PrefetchScalarGridSpec(
            num_scalar_prefetch=0,
            grid=(N,),
            in_specs=in_specs,
            out_specs=pl.BlockSpec((1, m1, cp), lambda n: (n, 0, 0)),
            scratch_shapes=[pltpu.VMEM((mx, cp), jnp.bfloat16),     # mid (bf16 halo'd)
                            pltpu.VMEM((m1, cp), jnp.float32)],     # shared accumulator
        ),
        compiler_params=pltpu.CompilerParams(
            dimension_semantics=("parallel",),
            vmem_limit_bytes=32 * 1024 * 1024),
    )(*args)

    out = out.reshape(N, Ho, Wm, cp)[:, :, :Wo, :planes]             # drop junk cols/chans
    return jnp.transpose(out, (0, 3, 1, 2)).astype(jnp.float32)      # back to NCHW


# ---------------------------------------------------------------------------
# Parameter init + pure-JAX reference
# ---------------------------------------------------------------------------
def init_basic_block(key, in_planes, planes, stride):
    ks = jax.random.split(key, 8)

    def conv_w(k, cout, cin, kh, kw):
        fan = cin * kh * kw
        return jax.random.normal(k, (cout, cin, kh, kw), jnp.float32) * (2.0 / fan) ** 0.5

    params = {
        "conv1_w": conv_w(ks[0], planes, in_planes, 3, 3),
        "bn1_gamma": jax.random.uniform(ks[1], (planes,), jnp.float32, 0.5, 1.5),
        "bn1_beta": 0.1 * jax.random.normal(ks[2], (planes,), jnp.float32),
        "conv2_w": conv_w(ks[3], planes, planes, 3, 3),
        "bn2_gamma": jax.random.uniform(ks[4], (planes,), jnp.float32, 0.5, 1.5),
        "bn2_beta": 0.1 * jax.random.normal(ks[5], (planes,), jnp.float32),
    }
    if stride != 1 or in_planes != planes:
        params["sc_w"] = conv_w(ks[6], planes, in_planes, 1, 1)
        params["sc_gamma"] = jax.random.uniform(ks[7], (planes,), jnp.float32, 0.5, 1.5)
        params["sc_beta"] = jnp.zeros((planes,), jnp.float32)
    return params


def ref_forward(params, x, stride, quantized=False):
    """Pure-JAX reference.  With quantized=True inputs/weights/intermediate are rounded
    to bf16 at the same points as the kernel (math stays f32)."""
    def q(a):
        return a.astype(jnp.bfloat16).astype(jnp.float32) if quantized else a

    def conv(xx, w, s, pad):
        return jax.lax.conv_general_dilated(
            xx, w, (s, s), [(pad, pad), (pad, pad)],
            dimension_numbers=("NCHW", "OIHW", "NCHW"))

    def fold(w, g):
        return q(w * (g / jnp.sqrt(1.0 + _EPS))[:, None, None, None])

    xq = q(x)
    out1 = jax.nn.relu(conv(xq, fold(params["conv1_w"], params["bn1_gamma"]), stride, 1)
                       + params["bn1_beta"][None, :, None, None])
    out2 = (conv(q(out1), fold(params["conv2_w"], params["bn2_gamma"]), 1, 1)
            + params["bn2_beta"][None, :, None, None])
    if "sc_w" in params:
        sc = (conv(xq, fold(params["sc_w"], params["sc_gamma"]), stride, 0)
              + params["sc_beta"][None, :, None, None])
    else:
        sc = xq
    return jax.nn.relu(out2 + sc)


if __name__ == "__main__":
    key = jax.random.PRNGKey(0)

    # (in_planes, planes, stride, H, W): projection-shortcut and identity-shortcut cases.
    configs = [(4, 8, 2, 16, 16), (8, 8, 1, 16, 16)]
    for idx, (cin, planes, stride, H, W) in enumerate(configs):
        kx, kp = jax.random.split(jax.random.fold_in(key, idx))
        x = jax.random.normal(kx, (2, cin, H, W), jnp.float32)
        params = init_basic_block(kp, cin, planes, stride)

        out = jax.block_until_ready(basic_block_forward(params, x, stride))

        Ho = (H - 1) // stride + 1
        assert out.shape == (2, planes, Ho, Ho), out.shape
        assert bool(jnp.all(jnp.isfinite(out)))
        # Tight check vs. a reference quantized at the same points as the kernel.
        ref_q = ref_forward(params, x, stride, quantized=True)
        assert jnp.allclose(out, ref_q, atol=1e-1, rtol=5e-2), \
            float(jnp.max(jnp.abs(out - ref_q)))
        # Loose check vs. the full-precision module (bf16 operand noise only).
        ref_f = ref_forward(params, x, stride, quantized=False)
        assert jnp.allclose(out, ref_f, atol=3e-1, rtol=1e-1), \
            float(jnp.max(jnp.abs(out - ref_f)))

    print("KERNEL_OK")
</pallas_src>

<mosaic_0001>
module attributes {stable_mosaic.version = 11 : i64} {
  func.func @_basic_block_kernel(%arg0: i32, %arg1: memref<1x4x110x128xbf16, #tpu.memory_space<vmem>>, %arg2: memref<9x128x128xbf16, #tpu.memory_space<vmem>>, %arg3: memref<1x128xf32, #tpu.memory_space<vmem>>, %arg4: memref<9x128x128xbf16, #tpu.memory_space<vmem>>, %arg5: memref<1x128xf32, #tpu.memory_space<vmem>>, %arg6: memref<128x128xbf16, #tpu.memory_space<vmem>>, %arg7: memref<1x128xf32, #tpu.memory_space<vmem>>, %arg8: memref<1x80x128xbf16, #tpu.memory_space<vmem>>, %arg9: memref<110x128xbf16, #tpu.memory_space<vmem>>, %arg10: memref<80x128xf32, #tpu.memory_space<vmem>>) attributes {dimension_semantics = [#tpu.dimension_semantics<parallel>], iteration_bounds = array<i64: 2>, scalar_prefetch = 0 : i64, scratch_operands = 2 : i64, tpu.core_type = #tpu.core_type<tc>, window_params = [{transform_indices = @transform_0, window_bounds = array<i64: 1, 4, 110, 128>}, {pipeline_mode = #tpu.pipeline_mode<synchronous>, transform_indices = @transform_1, window_bounds = array<i64: 9, 128, 128>}, {pipeline_mode = #tpu.pipeline_mode<synchronous>, transform_indices = @transform_2, window_bounds = array<i64: 1, 128>}, {pipeline_mode = #tpu.pipeline_mode<synchronous>, transform_indices = @transform_3, window_bounds = array<i64: 9, 128, 128>}, {pipeline_mode = #tpu.pipeline_mode<synchronous>, transform_indices = @transform_4, window_bounds = array<i64: 1, 128>}, {pipeline_mode = #tpu.pipeline_mode<synchronous>, transform_indices = @transform_5, window_bounds = array<i64: 128, 128>}, {pipeline_mode = #tpu.pipeline_mode<synchronous>, transform_indices = @transform_6, window_bounds = array<i64: 1, 128>}, {transform_indices = @transform_7, window_bounds = array<i64: 1, 80, 128>}]} {
    %0 = tpu.iota {dimensions = array<i32: 0>} : vector<80x1xi32>
    %c10_i32 = arith.constant 10 : i32
    %c0_i32 = arith.constant 0 : i32
    %1 = arith.cmpi eq, %c10_i32, %c0_i32 : i32
    %c1_i32 = arith.constant 1 : i32
    %2 = arith.select %1, %c1_i32, %c10_i32 : i32
    %3 = vector.broadcast %2 : i32 to vector<80x1xi32>
    %4 = arith.remsi %0, %3 : vector<80x1xi32>
    %c0_i32_0 = arith.constant 0 : i32
    %5 = vector.broadcast %c0_i32_0 : i32 to vector<80x1xi32>
    %6 = arith.cmpi ne, %4, %5 : vector<80x1xi32>
    %c0_i32_1 = arith.constant 0 : i32
    %7 = vector.broadcast %c0_i32_1 : i32 to vector<80x1xi32>
    %8 = arith.cmpi slt, %4, %7 : vector<80x1xi32>
    %c0_i32_2 = arith.constant 0 : i32
    %9 = arith.cmpi slt, %2, %c0_i32_2 : i32
    %10 = vector.broadcast %9 : i1 to vector<80x1xi1>
    %11 = vector.broadcast %10 : vector<80x1xi1> to vector<80x1xi1>
    %12 = arith.xori %8, %11 : vector<80x1xi1>
    %13 = arith.andi %12, %6 : vector<80x1xi1>
    %14 = vector.broadcast %2 : i32 to vector<80x1xi32>
    %15 = arith.addi %4, %14 : vector<80x1xi32>
    %16 = arith.select %13, %15, %4 : vector<80x1xi1>, vector<80x1xi32>
    %c8_i32 = arith.constant 8 : i32
    %17 = vector.broadcast %c8_i32 : i32 to vector<80x1xi32>
    %18 = arith.cmpi slt, %16, %17 : vector<80x1xi32>
    %c0 = arith.constant 0 : index
    %c0_3 = arith.constant 0 : index
    %c0_4 = arith.constant 0 : index
    %c0_5 = arith.constant 0 : index
    %19 = vector.load %arg1[%c0, %c0_3, %c0_4, %c0_5] : memref<1x4x110x128xbf16, #tpu.memory_space<vmem>>, vector<1x1x80x128xbf16>
    %20 = vector.shape_cast %19 : vector<1x1x80x128xbf16> to vector<80x128xbf16>
    %c0_6 = arith.constant 0 : index
    %c0_7 = arith.constant 0 : index
    %c0_8 = arith.constant 0 : index
    %21 = vector.load %arg2[%c0_6, %c0_7, %c0_8] : memref<9x128x128xbf16, #tpu.memory_space<vmem>>, vector<1x128x128xbf16>
    %22 = vector.shape_cast %21 : vector<1x128x128xbf16> to vector<128x128xbf16>
    %cst = arith.constant dense<0.000000e+00> : vector<80x128xf32>
    %23 = tpu.matmul %20, %22, %cst {dimension_numbers = #tpu.dot_dimension_numbers<[1], [0], [0], [1], [0, 0, 1, 1], [], []>} : vector<80x128xbf16>, vector<128x128xbf16>, vector<80x128xf32> -> vector<80x128xf32>
    %c0_9 = arith.constant 0 : index
    %c0_10 = arith.constant 0 : index
    %24 = vector.load %arg10[%c0_9, %c0_10] : memref<80x128xf32, #tpu.memory_space<vmem>>, vector<80x128xf32>
    tpu.vector_store %arg10[%c0_9, %c0_10], %23 {strides = array<i32>} : memref<80x128xf32, #tpu.memory_space<vmem>>, vector<80x128xf32>,
    %c0_11 = arith.constant 0 : index
    %c1 = arith.constant 1 : index
    %c0_12 = arith.constant 0 : index
    %c0_13 = arith.constant 0 : index
    %25 = vector.load %arg1[%c0_11, %c1, %c0_12, %c0_13] : memref<1x4x110x128xbf16, #tpu.memory_space<vmem>>, vector<1x1x80x128xbf16>
    %26 = vector.shape_cast %25 : vector<1x1x80x128xbf16> to vector<80x128xbf16>
    %c1_14 = arith.constant 1 : index
    %c0_15 = arith.constant 0 : index
    %c0_16 = arith.constant 0 : index
    %27 = vector.load %arg2[%c1_14, %c0_15, %c0_16] : memref<9x128x128xbf16, #tpu.memory_space<vmem>>, vector<1x128x128xbf16>
    %28 = vector.shape_cast %27 : vector<1x128x128xbf16> to vector<128x128xbf16>
    %cst_17 = arith.constant dense<0.000000e+00> : vector<80x128xf32>
    %29 = tpu.matmul %26, %28, %cst_17 {dimension_numbers = #tpu.dot_dimension_numbers<[1], [0], [0], [1], [0, 0, 1, 1], [], []>} : vector<80x128xbf16>, vector<128x128xbf16>, vector<80x128xf32> -> vector<80x128xf32>
    %c0_18 = arith.constant 0 : index
    %c0_19 = arith.constant 0 : index
    %30 = vector.load %arg10[%c0_18, %c0_19] : memref<80x128xf32, #tpu.memory_space<vmem>>, vector<80x128xf32>
    %31 = arith.addf %30, %29 : vector<80x128xf32>
    %c0_20 = arith.constant 0 : index
    %c0_21 = arith.constant 0 : index
    %32 = vector.load %arg10[%c0_20, %c0_21] : memref<80x128xf32, #tpu.memory_space<vmem>>, vector<80x128xf32>
    tpu.vector_store %arg10[%c0_20, %c0_21], %31 {strides = array<i32>} : memref<80x128xf32, #tpu.memory_space<vmem>>, vector<80x128xf32>,
    %c0_22 = arith.constant 0 : index
    %c0_23 = arith.constant 0 : index
    %c1_24 = arith.constant 1 : index
    %c0_25 = arith.constant 0 : index
    %33 = vector.load %arg1[%c0_22, %c0_23, %c1_24, %c0_25] : memref<1x4x110x128xbf16, #tpu.memory_space<vmem>>, vector<1x1x80x128xbf16>
    %34 = vector.shape_cast %33 : vector<1x1x80x128xbf16> to vector<80x128xbf16>
    %c2 = arith.constant 2 : index
    %c0_26 = arith.constant 0 : index
    %c0_27 = arith.constant 0 : index
    %35 = vector.load %arg2[%c2, %c0_26, %c0_27] : memref<9x128x128xbf16, #tpu.memory_space<vmem>>, vector<1x128x128xbf16>
    %36 = vector.shape_cast %35 : vector<1x128x128xbf16> to vector<128x128xbf16>
    %cst_28 = arith.constant dense<0.000000e+00> : vector<80x128xf32>
    %37 = tpu.matmul %34, %36, %cst_28 {dimension_numbers = #tpu.dot_dimension_numbers<[1], [0], [0], [1], [0, 0, 1, 1], [], []>} : vector<80x128xbf16>, vector<128x128xbf16>, vector<80x128xf32> -> vector<80x128xf32>
    %c0_29 = arith.constant 0 : index
    %c0_30 = arith.constant 0 : index
    %38 = vector.load %arg10[%c0_29, %c0_30] : memref<80x128xf32, #tpu.memory_space<vmem>>, vector<80x128xf32>
    %39 = arith.addf %38, %37 : vector<80x128xf32>
    %c0_31 = arith.constant 0 : index
    %c0_32 = arith.constant 0 : index
    %40 = vector.load %arg10[%c0_31, %c0_32] : memref<80x128xf32, #tpu.memory_space<vmem>>, vector<80x128xf32>
    tpu.vector_store %arg10[%c0_31, %c0_32], %39 {strides = array<i32>} : memref<80x128xf32, #tpu.memory_space<vmem>>, vector<80x128xf32>,
    %c0_33 = arith.constant 0 : index
    %c2_34 = arith.constant 2 : index
    %c0_35 = arith.constant 0 : index
    %c0_36 = arith.constant 0 : index
    %41 = vector.load %arg1[%c0_33, %c2_34, %c0_35, %c0_36] : memref<1x4x110x128xbf16, #tpu.memory_space<vmem>>, vector<1x1x80x128xbf16>
    %42 = vector.shape_cast %41 : vector<1x1x80x128xbf16> to vector<80x128xbf16>
    %c3 = arith.constant 3 : index
    %c0_37 = arith.constant 0 : index
    %c0_38 = arith.constant 0 : index
    %43 = vector.load %arg2[%c3, %c0_37, %c0_38] : memref<9x128x128xbf16, #tpu.memory_space<vmem>>, vector<1x128x128xbf16>
    %44 = vector.shape_cast %43 : vector<1x128x128xbf16> to vector<128x128xbf16>
    %cst_39 = arith.constant dense<0.000000e+00> : vector<80x128xf32>
    %45 = tpu.matmul %42, %44, %cst_39 {dimension_numbers = #tpu.dot_dimension_numbers<[1], [0], [0], [1], [0, 0, 1, 1], [], []>} : vector<80x128xbf16>, vector<128x128xbf16>, vector<80x128xf32> -> vector<80x128xf32>
    %c0_40 = arith.constant 0 : index
    %c0_41 = arith.constant 0 : index
    %46 = vector.load %arg10[%c0_40, %c0_41] : memref<80x128xf32, #tpu.memory_space<vmem>>, vector<80x128xf32>
    %47 = arith.addf %46, %45 : vector<80x128xf32>
    %c0_42 = arith.constant 0 : index
    %c0_43 = arith.constant 0 : index
    %48 = vector.load %arg10[%c0_42, %c0_43] : memref<80x128xf32, #tpu.memory_space<vmem>>, vector<80x128xf32>
    tpu.vector_store %arg10[%c0_42, %c0_43], %47 {strides = array<i32>} : memref<80x128xf32, #tpu.memory_space<vmem>>, vector<80x128xf32>,
    %c0_44 = arith.constant 0 : index
    %c3_45 = arith.constant 3 : index
    %c0_46 = arith.constant 0 : index
    %c0_47 = arith.constant 0 : index
    %49 = vector.load %arg1[%c0_44, %c3_45, %c0_46, %c0_47] : memref<1x4x110x128xbf16, #tpu.memory_space<vmem>>, vector<1x1x80x128xbf16>
    %50 = vector.shape_cast %49 : vector<1x1x80x128xbf16> to vector<80x128xbf16>
    %c4 = arith.constant 4 : index
    %c0_48 = arith.constant 0 : index
    %c0_49 = arith.constant 0 : index
    %51 = vector.load %arg2[%c4, %c0_48, %c0_49] : memref<9x128x128xbf16, #tpu.memory_space<vmem>>, vector<1x128x128xbf16>
    %52 = vector.shape_cast %51 : vector<1x128x128xbf16> to vector<128x128xbf16>
    %cst_50 = arith.constant dense<0.000000e+00> : vector<80x128xf32>
    %53 = tpu.matmul %50, %52, %cst_50 {dimension_numbers = #tpu.dot_dimension_numbers<[1], [0], [0], [1], [0, 0, 1, 1], [], []>} : vector<80x128xbf16>, vector<128x128xbf16>, vector<80x128xf32> -> vector<80x128xf32>
    %c0_51 = arith.constant 0 : index
    %c0_52 = arith.constant 0 : index
    %54 = vector.load %arg10[%c0_51, %c0_52] : memref<80x128xf32, #tpu.memory_space<vmem>>, vector<80x128xf32>
    %55 = arith.addf %54, %53 : vector<80x128xf32>
    %c0_53 = arith.constant 0 : index
    %c0_54 = arith.constant 0 : index
    %56 = vector.load %arg10[%c0_53, %c0_54] : memref<80x128xf32, #tpu.memory_space<vmem>>, vector<80x128xf32>
    tpu.vector_store %arg10[%c0_53, %c0_54], %55 {strides = array<i32>} : memref<80x128xf32, #tpu.memory_space<vmem>>, vector<80x128xf32>,
    %c0_55 = arith.constant 0 : index
    %c2_56 = arith.constant 2 : index
    %c1_57 = arith.constant 1 : index
    %c0_58 = arith.constant 0 : index
    %57 = vector.load %arg1[%c0_55, %c2_56, %c1_57, %c0_58] : memref<1x4x110x128xbf16, #tpu.memory_space<vmem>>, vector<1x1x80x128xbf16>
    %58 = vector.shape_cast %57 : vector<1x1x80x128xbf16> to vector<80x128xbf16>
    %c5 = arith.constant 5 : index
    %c0_59 = arith.constant 0 : index
    %c0_60 = arith.constant 0 : index
    %59 = vector.load %arg2[%c5, %c0_59, %c0_60] : memref<9x128x128xbf16, #tpu.memory_space<vmem>>, vector<1x128x128xbf16>
    %60 = vector.shape_cast %59 : vector<1x128x128xbf16> to vector<128x128xbf16>
    %cst_61 = arith.constant dense<0.000000e+00> : vector<80x128xf32>
    %61 = tpu.matmul %58, %60, %cst_61 {dimension_numbers = #tpu.dot_dimension_numbers<[1], [0], [0], [1], [0, 0, 1, 1], [], []>} : vector<80x128xbf16>, vector<128x128xbf16>, vector<80x128xf32> -> vector<80x128xf32>
    %c0_62 = arith.constant 0 : index
    %c0_63 = arith.constant 0 : index
    %62 = vector.load %arg10[%c0_62, %c0_63] : memref<80x128xf32, #tpu.memory_space<vmem>>, vector<80x128xf32>
    %63 = arith.addf %62, %61 : vector<80x128xf32>
    %c0_64 = arith.constant 0 : index
    %c0_65 = arith.constant 0 : index
    %64 = vector.load %arg10[%c0_64, %c0_65] : memref<80x128xf32, #tpu.memory_space<vmem>>, vector<80x128xf32>
    tpu.vector_store %arg10[%c0_64, %c0_65], %63 {strides = array<i32>} : memref<80x128xf32, #tpu.memory_space<vmem>>, vector<80x128xf32>,
    %c0_66 = arith.constant 0 : index
    %c0_67 = arith.constant 0 : index
    %c10 = arith.constant 10 : index
    %c0_68 = arith.constant 0 : index
    %65 = vector.load %arg1[%c0_66, %c0_67, %c10, %c0_68] : memref<1x4x110x128xbf16, #tpu.memory_space<vmem>>, vector<1x1x80x128xbf16>
    %66 = vector.shape_cast %65 : vector<1x1x80x128xbf16> to vector<80x128xbf16>
    %c6 = arith.constant 6 : index
    %c0_69 = arith.constant 0 : index
    %c0_70 = arith.constant 0 : index
    %67 = vector.load %arg2[%c6, %c0_69, %c0_70] : memref<9x128x128xbf16, #tpu.memory_space<vmem>>, vector<1x128x128xbf16>
    %68 = vector.shape_cast %67 : vector<1x128x128xbf16> to vector<128x128xbf16>
    %cst_71 = arith.constant dense<0.000000e+00> : vector<80x128xf32>
    %69 = tpu.matmul %66, %68, %cst_71 {dimension_numbers = #tpu.dot_dimension_numbers<[1], [0], [0], [1], [0, 0, 1, 1], [], []>} : vector<80x128xbf16>, vector<128x128xbf16>, vector<80x128xf32> -> vector<80x128xf32>
    %c0_72 = arith.constant 0 : index
    %c0_73 = arith.constant 0 : index
    %70 = vector.load %arg10[%c0_72, %c0_73] : memref<80x128xf32, #tpu.memory_space<vmem>>, vector<80x128xf32>
    %71 = arith.addf %70, %69 : vector<80x128xf32>
    %c0_74 = arith.constant 0 : index
    %c0_75 = arith.constant 0 : index
    %72 = vector.load %arg10[%c0_74, %c0_75] : memref<80x128xf32, #tpu.memory_space<vmem>>, vector<80x128xf32>
    tpu.vector_store %arg10[%c0_74, %c0_75], %71 {strides = array<i32>} : memref<80x128xf32, #tpu.memory_space<vmem>>, vector<80x128xf32>,
    %c0_76 = arith.constant 0 : index
    %c1_77 = arith.constant 1 : index
    %c10_78 = arith.constant 10 : index
    %c0_79 = arith.constant 0 : index
    %73 = vector.load %arg1[%c0_76, %c1_77, %c10_78, %c0_79] : memref<1x4x110x128xbf16, #tpu.memory_space<vmem>>, vector<1x1x80x128xbf16>
    %74 = vector.shape_cast %73 : vector<1x1x80x128xbf16> to vector<80x128xbf16>
    %c7 = arith.constant 7 : index
    %c0_80 = arith.constant 0 : index
    %c0_81 = arith.constant 0 : index
    %75 = vector.load %arg2[%c7, %c0_80, %c0_81] : memref<9x128x128xbf16, #tpu.memory_space<vmem>>, vector<1x128x128xbf16>
    %76 = vector.shape_cast %75 : vector<1x128x128xbf16> to vector<128x128xbf16>
    %cst_82 = arith.constant dense<0.000000e+00> : vector<80x128xf32>
    %77 = tpu.matmul %74, %76, %cst_82 {dimension_numbers = #tpu.dot_dimension_numbers<[1], [0], [0], [1], [0, 0, 1, 1], [], []>} : vector<80x128xbf16>, vector<128x128xbf16>, vector<80x128xf32> -> vector<80x128xf32>
    %c0_83 = arith.constant 0 : index
    %c0_84 = arith.constant 0 : index
    %78 = vector.load %arg10[%c0_83, %c0_84] : memref<80x128xf32, #tpu.memory_space<vmem>>, vector<80x128xf32>
    %79 = arith.addf %78, %77 : vector<80x128xf32>
    %c0_85 = arith.constant 0 : index
    %c0_86 = arith.constant 0 : index
    %80 = vector.load %arg10[%c0_85, %c0_86] : memref<80x128xf32, #tpu.memory_space<vmem>>, vector<80x128xf32>
    tpu.vector_store %arg10[%c0_85, %c0_86], %79 {strides = array<i32>} : memref<80x128xf32, #tpu.memory_space<vmem>>, vector<80x128xf32>,
    %c0_87 = arith.constant 0 : index
    %c0_88 = arith.constant 0 : index
    %c11 = arith.constant 11 : index
    %c0_89 = arith.constant 0 : index
    %81 = vector.load %arg1[%c0_87, %c0_88, %c11, %c0_89] : memref<1x4x110x128xbf16, #tpu.memory_space<vmem>>, vector<1x1x80x128xbf16>
    %82 = vector.shape_cast %81 : vector<1x1x80x128xbf16> to vector<80x128xbf16>
    %c8 = arith.constant 8 : index
    %c0_90 = arith.constant 0 : index
    %c0_91 = arith.constant 0 : index
    %83 = vector.load %arg2[%c8, %c0_90, %c0_91] : memref<9x128x128xbf16, #tpu.memory_space<vmem>>, vector<1x128x128xbf16>
    %84 = vector.shape_cast %83 : vector<1x128x128xbf16> to vector<128x128xbf16>
    %cst_92 = arith.constant dense<0.000000e+00> : vector<80x128xf32>
    %85 = tpu.matmul %82, %84, %cst_92 {dimension_numbers = #tpu.dot_dimension_numbers<[1], [0], [0], [1], [0, 0, 1, 1], [], []>} : vector<80x128xbf16>, vector<128x128xbf16>, vector<80x128xf32> -> vector<80x128xf32>
    %c0_93 = arith.constant 0 : index
    %c0_94 = arith.constant 0 : index
    %86 = vector.load %arg10[%c0_93, %c0_94] : memref<80x128xf32, #tpu.memory_space<vmem>>, vector<80x128xf32>
    %87 = arith.addf %86, %85 : vector<80x128xf32>
    %c0_95 = arith.constant 0 : index
    %c0_96 = arith.constant 0 : index
    %88 = vector.load %arg10[%c0_95, %c0_96] : memref<80x128xf32, #tpu.memory_space<vmem>>, vector<80x128xf32>
    tpu.vector_store %arg10[%c0_95, %c0_96], %87 {strides = array<i32>} : memref<80x128xf32, #tpu.memory_space<vmem>>, vector<80x128xf32>,
    %c0_97 = arith.constant 0 : index
    %c0_98 = arith.constant 0 : index
    %89 = vector.load %arg10[%c0_97, %c0_98] : memref<80x128xf32, #tpu.memory_space<vmem>>, vector<80x128xf32>
    %c0_99 = arith.constant 0 : index
    %c0_100 = arith.constant 0 : index
    %90 = vector.load %arg3[%c0_99, %c0_100] : memref<1x128xf32, #tpu.memory_space<vmem>>, vector<1x128xf32>
    %91 = vector.broadcast %90 : vector<1x128xf32> to vector<80x128xf32>
    %92 = arith.addf %89, %91 : vector<80x128xf32>
    %cst_101 = arith.constant 0.000000e+00 : f32
    %93 = vector.broadcast %cst_101 : f32 to vector<80x128xf32>
    %94 = arith.maximumf %92, %93 : vector<80x128xf32>
    %cst_102 = arith.constant 0.000000e+00 : f32
    %95 = vector.shape_cast %18 : vector<80x1xi1> to vector<80x1xi1>
    %96 = vector.broadcast %95 : vector<80x1xi1> to vector<80x128xi1>
    %97 = vector.broadcast %cst_102 : f32 to vector<80x128xf32>
    %98 = arith.select %96, %94, %97 : vector<80x128xi1>, vector<80x128xf32>
    %99 = arith.truncf %98 : vector<80x128xf32> to vector<80x128xbf16>
    %cst_103 = arith.constant 0.000000e+00 : bf16
    %100 = vector.broadcast %cst_103 : bf16 to vector<11x128xbf16>
    %c0_104 = arith.constant 0 : index
    %c0_105 = arith.constant 0 : index
    %101 = vector.load %arg9[%c0_104, %c0_105] : memref<110x128xbf16, #tpu.memory_space<vmem>>, vector<11x128xbf16>
    tpu.vector_store %arg9[%c0_104, %c0_105], %100 {strides = array<i32>} : memref<110x128xbf16, #tpu.memory_space<vmem>>, vector<11x128xbf16>,
    %cst_106 = arith.constant 0.000000e+00 : bf16
    %102 = vector.broadcast %cst_106 : bf16 to vector<19x128xbf16>
    %c91 = arith.constant 91 : index
    %c0_107 = arith.constant 0 : index
    %103 = vector.load %arg9[%c91, %c0_107] : memref<110x128xbf16, #tpu.memory_space<vmem>>, vector<19x128xbf16>
    tpu.vector_store %arg9[%c91, %c0_107], %102 {strides = array<i32>} : memref<110x128xbf16, #tpu.memory_space<vmem>>, vector<19x128xbf16>,
    %c11_108 = arith.constant 11 : index
    %c0_109 = arith.constant 0 : index
    %104 = vector.load %arg9[%c11_108, %c0_109] : memref<110x128xbf16, #tpu.memory_space<vmem>>, vector<80x128xbf16>
    tpu.vector_store %arg9[%c11_108, %c0_109], %99 {strides = array<i32>} : memref<110x128xbf16, #tpu.memory_space<vmem>>, vector<80x128xbf16>,
    %c0_110 = arith.constant 0 : index
    %c0_111 = arith.constant 0 : index
    %105 = vector.load %arg9[%c0_110, %c0_111] : memref<110x128xbf16, #tpu.memory_space<vmem>>, vector<80x128xbf16>
    %c0_112 = arith.constant 0 : index
    %c0_113 = arith.constant 0 : index
    %c0_114 = arith.constant 0 : index
    %106 = vector.load %arg4[%c0_112, %c0_113, %c0_114] : memref<9x128x128xbf16, #tpu.memory_space<vmem>>, vector<1x128x128xbf16>
    %107 = vector.shape_cast %106 : vector<1x128x128xbf16> to vector<128x128xbf16>
    %cst_115 = arith.constant dense<0.000000e+00> : vector<80x128xf32>
    %108 = tpu.matmul %105, %107, %cst_115 {dimension_numbers = #tpu.dot_dimension_numbers<[1], [0], [0], [1], [0, 0, 1, 1], [], []>} : vector<80x128xbf16>, vector<128x128xbf16>, vector<80x128xf32> -> vector<80x128xf32>
    %c0_116 = arith.constant 0 : index
    %c0_117 = arith.constant 0 : index
    %109 = vector.load %arg10[%c0_116, %c0_117] : memref<80x128xf32, #tpu.memory_space<vmem>>, vector<80x128xf32>
    tpu.vector_store %arg10[%c0_116, %c0_117], %108 {strides = array<i32>} : memref<80x128xf32, #tpu.memory_space<vmem>>, vector<80x128xf32>,
    %c1_118 = arith.constant 1 : index
    %c0_119 = arith.constant 0 : index
    %110 = vector.load %arg9[%c1_118, %c0_119] : memref<110x128xbf16, #tpu.memory_space<vmem>>, vector<80x128xbf16>
    %c1_120 = arith.constant 1 : index
    %c0_121 = arith.constant 0 : index
    %c0_122 = arith.constant 0 : index
    %111 = vector.load %arg4[%c1_120, %c0_121, %c0_122] : memref<9x128x128xbf16, #tpu.memory_space<vmem>>, vector<1x128x128xbf16>
    %112 = vector.shape_cast %111 : vector<1x128x128xbf16> to vector<128x128xbf16>
    %cst_123 = arith.constant dense<0.000000e+00> : vector<80x128xf32>
    %113 = tpu.matmul %110, %112, %cst_123 {dimension_numbers = #tpu.dot_dimension_numbers<[1], [0], [0], [1], [0, 0, 1, 1], [], []>} : vector<80x128xbf16>, vector<128x128xbf16>, vector<80x128xf32> -> vector<80x128xf32>
    %c0_124 = arith.constant 0 : index
    %c0_125 = arith.constant 0 : index
    %114 = vector.load %arg10[%c0_124, %c0_125] : memref<80x128xf32, #tpu.memory_space<vmem>>, vector<80x128xf32>
    %115 = arith.addf %114, %113 : vector<80x128xf32>
    %c0_126 = arith.constant 0 : index
    %c0_127 = arith.constant 0 : index
    %116 = vector.load %arg10[%c0_126, %c0_127] : memref<80x128xf32, #tpu.memory_space<vmem>>, vector<80x128xf32>
    tpu.vector_store %arg10[%c0_126, %c0_127], %115 {strides = array<i32>} : memref<80x128xf32, #tpu.memory_space<vmem>>, vector<80x128xf32>,
    %c2_128 = arith.constant 2 : index
    %c0_129 = arith.constant 0 : index
    %117 = vector.load %arg9[%c2_128, %c0_129] : memref<110x128xbf16, #tpu.memory_space<vmem>>, vector<80x128xbf16>
    %c2_130 = arith.constant 2 : index
    %c0_131 = arith.constant 0 : index
    %c0_132 = arith.constant 0 : index
    %118 = vector.load %arg4[%c2_130, %c0_131, %c0_132] : memref<9x128x128xbf16, #tpu.memory_space<vmem>>, vector<1x128x128xbf16>
    %119 = vector.shape_cast %118 : vector<1x128x128xbf16> to vector<128x128xbf16>
    %cst_133 = arith.constant dense<0.000000e+00> : vector<80x128xf32>
    %120 = tpu.matmul %117, %119, %cst_133 {dimension_numbers = #tpu.dot_dimension_numbers<[1], [0], [0], [1], [0, 0, 1, 1], [], []>} : vector<80x128xbf16>, vector<128x128xbf16>, vector<80x128xf32> -> vector<80x128xf32>
    %c0_134 = arith.constant 0 : index
    %c0_135 = arith.constant 0 : index
    %121 = vector.load %arg10[%c0_134, %c0_135] : memref<80x128xf32, #tpu.memory_space<vmem>>, vector<80x128xf32>
    %122 = arith.addf %121, %120 : vector<80x128xf32>
    %c0_136 = arith.constant 0 : index
    %c0_137 = arith.constant 0 : index
    %123 = vector.load %arg10[%c0_136, %c0_137] : memref<80x128xf32, #tpu.memory_space<vmem>>, vector<80x128xf32>
    tpu.vector_store %arg10[%c0_136, %c0_137], %122 {strides = array<i32>} : memref<80x128xf32, #tpu.memory_space<vmem>>, vector<80x128xf32>,
    %c10_138 = arith.constant 10 : index
    %c0_139 = arith.constant 0 : index
    %124 = vector.load %arg9[%c10_138, %c0_139] : memref<110x128xbf16, #tpu.memory_space<vmem>>, vector<80x128xbf16>
    %c3_140 = arith.constant 3 : index
    %c0_141 = arith.constant 0 : index
    %c0_142 = arith.constant 0 : index
    %125 = vector.load %arg4[%c3_140, %c0_141, %c0_142] : memref<9x128x128xbf16, #tpu.memory_space<vmem>>, vector<1x128x128xbf16>
    %126 = vector.shape_cast %125 : vector<1x128x128xbf16> to vector<128x128xbf16>
    %cst_143 = arith.constant dense<0.000000e+00> : vector<80x128xf32>
    %127 = tpu.matmul %124, %126, %cst_143 {dimension_numbers = #tpu.dot_dimension_numbers<[1], [0], [0], [1], [0, 0, 1, 1], [], []>} : vector<80x128xbf16>, vector<128x128xbf16>, vector<80x128xf32> -> vector<80x128xf32>
    %c0_144 = arith.constant 0 : index
    %c0_145 = arith.constant 0 : index
    %128 = vector.load %arg10[%c0_144, %c0_145] : memref<80x128xf32, #tpu.memory_space<vmem>>, vector<80x128xf32>
    %129 = arith.addf %128, %127 : vector<80x128xf32>
    %c0_146 = arith.constant 0 : index
    %c0_147 = arith.constant 0 : index
    %130 = vector.load %arg10[%c0_146, %c0_147] : memref<80x128xf32, #tpu.memory_space<vmem>>, vector<80x128xf32>
    tpu.vector_store %arg10[%c0_146, %c0_147], %129 {strides = array<i32>} : memref<80x128xf32, #tpu.memory_space<vmem>>, vector<80x128xf32>,
    %c11_148 = arith.constant 11 : index
    %c0_149 = arith.constant 0 : index
    %131 = vector.load %arg9[%c11_148, %c0_149] : memref<110x128xbf16, #tpu.memory_space<vmem>>, vector<80x128xbf16>
    %c4_150 = arith.constant 4 : index
    %c0_151 = arith.constant 0 : index
    %c0_152 = arith.constant 0 : index
    %132 = vector.load %arg4[%c4_150, %c0_151, %c0_152] : memref<9x128x128xbf16, #tpu.memory_space<vmem>>, vector<1x128x128xbf16>
    %133 = vector.shape_cast %132 : vector<1x128x128xbf16> to vector<128x128xbf16>
    %cst_153 = arith.constant dense<0.000000e+00> : vector<80x128xf32>
    %134 = tpu.matmul %131, %133, %cst_153 {dimension_numbers = #tpu.dot_dimension_numbers<[1], [0], [0], [1], [0, 0, 1, 1], [], []>} : vector<80x128xbf16>, vector<128x128xbf16>, vector<80x128xf32> -> vector<80x128xf32>
    %c0_154 = arith.constant 0 : index
    %c0_155 = arith.constant 0 : index
    %135 = vector.load %arg10[%c0_154, %c0_155] : memref<80x128xf32, #tpu.memory_space<vmem>>, vector<80x128xf32>
    %136 = arith.addf %135, %134 : vector<80x128xf32>
    %c0_156 = arith.constant 0 : index
    %c0_157 = arith.constant 0 : index
    %137 = vector.load %arg10[%c0_156, %c0_157] : memref<80x128xf32, #tpu.memory_space<vmem>>, vector<80x128xf32>
    tpu.vector_store %arg10[%c0_156, %c0_157], %136 {strides = array<i32>} : memref<80x128xf32, #tpu.memory_space<vmem>>, vector<80x128xf32>,
    %c12 = arith.constant 12 : index
    %c0_158 = arith.constant 0 : index
    %138 = vector.load %arg9[%c12, %c0_158] : memref<110x128xbf16, #tpu.memory_space<vmem>>, vector<80x128xbf16>
    %c5_159 = arith.constant 5 : index
    %c0_160 = arith.constant 0 : index
    %c0_161 = arith.constant 0 : index
    %139 = vector.load %arg4[%c5_159, %c0_160, %c0_161] : memref<9x128x128xbf16, #tpu.memory_space<vmem>>, vector<1x128x128xbf16>
    %140 = vector.shape_cast %139 : vector<1x128x128xbf16> to vector<128x128xbf16>
    %cst_162 = arith.constant dense<0.000000e+00> : vector<80x128xf32>
    %141 = tpu.matmul %138, %140, %cst_162 {dimension_numbers = #tpu.dot_dimension_numbers<[1], [0], [0], [1], [0, 0, 1, 1], [], []>} : vector<80x128xbf16>, vector<128x128xbf16>, vector<80x128xf32> -> vector<80x128xf32>
    %c0_163 = arith.constant 0 : index
    %c0_164 = arith.constant 0 : index
    %142 = vector.load %arg10[%c0_163, %c0_164] : memref<80x128xf32, #tpu.memory_space<vmem>>, vector<80x128xf32>
    %143 = arith.addf %142, %141 : vector<80x128xf32>
    %c0_165 = arith.constant 0 : index
    %c0_166 = arith.constant 0 : index
    %144 = vector.load %arg10[%c0_165, %c0_166] : memref<80x128xf32, #tpu.memory_space<vmem>>, vector<80x128xf32>
    tpu.vector_store %arg10[%c0_165, %c0_166], %143 {strides = array<i32>} : memref<80x128xf32, #tpu.memory_space<vmem>>, vector<80x128xf32>,
    %c20 = arith.constant 20 : index
    %c0_167 = arith.constant 0 : index
    %145 = vector.load %arg9[%c20, %c0_167] : memref<110x128xbf16, #tpu.memory_space<vmem>>, vector<80x128xbf16>
    %c6_168 = arith.constant 6 : index
    %c0_169 = arith.constant 0 : index
    %c0_170 = arith.constant 0 : index
    %146 = vector.load %arg4[%c6_168, %c0_169, %c0_170] : memref<9x128x128xbf16, #tpu.memory_space<vmem>>, vector<1x128x128xbf16>
    %147 = vector.shape_cast %146 : vector<1x128x128xbf16> to vector<128x128xbf16>
    %cst_171 = arith.constant dense<0.000000e+00> : vector<80x128xf32>
    %148 = tpu.matmul %145, %147, %cst_171 {dimension_numbers = #tpu.dot_dimension_numbers<[1], [0], [0], [1], [0, 0, 1, 1], [], []>} : vector<80x128xbf16>, vector<128x128xbf16>, vector<80x128xf32> -> vector<80x128xf32>
    %c0_172 = arith.constant 0 : index
    %c0_173 = arith.constant 0 : index
    %149 = vector.load %arg10[%c0_172, %c0_173] : memref<80x128xf32, #tpu.memory_space<vmem>>, vector<80x128xf32>
    %150 = arith.addf %149, %148 : vector<80x128xf32>
    %c0_174 = arith.constant 0 : index
    %c0_175 = arith.constant 0 : index
    %151 = vector.load %arg10[%c0_174, %c0_175] : memref<80x128xf32, #tpu.memory_space<vmem>>, vector<80x128xf32>
    tpu.vector_store %arg10[%c0_174, %c0_175], %150 {strides = array<i32>} : memref<80x128xf32, #tpu.memory_space<vmem>>, vector<80x128xf32>,
    %c21 = arith.constant 21 : index
    %c0_176 = arith.constant 0 : index
    %152 = vector.load %arg9[%c21, %c0_176] : memref<110x128xbf16, #tpu.memory_space<vmem>>, vector<80x128xbf16>
    %c7_177 = arith.constant 7 : index
    %c0_178 = arith.constant 0 : index
    %c0_179 = arith.constant 0 : index
    %153 = vector.load %arg4[%c7_177, %c0_178, %c0_179] : memref<9x128x128xbf16, #tpu.memory_space<vmem>>, vector<1x128x128xbf16>
    %154 = vector.shape_cast %153 : vector<1x128x128xbf16> to vector<128x128xbf16>
    %cst_180 = arith.constant dense<0.000000e+00> : vector<80x128xf32>
    %155 = tpu.matmul %152, %154, %cst_180 {dimension_numbers = #tpu.dot_dimension_numbers<[1], [0], [0], [1], [0, 0, 1, 1], [], []>} : vector<80x128xbf16>, vector<128x128xbf16>, vector<80x128xf32> -> vector<80x128xf32>
    %c0_181 = arith.constant 0 : index
    %c0_182 = arith.constant 0 : index
    %156 = vector.load %arg10[%c0_181, %c0_182] : memref<80x128xf32, #tpu.memory_space<vmem>>, vector<80x128xf32>
    %157 = arith.addf %156, %155 : vector<80x128xf32>
    %c0_183 = arith.constant 0 : index
    %c0_184 = arith.constant 0 : index
    %158 = vector.load %arg10[%c0_183, %c0_184] : memref<80x128xf32, #tpu.memory_space<vmem>>, vector<80x128xf32>
    tpu.vector_store %arg10[%c0_183, %c0_184], %157 {strides = array<i32>} : memref<80x128xf32, #tpu.memory_space<vmem>>, vector<80x128xf32>,
    %c22 = arith.constant 22 : index
    %c0_185 = arith.constant 0 : index
    %159 = vector.load %arg9[%c22, %c0_185] : memref<110x128xbf16, #tpu.memory_space<vmem>>, vector<80x128xbf16>
    %c8_186 = arith.constant 8 : index
    %c0_187 = arith.constant 0 : index
    %c0_188 = arith.constant 0 : index
    %160 = vector.load %arg4[%c8_186, %c0_187, %c0_188] : memref<9x128x128xbf16, #tpu.memory_space<vmem>>, vector<1x128x128xbf16>
    %161 = vector.shape_cast %160 : vector<1x128x128xbf16> to vector<128x128xbf16>
    %cst_189 = arith.constant dense<0.000000e+00> : vector<80x128xf32>
    %162 = tpu.matmul %159, %161, %cst_189 {dimension_numbers = #tpu.dot_dimension_numbers<[1], [0], [0], [1], [0, 0, 1, 1], [], []>} : vector<80x128xbf16>, vector<128x128xbf16>, vector<80x128xf32> -> vector<80x128xf32>
    %c0_190 = arith.constant 0 : index
    %c0_191 = arith.constant 0 : index
    %163 = vector.load %arg10[%c0_190, %c0_191] : memref<80x128xf32, #tpu.memory_space<vmem>>, vector<80x128xf32>
    %164 = arith.addf %163, %162 : vector<80x128xf32>
    %c0_192 = arith.constant 0 : index
    %c0_193 = arith.constant 0 : index
    %165 = vector.load %arg10[%c0_192, %c0_193] : memref<80x128xf32, #tpu.memory_space<vmem>>, vector<80x128xf32>
    tpu.vector_store %arg10[%c0_192, %c0_193], %164 {strides = array<i32>} : memref<80x128xf32, #tpu.memory_space<vmem>>, vector<80x128xf32>,
    %c0_194 = arith.constant 0 : index
    %c0_195 = arith.constant 0 : index
    %166 = vector.load %arg10[%c0_194, %c0_195] : memref<80x128xf32, #tpu.memory_space<vmem>>, vector<80x128xf32>
    %c0_196 = arith.constant 0 : index
    %c0_197 = arith.constant 0 : index
    %167 = vector.load %arg5[%c0_196, %c0_197] : memref<1x128xf32, #tpu.memory_space<vmem>>, vector<1x128xf32>
    %168 = vector.broadcast %167 : vector<1x128xf32> to vector<80x128xf32>
    %169 = arith.addf %166, %168 : vector<80x128xf32>
    %c0_198 = arith.constant 0 : index
    %c3_199 = arith.constant 3 : index
    %c0_200 = arith.constant 0 : index
    %c0_201 = arith.constant 0 : index
    %170 = vector.load %arg1[%c0_198, %c3_199, %c0_200, %c0_201] : memref<1x4x110x128xbf16, #tpu.memory_space<vmem>>, vector<1x1x80x128xbf16>
    %171 = vector.shape_cast %170 : vector<1x1x80x128xbf16> to vector<80x128xbf16>
    %c0_202 = arith.constant 0 : index
    %c0_203 = arith.constant 0 : index
    %172 = vector.load %arg6[%c0_202, %c0_203] : memref<128x128xbf16, #tpu.memory_space<vmem>>, vector<128x128xbf16>
    %cst_204 = arith.constant dense<0.000000e+00> : vector<80x128xf32>
    %173 = tpu.matmul %171, %172, %cst_204 {dimension_numbers = #tpu.dot_dimension_numbers<[1], [0], [0], [1], [0, 0, 1, 1], [], []>} : vector<80x128xbf16>, vector<128x128xbf16>, vector<80x128xf32> -> vector<80x128xf32>
    %174 = arith.addf %169, %173 : vector<80x128xf32>
    %c0_205 = arith.constant 0 : index
    %c0_206 = arith.constant 0 : index
    %175 = vector.load %arg7[%c0_205, %c0_206] : memref<1x128xf32, #tpu.memory_space<vmem>>, vector<1x128xf32>
    %176 = vector.broadcast %175 : vector<1x128xf32> to vector<80x128xf32>
    %177 = arith.addf %174, %176 : vector<80x128xf32>
    %cst_207 = arith.constant 0.000000e+00 : f32
    %178 = vector.broadcast %cst_207 : f32 to vector<80x128xf32>
    %179 = arith.maximumf %177, %178 : vector<80x128xf32>
    %180 = arith.truncf %179 : vector<80x128xf32> to vector<80x128xbf16>
    %c0_208 = arith.constant 0 : index
    %c0_209 = arith.constant 0 : index
    %c0_210 = arith.constant 0 : index
    %181 = vector.load %arg8[%c0_208, %c0_209, %c0_210] : memref<1x80x128xbf16, #tpu.memory_space<vmem>>, vector<1x80x128xbf16>
    %182 = vector.shape_cast %181 : vector<1x80x128xbf16> to vector<80x128xbf16>
    %183 = vector.shape_cast %180 : vector<80x128xbf16> to vector<1x80x128xbf16>
    tpu.vector_store %arg8[%c0_208, %c0_209, %c0_210], %183 {strides = array<i32>} : memref<1x80x128xbf16, #tpu.memory_space<vmem>>, vector<1x80x128xbf16>,
    return
  }
  func.func @transform_0(%arg0: i32) -> (i32, i32, i32, i32) {
    %c0_i32 = arith.constant 0 : i32
    %c0_i32_0 = arith.constant 0 : i32
    %c0_i32_1 = arith.constant 0 : i32
    %c0_i32_2 = arith.constant 0 : i32
    return %arg0, %c0_i32, %c0_i32_0, %c0_i32_1 : i32, i32, i32, i32
  }
  func.func @transform_1(%arg0: i32) -> (i32, i32, i32) {
    %c0_i32 = arith.constant 0 : i32
    %c0_i32_0 = arith.constant 0 : i32
    %c0_i32_1 = arith.constant 0 : i32
    %c0_i32_2 = arith.constant 0 : i32
    return %c0_i32, %c0_i32_0, %c0_i32_1 : i32, i32, i32
  }
  func.func @transform_2(%arg0: i32) -> (i32, i32) {
    %c0_i32 = arith.constant 0 : i32
    %c0_i32_0 = arith.constant 0 : i32
    %c0_i32_1 = arith.constant 0 : i32
    return %c0_i32, %c0_i32_0 : i32, i32
  }
  func.func @transform_3(%arg0: i32) -> (i32, i32, i32) {
    %c0_i32 = arith.constant 0 : i32
    %c0_i32_0 = arith.constant 0 : i32
    %c0_i32_1 = arith.constant 0 : i32
    %c0_i32_2 = arith.constant 0 : i32
    return %c0_i32, %c0_i32_0, %c0_i32_1 : i32, i32, i32
  }
  func.func @transform_4(%arg0: i32) -> (i32, i32) {
    %c0_i32 = arith.constant 0 : i32
    %c0_i32_0 = arith.constant 0 : i32
    %c0_i32_1 = arith.constant 0 : i32
    return %c0_i32, %c0_i32_0 : i32, i32
  }
  func.func @transform_5(%arg0: i32) -> (i32, i32) {
    %c0_i32 = arith.constant 0 : i32
    %c0_i32_0 = arith.constant 0 : i32
    %c0_i32_1 = arith.constant 0 : i32
    return %c0_i32, %c0_i32_0 : i32, i32
  }
  func.func @transform_6(%arg0: i32) -> (i32, i32) {
    %c0_i32 = arith.constant 0 : i32
    %c0_i32_0 = arith.constant 0 : i32
    %c0_i32_1 = arith.constant 0 : i32
    return %c0_i32, %c0_i32_0 : i32, i32
  }
  func.func @transform_7(%arg0: i32) -> (i32, i32, i32) {
    %c0_i32 = arith.constant 0 : i32
    %c0_i32_0 = arith.constant 0 : i32
    %c0_i32_1 = arith.constant 0 : i32
    return %arg0, %c0_i32, %c0_i32_0 : i32, i32, i32
  }
}

</mosaic_0001>

<bundles_post_ra>
// kernel: basic_block_forward.1
= control target key start
LH: loop header
LB: loop body
LE: loop exit
PB: predicated region body
PF: predicated region fallthrough
CT: control target
= control target key end

     0   :  { %s7127_s24 = smov 0   ;;  %s8678_s0 = inlined_call_operand.vmem [shape: bf16[2,4,110,128], index: 0, kind: input, shape index: {}]   ;;  %s8679_s1 = inlined_call_operand.vmem [shape: bf16[9,128,128], index: 1, kind: input, shape index: {}]   ;;  %s8680_s2 = inlined_call_operand.vmem [shape: f32[1,128], index: 2, kind: input, shape index: {}]   ;;  %s8681_s3 = inlined_call_operand.vmem [shape: bf16[9,128,128], index: 3, kind: input, shape index: {}]   ;;  %s8682_s4 = inlined_call_operand.vmem [shape: f32[1,128], index: 4, kind: input, shape index: {}]   ;;  %s8683_s5 = inlined_call_operand.vmem [shape: bf16[128,128], index: 5, kind: input, shape index: {}]   ;;  %s8684_s6 = inlined_call_operand.vmem [shape: f32[1,128], index: 6, kind: input, shape index: {}]   ;;  %s8685_s7 = inlined_call_operand.vmem [shape: bf16[2,80,128], index: 7, kind: output, shape index: {}]  }
   0x1 LB: > { %s5177_s25 = sadd.s32 4294967295, %s7082_s24   ;;  %p5181_p0 = scmp.ge.s32.totalorder %s7082_s24, 1  ;;  %s7082_s24 = sphi %s7127_s24, %s17_s24  }
   0x2   : > { %p237_p1 = scmp.lt.s32.totalorder %s7082_s24, 3 }
   0x4   : > { %p238_p2 = pnand %p5181_p0, %p237_p1 }
   0x5   : > { %v6816_v0 = vld [vmem:[%s8679_s1] sm:$0xff] (!%p238_p2)   ;;  %v7084_v1 = vmov (!%p238_p2), 0.0   ;;  %v6818_v3 = vld [vmem:[%s8679_s1 + $0x8] sm:$0xff] (!%p238_p2)   ;;  %vm7085_vm0 = vmmov (!%p238_p2), 0   ;;  %p269_p3 = scmp.lt.s32.totalorder (!%p238_p2), %s5177_s25, 1  ;;  %v6820_v5 = vld [vmem:[%s8679_s1 + $0x10] sm:$0xff] (!%p238_p2)  }
   0x6   : > { %241 = sbr.rel (%p238_p2) target bundleno = 865 (0x361), region = 48  ;;  %6083 = vmatprep.subr.bf16.mxu0 (!%p238_p2), %v7084_v1  ;;  %6119 = vmatprep.subr.bf16.mxu1 (!%p238_p2), %v7084_v1  ;;  %v6817_v2 = vld [vmem:[%s8679_s1 + $0x40] sm:$0xff] (!%p238_p2)   ;;  %v6819_v4 = vld [vmem:[%s8679_s1 + $0x48] sm:$0xff] (!%p238_p2)   ;;  %v6821_v6 = vld [vmem:[%s8679_s1 + $0x50] sm:$0xff] (!%p238_p2)   ;;  %vm913_vm1 = vsmask.f32 (!%p238_p2), 7424 }
   0x7   : > { %6084 = vmatpush3.bf16.msra.mxu0 (!%p238_p2), %v6816_v0  ;;  %6099 = vmatprep.mubr.msk.bf16.mxu0 (!%p238_p2), %vm7085_vm0, %v7084_v1  ;;  %v6822_v7 = vld [vmem:[%s8679_s1 + $0x18] sm:$0xff] (!%p238_p2)   ;;  %v6824_v9 = vld [vmem:[%s8679_s1 + $0x20] sm:$0xff] (!%p238_p2)   ;;  %v6826_v11 = vld [vmem:[%s8679_s1 + $0x28] sm:$0xff] (!%p238_p2)   ;;  %vm1844_vm2 = vcmask (!%p238_p2), 1046528   ;;  %vm8686_vm3 = vsmask.f32 (!%p238_p2), 6400 }
   0x8   : > { %6120 = vmatpush3.bf16.msra.mxu1 (!%p238_p2), %v6817_v2  ;;  %6085 = vmatprep.subr.bf16.mxu0 (!%p238_p2), %v7084_v1  ;;  %v6823_v8 = vld [vmem:[%s8679_s1 + $0x58] sm:$0xff] (!%p238_p2)   ;;  %v6825_v10 = vld [vmem:[%s8679_s1 + $0x60] sm:$0xff] (!%p238_p2)   ;;  %v6827_v12 = vld [vmem:[%s8679_s1 + $0x68] sm:$0xff] (!%p238_p2)   ;;  %vm2574_vm4 = vcmask (!%p238_p2), 1041408   ;;  %vm2575_vm5 = vsmask.f32 (!%p238_p2), 1280 }
   0x9   : > { %6121 = vmatprep.subr.bf16.mxu1 (!%p238_p2), %v7084_v1  ;;  %6135 = vmatprep.mubr.msk.bf16.mxu1 (!%p238_p2), %vm7085_vm0, %v7084_v1  ;;  %v6828_v13 = vld [vmem:[%s8679_s1 + $0x30] sm:$0xff] (!%p238_p2)   ;;  %v6830_v15 = vld [vmem:[%s8679_s1 + $0x38] sm:$0xff] (!%p238_p2)   ;;  %v6834_v19 = vld [vmem:[%s8679_s1 + $0x80] sm:$0xff] (!%p238_p2)   ;;  %vm2580_vm7 = vcmask (!%p238_p2), 1043457   ;;  %vm2581_vm8 = vsmask.f32 (!%p238_p2), 7942 }
   0xa   : > { %v6829_v14 = vld [vmem:[%s8679_s1 + $0x70] sm:$0xff] (!%p238_p2)   ;;  %v6831_v16 = vld [vmem:[%s8679_s1 + $0x78] sm:$0xff] (!%p238_p2)   ;;  %v6839_v20 = vld [vmem:[%s8679_s1 + $0xc0] sm:$0xff] (!%p238_p2)  }
   0xb   : > { %6086 = vmatpush3.bf16.msra.mxu0 (!%p238_p2), %v6818_v3  ;;  %v6835_v21 = vld [vmem:[%s8679_s1 + $0x88] sm:$0xff] (!%p238_p2)   ;;  %v6838_v25 = vld [vmem:[%s8679_s1 + $0x90] sm:$0xff] (!%p238_p2)   ;;  %v6843_v27 = vld [vmem:[%s8679_s1 + $0x98] sm:$0xff] (!%p238_p2)  }
   0xc   : > { %6122 = vmatpush3.bf16.msra.mxu1 (!%p238_p2), %v6819_v4  ;;  %6087 = vmatprep.subr.bf16.mxu0 (!%p238_p2), %v7084_v1  ;;  %v6840_v23 = vld [vmem:[%s8679_s1 + $0xc8] sm:$0xff] (!%p238_p2)   ;;  %v6844_v26 = vld [vmem:[%s8679_s1 + $0xd0] sm:$0xff] (!%p238_p2)   ;;  %v6846_v29 = vld [vmem:[%s8679_s1 + $0xd8] sm:$0xff] (!%p238_p2)  }
   0xd   : > { %s8737_s25 = smov (!%p269_p3, %s5177_s25), 1  ;;  %6123 = vmatprep.subr.bf16.mxu1 %v7084_v1  ;;  %v6845_v31 = vld [vmem:[%s8679_s1 + $0xa0] sm:$0xff]   ;;  %v6849_v33 = vld [vmem:[%s8679_s1 + $0xa8] sm:$0xff]   ;;  %v6851_v38 = vld [vmem:[%s8679_s1 + $0xb0] sm:$0xff]  }
   0xe   : > { %s6783_s19 = smul.u32 224, %s8737_s25  ;;  %v6850_v32 = vld [vmem:[%s8679_s1 + $0xe0] sm:$0xff]   ;;  %v6852_v35 = vld [vmem:[%s8679_s1 + $0xe8] sm:$0xff]   ;;  %v6855_v39 = vld [vmem:[%s8679_s1 + $0xf0] sm:$0xff]  }
   0xf   : > { %6088 = vmatpush3.bf16.msra.mxu0 %v6820_v5  ;;  %v6856_v43 = vld [vmem:[%s8679_s1 + $0xb8] sm:$0xff]   ;;  %v6860_v52 = vld [vmem:[%s8679_s1 + $0x100] sm:$0xff]   ;;  %v6862_v58 = vld [vmem:[%s8679_s1 + $0x108] sm:$0xff]   ;;  %s6784_s15 = smul.u32 40, %s8737_s25 }
  0x10   : > { %6124 = vmatpush3.bf16.msra.mxu1 %v6821_v6  ;;  %6089 = vmatprep.subr.bf16.mxu0 %v7084_v1  ;;  %s7184_s28 = scalar_lea.vmem %s8678_s0, %s6783_s19  ;;  %v6857_v44 = vld [vmem:[%s8679_s1 + $0xf8] sm:$0xff]   ;;  %v6866_v57 = vld [vmem:[%s8679_s1 + $0x140] sm:$0xff]   ;;  %v6867_v63 = vld [vmem:[%s8679_s1 + $0x148] sm:$0xff]  }
  0x11   : > { %6125 = vmatprep.subr.bf16.mxu1 %v7084_v1  ;;  %v6832_v17 = vld [vmem:[%s7184_s28] sm:$0xff]   ;;  %v6833_v18 = vld [vmem:[%s7184_s28 + $0x38] sm:$0xff]   ;;  %v6836_v22 = vld [vmem:[%s7184_s28 + $0x8] sm:$0xff]   ;;  %s8653_s18 = scalar_lea.vmem %s8685_s7, %s6784_s15 }
  0x12   : > { %v6837_v24 = vld [vmem:[%s7184_s28 + $0x40] sm:$0xff]   ;;  %v6841_v28 = vld [vmem:[%s7184_s28 + $0x10] sm:$0xff]   ;;  %v6842_v30 = vld [vmem:[%s7184_s28 + $0x48] sm:$0xff]  }
  0x13   : > { %6090 = vmatpush3.bf16.msra.mxu0 %v6822_v7  ;;  %v6847_v34 = vld [vmem:[%s7184_s28 + $0x18] sm:$0xff]   ;;  %v6848_v36 = vld [vmem:[%s7184_s28 + $0x50] sm:$0xff]   ;;  %v6858_v37 = vld [vmem:[%s7184_s28] sm:$0xff]  }
  0x14   : > { %6126 = vmatpush3.bf16.msra.mxu1 %v6823_v8  ;;  %6091 = vmatprep.subr.bf16.mxu0 %v7084_v1  ;;  %v6859_v40 = vld [vmem:[%s7184_s28 + $0x8] sm:$0xff]   ;;  %v917_v41 = vshll.u32 %v6858_v37, 16  ;;  %v6853_v42 = vld [vmem:[%s7184_s28 + $0x20] sm:$0xff]   ;;  %v6854_v45 = vld [vmem:[%s7184_s28 + $0x58] sm:$0xff]   ;;  %v915_v46 = vshrl.u32 %v6858_v37, 16 }
  0x15   : > { %6127 = vmatprep.subr.bf16.mxu1 %v7084_v1  ;;  %v922_v48 = vshll.u32 %v6859_v40, 16  ;;  %v6863_v51 = vld [vmem:[%s7184_s28 + $0x10] sm:$0xff]   ;;  %v926_v55 = vshrl.u32 %v6859_v40, 16  ;;  %v6868_v61 = vld [vmem:[%s7184_s28 + $0x18] sm:$0xff]   ;;  %v7405_v40 = vld [vmem:[%s7184_s28 + $0x80] sm:$0xff]  }
  0x16   : > { %v919_v47 = vrot.slane %v917_v41, 1  ;;  %v6861_v53 = vld [vmem:[%s7184_s28 + $0x70] sm:$0xff]   ;;  %v930_v56 = vshll.u32 %v6863_v51, 16  ;;  %v6864_v62 = vld [vmem:[%s7184_s28 + $0x78] sm:$0xff]   ;;  %v934_v3 = vshrl.u32 %v6863_v51, 16  ;;  %v938_v4 = vshll.u32 %v6868_v61, 16  ;;  %vm7753_vm6 = vmand %vm2574_vm4, %vm2575_vm5 }
  0x17   : > { %6092 = vmatpush3.bf16.msra.mxu0 %v6824_v9  ;;  %v924_v50 = vrot.slane %v922_v48, 1  ;;  %v6865_v0 = vld [vmem:[%s8679_s1 + $0x110] sm:$0xff]   ;;  %v6869_v6 = vld [vmem:[%s8679_s1 + $0x118] sm:$0xff]   ;;  %v6874_v9 = vld [vmem:[%s7184_s28 + $0x20] sm:$0xff]  }
  0x18   : > { %6128 = vmatpush3.bf16.msra.mxu1 %v6825_v10  ;;  %6093 = vmatprep.subr.bf16.mxu0 %v7084_v1  ;;  %v920_v49 = vor.u32 %v919_v47, %v915_v46  ;;  %v932_v60 = vrot.slane %v930_v56, 1  ;;  %v6871_v5 = vld [vmem:[%s8679_s1 + $0x150] sm:$0xff]   ;;  %v940_v8 = vrot.slane %v938_v4, 1  ;;  %v6873_v10 = vld [vmem:[%s8679_s1 + $0x158] sm:$0xff]   ;;  %v7411_v41 = vld [vmem:[%s7184_s28 + $0x88] sm:$0xff]   ;;  %v1604_v46 = vshll.u32 %v7405_v40, 16 }
  0x19   : > { %6129 = vmatprep.subr.bf16.mxu1 %v7084_v1  ;;  %v928_v59 = vor.u32 %v926_v55, %v924_v50  ;;  %v7419_v47 = vld [vmem:[%s7184_s28 + $0x90] sm:$0xff]   ;;  %v6886_v48 = vld [vmem:[%s8679_s1 + $0x180] sm:$0xff]   ;;  %vm7759_vm9 = vmand %vm2580_vm7, %vm2581_vm8 }
  0x1a   : > { %v925_v54 = vsel %vm913_vm1, %v920_v49, %v924_v50  ;;  %v936_v7 = vor.u32 %v934_v3, %v932_v60  ;;  %v1612_v49 = vshll.u32 %v7411_v41, 16  ;;  %v1606_v55 = vrot.slane %v1604_v46, 1  ;;  %v7452_v3 = vld [vmem:[%s7184_s28 + $0x44] sm:$0xff]   ;;  %v6892_v4 = vld [vmem:[%s8679_s1 + $0x190] sm:$0xff]  }
  0x1b   : > { %6094 = vmatpush3.bf16.msra.mxu0 %v6826_v11  ;;  %v933_v2 = vsel %vm913_vm1, %v928_v59, %v932_v60  ;;  %v6870_v11 = vld [vmem:[%s7184_s28 + $0x80] sm:$0xff]   ;;  %v1620_v56 = vshll.u32 %v7419_v47, 16  ;;  %v1616_v59 = vshrl.u32 %v7411_v41, 16  ;;  %v6910_v41 = vld [vmem:[%s8679_s1 + $0x1b8] sm:$0xff]  }
  0x1c   : > { %6130 = vmatpush3.bf16.msra.mxu1 %v6827_v12  ;;  %6095 = vmatprep.subr.bf16.mxu0 %v7084_v1  ;;  %v942_v12 = vshrl.u32 %v6868_v61, 16  ;;  %v7441_v61 = vld [vmem:[%s7184_s28 + $0x4] sm:$0xfe]  }
  0x1d   : > { %6131 = vmatprep.subr.bf16.mxu1 %v7084_v1 }
  0x1f   : > { %6096 = vmatpush3.bf16.msra.mxu0 %v6828_v13  ;;  %v941_v13 = vsel %vm913_vm1, %v936_v7, %v940_v8  ;;  %v7466_v7 = vld [vmem:[%s7184_s28 + $0x14] sm:$0xff]  }
  0x20   : > { %6132 = vmatpush3.bf16.msra.mxu1 %v6829_v14  ;;  %6097 = vmatprep.subr.bf16.mxu0 %v7084_v1  ;;  %v6872_v14 = vld [vmem:[%s8679_s1 + $0x120] sm:$0xff]  }
  0x21   : > { %6133 = vmatprep.subr.bf16.mxu1 %v7084_v1 }
  0x23   : > { %6098 = vmatpush3.bf16.msra.mxu0 %v6830_v15  ;;  %v946_v15 = vshll.u32 %v6874_v9, 16 }
  0x24   : > { %6134 = vmatpush3.bf16.msra.mxu1 %v6831_v16  ;;  %6155 = vmatprep.subr.bf16.mxu0 %v7084_v1  ;;  %v6880_v16 = vld [vmem:[%s7184_s28 + $0x28] ss:$0 sps:$4 sm:$0x11]  }
  0x25   : > { %6191 = vmatprep.subr.bf16.mxu1 %v7084_v1 }
  0x26   : > { %6100 = vmatmul.mubr.bf16.vlgmr.msra.gmra.mrb[0].mxu0 %v6832_v17  ;;  %v6877_v17 = vld [vmem:[%s8679_s1 + $0x160] sm:$0xff]  }
  0x27   : > { %6136 = vmatmul.mubr.bf16.vlgmr.msra.gmra.mrb[0].mxu1 %v6833_v18  ;;  %6156 = vmatpush3.bf16.msra.mxu0 %v6834_v19  ;;  %v944_v18 = vor.u32 %v942_v12, %v940_v8  ;;  %v948_v19 = vrot.slane %v946_v15, 1  ;;  %v6898_v8 = vld [vmem:[%s8679_s1 + $0x1d0] sm:$0xff]   ;;  %v1845_v12 = vrot.slane %v7441_v61, 1 }
  0x28   : > { %6157 = vmatprep.subr.bf16.mxu0 %v7084_v1  ;;  %6103 = vmatprep.mubr.msk.bf16.mxu0 %vm7085_vm0, %v7084_v1  ;;  %v7484_v15 = vld [vmem:[%s7184_s28 + $0x54] sm:$0xff]  }
  0x29   : > { %6139 = vmatprep.mubr.msk.bf16.mxu1 %vm7085_vm0, %v7084_v1  ;;  %6192 = vmatpush3.bf16.msra.mxu1 %v6839_v20  ;;  %v6876_v20 = vld [vmem:[%s8679_s1 + $0x128] sm:$0xff]   ;;  %v6920_v61 = vld [vmem:[%s8679_s1 + $0x210] sm:$0xff]  }
  0x2a   : > { %6193 = vmatprep.subr.bf16.mxu1 %v7084_v1 }
  0x2b   : > { %6158 = vmatpush3.bf16.msra.mxu0 %v6835_v21  ;;  %v6879_v21 = vld [vmem:[%s8679_s1 + $0x168] sm:$0xff]  }
  0x2c   : > { %6159 = vmatprep.subr.bf16.mxu0 %v7084_v1 }
  0x2d   : > { %6194 = vmatpush3.bf16.msra.mxu1 %v6840_v23  ;;  %v6878_v23 = vld [vmem:[%s8679_s1 + $0x130] sm:$0xff]  }
  0x2e   : > { %6104 = vmatmul.mubr.bf16.gmra.mrb[4].mxu0 %v6836_v22  ;;  %6195 = vmatprep.subr.bf16.mxu1 %v7084_v1  ;;  %v6875_v22 = vld [vmem:[%s7184_s28 + $0x88] sm:$0xff]  }
  0x2f   : > { %6140 = vmatmul.mubr.bf16.gmra.mrb[4].mxu1 %v6837_v24  ;;  %6160 = vmatpush3.bf16.msra.mxu0 %v6838_v25  ;;  %v950_v24 = vshrl.u32 %v6874_v9, 16  ;;  %v954_v25 = vshll.u32 %v6880_v16, 16  ;;  %v6896_v16 = vld [vmem:[%s8679_s1 + $0x198] sm:$0xff]  }
  0x30   : > { %6107 = vmatprep.mubr.msk.bf16.mxu0 %vm7085_vm0, %v7084_v1  ;;  %6143 = vmatprep.mubr.msk.bf16.mxu1 %vm7085_vm0, %v7084_v1 }
  0x31   : > { %6161 = vmatprep.subr.bf16.mxu0 %v7084_v1  ;;  %6196 = vmatpush3.bf16.msra.mxu1 %v6844_v26  ;;  %v949_v26 = vsel %vm913_vm1, %v944_v18, %v948_v19  ;;  %v6932_v18 = vld [vmem:[%s7184_s28 + $0x4] sm:$0xfe]  }
  0x32   : > { %6197 = vmatprep.subr.bf16.mxu1 %v7084_v1 }
  0x33   : > { %6162 = vmatpush3.bf16.msra.mxu0 %v6843_v27  ;;  %v6887_v27 = vld [vmem:[%s7184_s28 + $0x70] sm:$0xff]  }
  0x34   : > { %6163 = vmatprep.subr.bf16.mxu0 %v7084_v1  ;;  %v1589_v37 = vshrl.u32 %v6887_v27, 16 }
  0x35   : > { %6198 = vmatpush3.bf16.msra.mxu1 %v6846_v29  ;;  %v952_v29 = vor.u32 %v950_v24, %v948_v19  ;;  %v7504_v24 = vld [vmem:[%s7184_s28 + $0x64] ss:$0 sps:$4 sm:$0x11]  }
  0x36   : > { %6108 = vmatmul.mubr.bf16.gmra.mrb[8].mxu0 %v6841_v28  ;;  %6199 = vmatprep.subr.bf16.mxu1 %v7084_v1  ;;  %v6882_v28 = vld [vmem:[%s8679_s1 + $0x170] sm:$0xff]  }
  0x37   : > { %6144 = vmatmul.mubr.bf16.gmra.mrb[8].mxu1 %v6842_v30  ;;  %6164 = vmatpush3.bf16.msra.mxu0 %v6845_v31  ;;  %v956_v30 = vrot.slane %v954_v25, 1  ;;  %v6883_v31 = vld [vmem:[%s8679_s1 + $0x138] sm:$0xff]  }
  0x38   : > { %6111 = vmatprep.mubr.msk.bf16.mxu0 %vm7085_vm0, %v7084_v1  ;;  %6147 = vmatprep.mubr.msk.bf16.mxu1 %vm7085_vm0, %v7084_v1  ;;  %v6895_v25 = vld [vmem:[%s7184_s28 + $0xb8] sm:$0xff]  }
  0x39   : > { %6165 = vmatprep.subr.bf16.mxu0 %v7084_v1  ;;  %6200 = vmatpush3.bf16.msra.mxu1 %v6850_v32  ;;  %v6888_v32 = vld [vmem:[%s7184_s28 + $0x78] sm:$0xff]  }
  0x3a   : > { %6201 = vmatprep.subr.bf16.mxu1 %v7084_v1  ;;  %v1600_v51 = vshrl.u32 %v6888_v32, 16 }
  0x3b   : > { %6166 = vmatpush3.bf16.msra.mxu0 %v6849_v33  ;;  %v1591_v33 = vshll.u32 %v6887_v27, 16  ;;  %v1848_v27 = vrot.slane %v7466_v7, 1  ;;  %v6928_v7 = vld [vmem:[%s8679_s1 + $0x230] sm:$0xff]  }
  0x3c   : > { %6167 = vmatprep.subr.bf16.mxu0 %v7084_v1 }
  0x3d   : > { %6202 = vmatpush3.bf16.msra.mxu1 %v6852_v35  ;;  %v957_v35 = vsel %vm913_vm1, %v952_v29, %v956_v30  ;;  %v6899_v29 = vld [vmem:[%s8679_s1 + $0x1a0] sm:$0xff]   ;;  %v6900_v30 = vld [vmem:[%s8679_s1 + $0x1d8] sm:$0xff]  }
  0x3e   : > { %6112 = vmatmul.mubr.bf16.gmra.mrb[12].mxu0 %v6847_v34  ;;  %6203 = vmatprep.subr.bf16.mxu1 %v7084_v1  ;;  %v6884_v34 = vld [vmem:[%s8679_s1 + $0x178] sm:$0xff]  }
  0x3f   : > { %6148 = vmatmul.mubr.bf16.gmra.mrb[12].mxu1 %v6848_v36  ;;  %6115 = vmatprep.mubr.msk.bf16.mxu0 %vm7085_vm0, %v7084_v1  ;;  %v6881_v36 = vld [vmem:[%s7184_s28 + $0x90] sm:$0xff]  }
  0x40   : > { %6151 = vmatprep.mubr.msk.bf16.mxu1 %vm7085_vm0, %v7084_v1  ;;  %6168 = vmatpush3.bf16.msra.mxu0 %v6851_v38  ;;  %v1593_v38 = vrot.slane %v1591_v33, 1  ;;  %v2293_v33 = vshrl.u32 %v6932_v18, 16 }
  0x41   : > { %6169 = vmatprep.subr.bf16.mxu0 %v7084_v1  ;;  %6204 = vmatpush3.bf16.msra.mxu1 %v6855_v39  ;;  %v1596_v39 = vshll.u32 %v6888_v32, 16  ;;  %v2073_v32 = vrot.slane %v7484_v15, 1 }
  0x42   : > { %6205 = vmatprep.subr.bf16.mxu1 %v7084_v1 }
  0x44   : > { %6170 = vmatpush3.bf16.msra.mxu0 %v6856_v43  ;;  %v1598_v43 = vrot.slane %v1596_v39, 1 }
  0x45   : > { %6206 = vmatpush3.bf16.msra.mxu1 %v6857_v44  ;;  %6227 = vmatprep.subr.bf16.mxu0 %v7084_v1  ;;  %v6885_v44 = vld [vmem:[%s7184_s28 + $0xa8] sm:$0xff]  }
  0x46   : > { %6116 = vmatmul.mubr.bf16.gmra.mrb[16].mxu0 %v6853_v42  ;;  %6263 = vmatprep.subr.bf16.mxu1 %v7084_v1  ;;  %v1594_v42 = vor.u32 %v1593_v38, %v1589_v37  ;;  %v6904_v37 = vld [vmem:[%s8679_s1 + $0x1e0] sm:$0xff]  }
  0x47   : > { %6152 = vmatmul.mubr.bf16.gmra.mrb[16].mxu1 %v6854_v45  ;;  %6171 = vmatprep.mubr.msk.bf16.mxu0 %vm7085_vm0, %v7084_v1  ;;  %v6908_v45 = vld [vmem:[%s7184_s28 + $0x98] ss:$0 sps:$4 sm:$0x11]  }
  0x48   : > { %6207 = vmatprep.mubr.msk.bf16.mxu1 %vm7085_vm0, %v7084_v1  ;;  %v1599_v50 = vsel %vm913_vm1, %v1594_v42, %v1598_v43  ;;  %v1628_v60 = vshll.u32 %v6908_v45, 16  ;;  %v7536_v45 = vrot.slane %v2293_v33, 1 }
  0x4a   : > { %v7471_v9 = vrot.slane %v1628_v60, 1 }
  0x4e   : > { %6172 = vmatmul.mubr.bf16.vlgmr.msra.gmra.mrb[20].mxu0 %v925_v54  ;;  %v1608_v54 = vshrl.u32 %v7405_v40, 16 }
  0x4f   : > { %6228 = vmatpush3.bf16.msra.mxu0 %v6860_v52  ;;  %6208 = vmatmul.mubr.bf16.vlgmr.msra.gmra.mrb[20].mxu1 %v6861_v53  ;;  %v6889_v52 = vld [vmem:[%s8679_s1 + $0x188] sm:$0xff]   ;;  %v6893_v53 = vld [vmem:[%s8679_s1 + $0x1c0] sm:$0xff]  }
  0x50   : > { %6229 = vmatprep.subr.bf16.mxu0 %v7084_v1  ;;  %6175 = vmatprep.mubr.msk.bf16.mxu0 %vm7085_vm0, %v7084_v1 }
  0x51   : > { %6211 = vmatprep.mubr.msk.bf16.mxu1 %vm7085_vm0, %v7084_v1  ;;  %6264 = vmatpush3.bf16.msra.mxu1 %v6866_v57  ;;  %v6894_v57 = vld [vmem:[%s8679_s1 + $0x1c8] sm:$0xff]  }
  0x52   : > { %6265 = vmatprep.subr.bf16.mxu1 %v7084_v1 }
  0x53   : > { %6230 = vmatpush3.bf16.msra.mxu0 %v6862_v58  ;;  %v7437_v58 = vrot.slane %v1612_v49, 1 }
  0x54   : > { %6231 = vmatprep.subr.bf16.mxu0 %v7084_v1 }
  0x55   : > { %6266 = vmatpush3.bf16.msra.mxu1 %v6867_v63  ;;  %v6890_v63 = vld [vmem:[%s7184_s28 + $0xb0] sm:$0xff]  }
  0x56   : > { %6176 = vmatmul.mubr.bf16.gmra.mrb[24].mxu0 %v933_v2  ;;  %6267 = vmatprep.subr.bf16.mxu1 %v7084_v1  ;;  %v1624_v2 = vshrl.u32 %v7419_v47, 16  ;;  %v6914_v47 = vld [vmem:[%s8679_s1 + $0x200] sm:$0xff]  }
  0x57   : > { %6212 = vmatmul.mubr.bf16.gmra.mrb[24].mxu1 %v6864_v62  ;;  %6232 = vmatpush3.bf16.msra.mxu0 %v6865_v0  ;;  %v7444_v62 = vld [vmem:[%s7184_s28 + $0xc] sm:$0xff]   ;;  %v1602_v0 = vor.u32 %v1600_v51, %v1598_v43  ;;  %v2077_v43 = vrot.slane %v7504_v24, 1  ;;  %v6901_v51 = vld [vmem:[%s7184_s28 + $0xc0] sm:$0xff]  }
  0x58   : > { %6179 = vmatprep.mubr.msk.bf16.mxu0 %vm7085_vm0, %v7084_v1  ;;  %6233 = vmatprep.subr.bf16.mxu0 %v7084_v1 }
  0x59   : > { %6215 = vmatprep.mubr.msk.bf16.mxu1 %vm7085_vm0, %v7084_v1  ;;  %6268 = vmatpush3.bf16.msra.mxu1 %v6871_v5  ;;  %v7460_v5 = vld [vmem:[%s7184_s28 + $0x3c] sm:$0xfe]  }
  0x5a   : > { %6269 = vmatprep.subr.bf16.mxu1 %v7084_v1  ;;  %v2068_v19 = vrot.slane %v7460_v5, 1  ;;  %v6922_v5 = vld [vmem:[%s8679_s1 + $0x218] sm:$0xff]  }
  0x5b   : > { %6234 = vmatpush3.bf16.msra.mxu0 %v6869_v6  ;;  %v7463_v6 = vrot.slane %v1620_v56, 1  ;;  %v6911_v56 = vld [vmem:[%s8679_s1 + $0x1f8] sm:$0xff]  }
  0x5c   : > { %6235 = vmatprep.subr.bf16.mxu0 %v7084_v1 }
  0x5d   : > { %6270 = vmatpush3.bf16.msra.mxu1 %v6873_v10  ;;  %v7474_v10 = vld [vmem:[%s7184_s28 + $0x4c] sm:$0xff]  }
  0x5e   : > { %6180 = vmatmul.mubr.bf16.gmra.mrb[28].mxu0 %v941_v13  ;;  %6271 = vmatprep.subr.bf16.mxu1 %v7084_v1  ;;  %v1846_v13 = vrot.slane %v7444_v62, 1  ;;  %v6924_v62 = vld [vmem:[%s8679_s1 + $0x220] sm:$0xff]  }
  0x5f   : > { %6216 = vmatmul.mubr.bf16.gmra.mrb[28].mxu1 %v6870_v11  ;;  %6236 = vmatpush3.bf16.msra.mxu0 %v6872_v14  ;;  %v1607_v11 = vsel %vm913_vm1, %v1602_v0, %v1606_v55  ;;  %v7481_v14 = vld [vmem:[%s7184_s28 + $0x1c] sm:$0xff]   ;;  %v6917_v0 = vld [vmem:[%s8679_s1 + $0x208] sm:$0xff]  }
  0x60   : > { %6183 = vmatprep.mubr.msk.bf16.mxu0 %vm7085_vm0, %v7084_v1  ;;  %6219 = vmatprep.mubr.msk.bf16.mxu1 %vm7085_vm0, %v7084_v1  ;;  %v1847_v60 = vsel %vm1844_vm2, %v1845_v12, %v1846_v13  ;;  %v6934_v12 = vld [vmem:[%s7184_s28 + $0x14] sm:$0xff]  }
  0x61   : > { %6237 = vmatprep.subr.bf16.mxu0 %v7084_v1  ;;  %6272 = vmatpush3.bf16.msra.mxu1 %v6877_v17  ;;  %v7490_v17 = vld [vmem:[%s7184_s28 + $0x24] sm:$0xff]  }
  0x62   : > { %6273 = vmatprep.subr.bf16.mxu1 %v7084_v1  ;;  %v1852_v38 = vrot.slane %v7490_v17, 1  ;;  %v2310_v17 = vshrl.u32 %v6934_v12, 16 }
  0x63   : > { %6238 = vmatpush3.bf16.msra.mxu0 %v6876_v20  ;;  %v2069_v20 = vrot.slane %v7452_v3, 1 }
  0x64   : > { %6239 = vmatprep.subr.bf16.mxu0 %v7084_v1 }
  0x65   : > { %6274 = vmatpush3.bf16.msra.mxu1 %v6879_v21  ;;  %v7497_v21 = vld [vmem:[%s7184_s28 + $0x5c] sm:$0xff]  }
  0x66   : > { %6184 = vmatmul.mubr.bf16.gmra.mrb[32].mxu0 %v949_v26  ;;  %6275 = vmatprep.subr.bf16.mxu1 %v7084_v1  ;;  %v1610_v26 = vor.u32 %v1608_v54, %v1606_v55  ;;  %v2075_v39 = vrot.slane %v7497_v21, 1  ;;  %v6909_v54 = vld [vmem:[%s8679_s1 + $0x1f0] sm:$0xff]  }
  0x67   : > { %6220 = vmatmul.mubr.bf16.gmra.mrb[32].mxu1 %v6875_v22  ;;  %6187 = vmatprep.mubr.msk.bf16.mxu0 %vm7085_vm0, %v7084_v1  ;;  %v6933_v22 = vld [vmem:[%s7184_s28 + $0xc] sm:$0xff]  }
  0x68   : > { %6240 = vmatpush3.bf16.msra.mxu0 %v6878_v23  ;;  %6223 = vmatprep.mubr.msk.bf16.mxu1 %vm7085_vm0, %v7084_v1  ;;  %v7501_v23 = vld [vmem:[%s7184_s28 + $0x2c] ss:$0 sps:$4 sm:$0x11]   ;;  %v1615_v40 = vsel %vm913_vm1, %v1610_v26, %v7437_v58 }
  0x69   : > { %6241 = vmatprep.subr.bf16.mxu0 %v7084_v1  ;;  %6276 = vmatpush3.bf16.msra.mxu1 %v6882_v28  ;;  %v2071_v28 = vrot.slane %v7474_v10, 1  ;;  %v1854_v42 = vrot.slane %v7501_v23, 1  ;;  %v2076_v10 = vsel %vm1844_vm2, %v2073_v32, %v2075_v39 }
  0x6a   : > { %6277 = vmatprep.subr.bf16.mxu1 %v7084_v1 }
  0x6c   : > { %6242 = vmatpush3.bf16.msra.mxu0 %v6883_v31  ;;  %v1850_v31 = vrot.slane %v7481_v14, 1  ;;  %v2078_v14 = vsel %vm1844_vm2, %v2075_v39, %v2077_v43 }
  0x6d   : > { %6278 = vmatpush3.bf16.msra.mxu1 %v6884_v34  ;;  %6299 = vmatprep.subr.bf16.mxu0 %v7084_v1  ;;  %v2296_v34 = vshll.u32 %v6932_v18, 16  ;;  %v2313_v18 = vshll.u32 %v6934_v12, 16  ;;  %v6938_v12 = vld [vmem:[%s8681_s3] sm:$0xff]  }
  0x6e   : > { %6188 = vmatmul.mubr.bf16.gmra.mrb[36].mxu0 %v957_v35  ;;  %6335 = vmatprep.subr.bf16.mxu1 %v7084_v1  ;;  %v2301_v35 = vshrl.u32 %v6933_v22, 16  ;;  %v1851_v3 = vsel %vm1844_vm2, %v1848_v27, %v1850_v31 }
  0x6f   : > { %6224 = vmatmul.mubr.bf16.gmra.mrb[36].mxu1 %v6881_v36  ;;  %6243 = vmatprep.mubr.msk.bf16.mxu0 %vm7085_vm0, %v7084_v1  ;;  %v2304_v36 = vshll.u32 %v6933_v22, 16  ;;  %v7538_v46 = vrot.slane %v2296_v34, 2  ;;  %v2315_v21 = vrot.slane %v2313_v18, 2  ;;  %v6935_v22 = vld [vmem:[%s7184_s28 + $0x1c] sm:$0xff]  }
  0x70   : > { %6279 = vmatprep.mubr.msk.bf16.mxu1 %vm7085_vm0, %v7084_v1  ;;  %v2319_v24 = vshrl.u32 %v6935_v22, 16 }
  0x71   : > { %v7543_v49 = vrot.slane %v2304_v36, 2  ;;  %v2299_v15 = vor.u32 %v7538_v46, %v7536_v45  ;;  %v6937_v36 = vld [vmem:[%s7184_s28 + $0x2c] ss:$0 sps:$4 sm:$0x33]  }
  0x72   : > { %v2340_v39 = vshll.u32 %v6937_v36, 16 }
  0x74   : > { %v2342_v43 = vrot.slane %v2340_v39, 2 }
  0x76   : > { %6244 = vmatmul.mubr.bf16.vlgmr.msra.gmra.mrb[40].mxu0 %v6885_v44  ;;  %v6903_v44 = vld [vmem:[%s8679_s1 + $0x1a8] sm:$0xff]  }
  0x77   : > { %6300 = vmatpush3.bf16.msra.mxu0 %v6886_v48  ;;  %6280 = vmatmul.mubr.bf16.vlgmr.msra.gmra.mrb[40].mxu1 %v1599_v50  ;;  %v7541_v48 = vrot.slane %v2301_v35, 1  ;;  %v6906_v50 = vld [vmem:[%s8679_s1 + $0x1e8] sm:$0xff]  }
  0x78   : > { %6301 = vmatprep.subr.bf16.mxu0 %v7084_v1  ;;  %6247 = vmatprep.mubr.msk.bf16.mxu0 %vm7085_vm0, %v7084_v1 }
  0x79   : > { %6283 = vmatprep.mubr.msk.bf16.mxu1 %vm7085_vm0, %v7084_v1  ;;  %6336 = vmatpush3.bf16.msra.mxu1 %v6893_v53  ;;  %v6905_v53 = vld [vmem:[%s8679_s1 + $0x1b0] sm:$0xff]  }
  0x7a   : > { %6337 = vmatprep.subr.bf16.mxu1 %v7084_v1 }
  0x7b   : > { %6302 = vmatpush3.bf16.msra.mxu0 %v6889_v52  ;;  %v1618_v52 = vor.u32 %v1616_v59, %v7437_v58  ;;  %v1626_v58 = vor.u32 %v1624_v2, %v7463_v6  ;;  %v1849_v2 = vsel %vm1844_vm2, %v1846_v13, %v1848_v27  ;;  %v1855_v13 = vsel %vm1844_vm2, %v1852_v38, %v1854_v42 }
  0x7c   : > { %6303 = vmatprep.subr.bf16.mxu0 %v7084_v1  ;;  %v2321_v27 = vrot.slane %v2319_v24, 1  ;;  %v6940_v24 = vld [vmem:[%s8681_s3 + $0x10] sm:$0xff]  }
  0x7d   : > { %6338 = vmatpush3.bf16.msra.mxu1 %v6894_v57  ;;  %v1623_v55 = vsel %vm913_vm1, %v1618_v52, %v7463_v6  ;;  %v6907_v57 = vld [vmem:[%s7184_s28 + $0xc8] sm:$0xff]   ;;  %v1631_v59 = vsel %vm913_vm1, %v1626_v58, %v7471_v9  ;;  %v2074_v6 = vsel %vm1844_vm2, %v2071_v28, %v2073_v32  ;;  %v1853_v9 = vsel %vm1844_vm2, %v1850_v31, %v1852_v38 }
  0x7e   : > { %6248 = vmatmul.mubr.bf16.gmra.mrb[44].mxu0 %v6890_v63  ;;  %6339 = vmatprep.subr.bf16.mxu1 %v7084_v1  ;;  %v2070_v63 = vsel %vm1844_vm2, %v2068_v19, %v2069_v20  ;;  %v2337_v38 = vshrl.u32 %v6937_v36, 16  ;;  %v6976_v36 = vld [vmem:[%s8681_s3 + $0xe0] sm:$0xff]  }
  0x7f   : > { %6284 = vmatmul.mubr.bf16.gmra.mrb[44].mxu1 %v1607_v11  ;;  %6304 = vmatpush3.bf16.msra.mxu0 %v6892_v4  ;;  %v2072_v4 = vsel %vm1844_vm2, %v2069_v20, %v2071_v28  ;;  %v6931_v11 = vld [vmem:[%s8679_s1 + $0x238] sm:$0xff]   ;;  %v2312_v20 = vrot.slane %v2310_v17, 1 }
  0x80   : > { %6251 = vmatprep.mubr.msk.bf16.mxu0 %vm7085_vm0, %v7084_v1  ;;  %6305 = vmatprep.subr.bf16.mxu0 %v7084_v1  ;;  %v2339_v42 = vrot.slane %v2337_v38, 1 }
  0x81   : > { %6287 = vmatprep.mubr.msk.bf16.mxu1 %vm7085_vm0, %v7084_v1  ;;  %6340 = vmatpush3.bf16.msra.mxu1 %v6898_v8  ;;  %v6927_v8 = vld [vmem:[%s8679_s1 + $0x228] sm:$0xff]   ;;  %v2316_v23 = vor.u32 %v2315_v21, %v2312_v20 }
  0x82   : > { %6341 = vmatprep.subr.bf16.mxu1 %v7084_v1 }
  0x83   : > { %6306 = vmatpush3.bf16.msra.mxu0 %v6896_v16  ;;  %v2307_v16 = vor.u32 %v7543_v49, %v7541_v48 }
  0x84   : > { %6307 = vmatprep.subr.bf16.mxu0 %v7084_v1 }
  0x85   : > { %6342 = vmatpush3.bf16.msra.mxu1 %v6900_v30  ;;  %v2308_v19 = vsel %vm8686_vm3, %v2299_v15, %v2307_v16  ;;  %v2317_v26 = vsel %vm8686_vm3, %v2307_v16, %v2316_v23  ;;  %v6939_v16 = vld [vmem:[%s8681_s3 + $0x8] sm:$0xff]  }
  0x86   : > { %6252 = vmatmul.mubr.bf16.gmra.mrb[48].mxu0 %v6895_v25  ;;  %6343 = vmatprep.subr.bf16.mxu1 %v7084_v1  ;;  %v2322_v25 = vshll.u32 %v6935_v22, 16 }
  0x87   : > { %6288 = vmatmul.mubr.bf16.gmra.mrb[48].mxu1 %v1615_v40  ;;  %6308 = vmatpush3.bf16.msra.mxu0 %v6899_v29  ;;  %v6936_v29 = vld [vmem:[%s7184_s28 + $0x24] sm:$0xff]  }
  0x88   : > { %6255 = vmatprep.mubr.msk.bf16.mxu0 %vm7085_vm0, %v7084_v1  ;;  %6291 = vmatprep.mubr.msk.bf16.mxu1 %vm7085_vm0, %v7084_v1  ;;  %v2324_v28 = vrot.slane %v2322_v25, 2  ;;  %v2328_v31 = vshrl.u32 %v6936_v29, 16  ;;  %v2331_v32 = vshll.u32 %v6936_v29, 16 }
  0x89   : > { %6309 = vmatprep.subr.bf16.mxu0 %v7084_v1  ;;  %6344 = vmatpush3.bf16.msra.mxu1 %v6904_v37 }
  0x8a   : > { %6345 = vmatprep.subr.bf16.mxu1 %v7084_v1  ;;  %v2325_v30 = vor.u32 %v2324_v28, %v2321_v27  ;;  %v2330_v34 = vrot.slane %v2328_v31, 1  ;;  %v2333_v35 = vrot.slane %v2331_v32, 2 }
  0x8b   : > { %6310 = vmatpush3.bf16.msra.mxu0 %v6903_v44  ;;  %v2343_v44 = vor.u32 %v2342_v43, %v2339_v42  ;;  %v2583_v42 = vld [vmem:[#allocation2 + $0x2c] sm:$0xe] }
  0x8c   : > { %6311 = vmatprep.subr.bf16.mxu0 %v7084_v1  ;;  %v2326_v33 = vsel %vm8686_vm3, %v2316_v23, %v2325_v30  ;;  %v2334_v37 = vor.u32 %v2333_v35, %v2330_v34  ;;  %v6941_v35 = vld [vmem:[%s8681_s3 + $0x18] sm:$0xff]  }
  0x8d   : > { %6346 = vmatpush3.bf16.msra.mxu1 %v6906_v50 }
  0x8e   : > { %6256 = vmatmul.mubr.bf16.gmra.mrb[52].mxu0 %v6901_v51  ;;  %6347 = vmatprep.subr.bf16.mxu1 %v7084_v1  ;;  %v2335_v40 = vsel %vm8686_vm3, %v2325_v30, %v2334_v37  ;;  %v2344_v45 = vsel %vm8686_vm3, %v2334_v37, %v2343_v44  ;;  %v2577_v37 = vld [vmem:[#allocation2 + $0x4] sm:$0x3] }
  0x8f   : > { %6292 = vmatmul.mubr.bf16.gmra.mrb[52].mxu1 %v1623_v55  ;;  %6259 = vmatprep.mubr.msk.bf16.mxu0 %vm7085_vm0, %v7084_v1  ;;  %v2578_v39 = vsel %vm7753_vm6, 0, %v2577_v37 }
  0x90   : > { %6312 = vmatpush3.bf16.msra.mxu0 %v6905_v53  ;;  %6295 = vmatprep.mubr.msk.bf16.mxu1 %vm7085_vm0, %v7084_v1  ;;  %2579 = vst [vmem:[#allocation2 + $0x4] sm:$0x3] %v2578_v39 }
  0x91   : > { %6313 = vmatprep.subr.bf16.mxu0 %v7084_v1  ;;  %6348 = vmatpush3.bf16.msra.mxu1 %v6909_v54 }
  0x92   : > { %6349 = vmatprep.subr.bf16.mxu1 %v7084_v1 }
  0x94   : > { %6314 = vmatpush3.bf16.msra.mxu0 %v6910_v41 }
  0x95   : > { %6350 = vmatpush3.bf16.msra.mxu1 %v6911_v56  ;;  %6371 = vmatprep.subr.bf16.mxu0 %v7084_v1 }
  0x96   : > { %6260 = vmatmul.mubr.bf16.gmra.mrb[56].mxu0 %v6907_v57  ;;  %6407 = vmatprep.subr.bf16.mxu1 %v7084_v1 }
  0x97   : > { %6296 = vmatmul.mubr.bf16.gmra.mrb[56].mxu1 %v1631_v59  ;;  %6315 = vmatprep.mubr.msk.bf16.mxu0 %vm7085_vm0, %v7084_v1 }
  0x98   : > { %6351 = vmatprep.mubr.msk.bf16.mxu1 %vm7085_vm0, %v7084_v1 }
  0x9e   : > { %6316 = vmatmul.mubr.bf16.vlgmr.msra.gmra.mrb[60].mxu0 %v1847_v60 }
  0x9f   : > { %6372 = vmatpush3.bf16.msra.mxu0 %v6914_v47  ;;  %6352 = vmatmul.mubr.bf16.vlgmr.msra.gmra.mrb[60].mxu1 %v2070_v63 }
  0xa0   : > { %6373 = vmatprep.subr.bf16.mxu0 %v7084_v1  ;;  %6319 = vmatprep.mubr.msk.bf16.mxu0 %vm7085_vm0, %v7084_v1 }
  0xa1   : > { %6355 = vmatprep.mubr.msk.bf16.mxu1 %vm7085_vm0, %v7084_v1  ;;  %6408 = vmatpush3.bf16.msra.mxu1 %v6938_v12 }
  0xa2   : > { %6409 = vmatprep.subr.bf16.mxu1 %v7084_v1 }
  0xa3   : > { %6374 = vmatpush3.bf16.msra.mxu0 %v6917_v0 }
  0xa4   : > { %6375 = vmatprep.subr.bf16.mxu0 %v7084_v1 }
  0xa5   : > { %6410 = vmatpush3.bf16.msra.mxu1 %v6939_v16 }
  0xa6   : > { %6320 = vmatmul.mubr.bf16.gmra.mrb[64].mxu0 %v1849_v2  ;;  %6411 = vmatprep.subr.bf16.mxu1 %v7084_v1 }
  0xa7   : > { %6356 = vmatmul.mubr.bf16.gmra.mrb[64].mxu1 %v2072_v4  ;;  %6376 = vmatpush3.bf16.msra.mxu0 %v6920_v61 }
  0xa8   : > { %6323 = vmatprep.mubr.msk.bf16.mxu0 %vm7085_vm0, %v7084_v1  ;;  %6377 = vmatprep.subr.bf16.mxu0 %v7084_v1 }
  0xa9   : > { %6359 = vmatprep.mubr.msk.bf16.mxu1 %vm7085_vm0, %v7084_v1  ;;  %6412 = vmatpush3.bf16.msra.mxu1 %v6940_v24 }
  0xaa   : > { %6413 = vmatprep.subr.bf16.mxu1 %v7084_v1 }
  0xab   : > { %6378 = vmatpush3.bf16.msra.mxu0 %v6922_v5 }
  0xac   : > { %6379 = vmatprep.subr.bf16.mxu0 %v7084_v1 }
  0xad   : > { %6414 = vmatpush3.bf16.msra.mxu1 %v6941_v35 }
  0xae   : > { %6324 = vmatmul.mubr.bf16.gmra.mrb[68].mxu0 %v1851_v3  ;;  %6415 = vmatprep.subr.bf16.mxu1 %v7084_v1 }
  0xaf   : > { %6360 = vmatmul.mubr.bf16.gmra.mrb[68].mxu1 %v2074_v6  ;;  %6380 = vmatpush3.bf16.msra.mxu0 %v6924_v62 }
  0xb0   : > { %6327 = vmatprep.mubr.msk.bf16.mxu0 %vm7085_vm0, %v7084_v1  ;;  %6363 = vmatprep.mubr.msk.bf16.mxu1 %vm7085_vm0, %v7084_v1 }
  0xb1   : > { %6381 = vmatprep.subr.bf16.mxu0 %v7084_v1 }
  0xb3   : > { %6382 = vmatpush3.bf16.msra.mxu0 %v6927_v8 }
  0xb4   : > { %6383 = vmatprep.subr.bf16.mxu0 %v7084_v1 }
  0xb6   : > { %6328 = vmatmul.mubr.bf16.gmra.mrb[72].mxu0 %v1853_v9 }
  0xb7   : > { %6364 = vmatmul.mubr.bf16.gmra.mrb[72].mxu1 %v2076_v10  ;;  %6331 = vmatprep.mubr.msk.bf16.mxu0 %vm7085_vm0, %v7084_v1 }
  0xb8   : > { %6384 = vmatpush3.bf16.msra.mxu0 %v6928_v7  ;;  %6367 = vmatprep.mubr.msk.bf16.mxu1 %vm7085_vm0, %v7084_v1 }
  0xb9   : > { %6385 = vmatprep.subr.bf16.mxu0 %v7084_v1 }
  0xbc   : > { %6386 = vmatpush3.bf16.msra.mxu0 %v6931_v11 }
  0xbd   : > { %6443 = vmatprep.subr.bf16.mxu0 %v7084_v1 }
  0xbe   : > { %6332 = vmatmul.mubr.bf16.gmra.mrb[76].mxu0 %v1855_v13 }
  0xbf   : > { %6368 = vmatmul.mubr.bf16.gmra.mrb[76].mxu1 %v2078_v14  ;;  %6387 = vmatprep.mubr.msk.bf16.mxu0 %vm7085_vm0, %v7084_v1 }
  0xc0   : > { %6423 = vmatprep.mubr.msk.bf16.mxu1 %vm7085_vm0, %v7084_v1 }
  0xc6   : > { %6388 = vmatmul.mubr.bf16.vlgmr.msra.gmra.mrb[80].mxu0 %v2308_v19 }
  0xc7   : > { %6391 = vmatprep.mubr.msk.bf16.mxu0 %vm7085_vm0, %v7084_v1 }
  0xce   : > { %6392 = vmatmul.mubr.bf16.gmra.mrb[84].mxu0 %v2317_v26 }
  0xcf   : > { %6395 = vmatprep.mubr.msk.bf16.mxu0 %vm7085_vm0, %v7084_v1 }
  0xd6   : > { %6396 = vmatmul.mubr.bf16.gmra.mrb[88].mxu0 %v2326_v33 }
  0xd7   : > { %6399 = vmatprep.mubr.msk.bf16.mxu0 %vm7085_vm0, %v7084_v1 }
  0xde   : > { %6400 = vmatmul.mubr.bf16.gmra.mrb[92].mxu0 %v2335_v40 }
  0xdf   : > { %6403 = vmatprep.mubr.msk.bf16.mxu0 %vm7085_vm0, %v7084_v1 }
  0xe6   : > { %6404 = vmatmul.mubr.bf16.gmra.mrb[96].mxu0 %v2344_v45 }
  0xe7   : > { %6459 = vmatprep.mubr.msk.bf16.mxu0 %vm7085_vm0, %v7084_v1 }
  0xf9   : > { %v599_v46 = vpop.f32.mrb[0].mxu0 }
  0xfa   : > { %v788_v48 = vpop.f32.mrb[0].mxu1  ;;  %v6101_v49 = vpop.f32.mrb[1].mxu0 }
  0xfb   : > { %v7717_v50 = vadd.f32 %v788_v48, %v599_v46  ;;  %v6137_v51 = vpop.f32.mrb[1].mxu1  ;;  %v602_v52 = vpop.f32.mrb[2].mxu0  ;;  %v2584_v46 = vsel %vm7759_vm9, 0, %v2583_v42  ;;  %v6943_v48 = vld [vmem:[%s8681_s3 + $0x40] sm:$0xff]  }
  0xfc   : > { %v791_v53 = vpop.f32.mrb[2].mxu1  ;;  %v6102_v54 = vpop.f32.mrb[3].mxu0  ;;  %2585 = vst [vmem:[#allocation2 + $0x2c] sm:$0xe] %v2584_v46  ;;  %6444 = vmatpush3.bf16.msra.mxu0 %v6943_v48 }
  0xfd   : > { %v7719_v55 = vadd.f32 %v791_v53, %v602_v52  ;;  %v6138_v41 = vpop.f32.mrb[3].mxu1  ;;  %v6942_v52 = vld [vmem:[%s8681_s3 + $0x20] sm:$0xff]   ;;  %6445 = vmatprep.subr.bf16.mxu0 %v7084_v1 }
  0xfe   : > { %6416 = vmatpush3.bf16.msra.mxu1 %v6942_v52 }
  0xff   : > { %6417 = vmatprep.subr.bf16.mxu1 %v7084_v1 }
 0x101   : > { %v607_v56 = vpop.f32.mrb[4].mxu0 }
 0x102   : > { %v796_v57 = vpop.f32.mrb[4].mxu1  ;;  %v6105_v58 = vpop.f32.mrb[5].mxu0 }
 0x103   : > { %v7721_v59 = vadd.f32 %v796_v57, %v607_v56  ;;  %v6141_v47 = vpop.f32.mrb[5].mxu1  ;;  %v610_v60 = vpop.f32.mrb[6].mxu0  ;;  %v6945_v56 = vld [vmem:[%s8681_s3 + $0x48] sm:$0xff]  }
 0x104   : > { %v799_v63 = vpop.f32.mrb[6].mxu1  ;;  %v6106_v0 = vpop.f32.mrb[7].mxu0  ;;  %6446 = vmatpush3.bf16.msra.mxu0 %v6945_v56  ;;  %v6946_v47 = vld [vmem:[%s8681_s3 + $0x50] sm:$0xff]  }
 0x105   : > { %v7723_v61 = vadd.f32 %v799_v63, %v610_v60  ;;  %v6142_v2 = vpop.f32.mrb[7].mxu1  ;;  %6447 = vmatprep.subr.bf16.mxu0 %v7084_v1 }
 0x108   : > { %6448 = vmatpush3.bf16.msra.mxu0 %v6946_v47 }
 0x109   : > { %v615_v4 = vpop.f32.mrb[8].mxu0  ;;  %6449 = vmatprep.subr.bf16.mxu0 %v7084_v1 }
 0x10a   : > { %v804_v5 = vpop.f32.mrb[8].mxu1  ;;  %v6109_v62 = vpop.f32.mrb[9].mxu0 }
 0x10b   : > { %v7725_v3 = vadd.f32 %v804_v5, %v615_v4  ;;  %v6145_v6 = vpop.f32.mrb[9].mxu1  ;;  %v618_v8 = vpop.f32.mrb[10].mxu0  ;;  %v6947_v62 = vld [vmem:[%s8681_s3 + $0x30] sm:$0xff]  }
 0x10c   : > { %v807_v7 = vpop.f32.mrb[10].mxu1  ;;  %v6110_v9 = vpop.f32.mrb[11].mxu0 }
 0x10d   : > { %v7727_v10 = vadd.f32 %v807_v7, %v618_v8  ;;  %v6146_v11 = vpop.f32.mrb[11].mxu1 }
 0x111   : > { %v623_v13 = vpop.f32.mrb[12].mxu0 }
 0x112   : > { %v812_v14 = vpop.f32.mrb[12].mxu1  ;;  %v6113_v15 = vpop.f32.mrb[13].mxu0 }
 0x113   : > { %v7736_v17 = vadd.f32 %v812_v14, %v623_v13  ;;  %v6149_v18 = vpop.f32.mrb[13].mxu1  ;;  %v626_v19 = vpop.f32.mrb[14].mxu0  ;;  %v7086_v13 = vmov 0   ;;  %v6950_v14 = vld [vmem:[%s8681_s3 + $0x60] sm:$0xff]  }
 0x114   : > { %v815_v20 = vpop.f32.mrb[14].mxu1  ;;  %v6114_v21 = vpop.f32.mrb[15].mxu0  ;;  %2573 = vst [vmem:[#allocation2] sm:$0xf] %v7086_v13  ;;  %2586 = vst [vmem:[#allocation2 + $0x30] sm:$0xf] %v7086_v13 }
 0x115   : > { %v7738_v22 = vadd.f32 %v815_v20, %v626_v19  ;;  %v6150_v23 = vpop.f32.mrb[15].mxu1 }
 0x119   : > { %v631_v25 = vpop.f32.mrb[16].mxu0 }
 0x11a   : > { %v820_v26 = vpop.f32.mrb[16].mxu1  ;;  %v6117_v27 = vpop.f32.mrb[17].mxu0 }
 0x11b   : > { %v7745_v28 = vadd.f32 %v820_v26, %v631_v25  ;;  %v6153_v29 = vpop.f32.mrb[17].mxu1  ;;  %v634_v30 = vpop.f32.mrb[18].mxu0  ;;  %v6953_v27 = vld [vmem:[%s8681_s3 + $0x68] sm:$0xff]  }
 0x11c   : > { %v823_v31 = vpop.f32.mrb[18].mxu1  ;;  %v6118_v32 = vpop.f32.mrb[19].mxu0 }
 0x11d   : > { %v7747_v33 = vadd.f32 %v823_v31, %v634_v30  ;;  %v6154_v34 = vpop.f32.mrb[19].mxu1  ;;  %v6954_v30 = vld [vmem:[%s8681_s3 + $0x70] sm:$0xff]  }
 0x121   : > { %v1045_v38 = vpop.f32.mrb[20].mxu0 }
 0x122   : > { %v1094_v43 = vadd.f32 %v1045_v38, %v7717_v50  ;;  %v6173_v44 = vpop.f32.mrb[21].mxu0  ;;  %v1254_v45 = vpop.f32.mrb[20].mxu1 }
 0x123   : > { %v1048_v49 = vpop.f32.mrb[22].mxu0  ;;  %v6209_v51 = vpop.f32.mrb[21].mxu1  ;;  %v6957_v44 = vld [vmem:[%s8681_s3 + $0x78] sm:$0xff]  }
 0x124   : > { %v1095_v50 = vadd.f32 %v1048_v49, %v7719_v55  ;;  %v7774_v53 = vadd.f32 %v1254_v45, %v1094_v43  ;;  %v6174_v54 = vpop.f32.mrb[23].mxu0  ;;  %v1257_v41 = vpop.f32.mrb[22].mxu1  ;;  %v6944_v55 = vld [vmem:[%s8681_s3 + $0x28] sm:$0xff]  }
 0x125   : > { %v6210_v57 = vpop.f32.mrb[23].mxu1  ;;  %6418 = vmatpush3.bf16.msra.mxu1 %v6944_v55 }
 0x126   : > { %v7780_v58 = vadd.f32 %v1257_v41, %v1095_v50  ;;  %6419 = vmatprep.subr.bf16.mxu1 %v7084_v1 }
 0x129   : > { %v1053_v60 = vpop.f32.mrb[24].mxu0  ;;  %6420 = vmatpush3.bf16.msra.mxu1 %v6947_v62 }
 0x12a   : > { %v1096_v63 = vadd.f32 %v1053_v60, %v7721_v59  ;;  %v6177_v0 = vpop.f32.mrb[25].mxu0  ;;  %v1262_v2 = vpop.f32.mrb[24].mxu1  ;;  %v6948_v59 = vld [vmem:[%s8681_s3 + $0x58] sm:$0xff]   ;;  %6421 = vmatprep.subr.bf16.mxu1 %v7084_v1 }
 0x12b   : > { %v1056_v4 = vpop.f32.mrb[26].mxu0  ;;  %v6213_v5 = vpop.f32.mrb[25].mxu1  ;;  %6450 = vmatpush3.bf16.msra.mxu0 %v6948_v59 }
 0x12c   : > { %v1097_v6 = vadd.f32 %v1056_v4, %v7723_v61  ;;  %v7796_v8 = vadd.f32 %v1262_v2, %v1096_v63  ;;  %v6178_v7 = vpop.f32.mrb[27].mxu0  ;;  %v1265_v9 = vpop.f32.mrb[26].mxu1  ;;  %v6949_v61 = vld [vmem:[%s8681_s3 + $0x38] sm:$0xff]   ;;  %6451 = vmatprep.subr.bf16.mxu0 %v7084_v1 }
 0x12d   : > { %v6214_v11 = vpop.f32.mrb[27].mxu1  ;;  %6422 = vmatpush3.bf16.msra.mxu1 %v6949_v61 }
 0x12e   : > { %v7802_v12 = vadd.f32 %v1265_v9, %v1097_v6  ;;  %6479 = vmatprep.subr.bf16.mxu1 %v7084_v1 }
 0x12f   : > { %6452 = vmatpush3.bf16.msra.mxu0 %v6950_v14 }
 0x130   : > { %6453 = vmatprep.subr.bf16.mxu0 %v7084_v1 }
 0x131   : > { %v1061_v15 = vpop.f32.mrb[28].mxu0 }
 0x132   : > { %v1098_v16 = vadd.f32 %v1061_v15, %v7725_v3  ;;  %v6181_v18 = vpop.f32.mrb[29].mxu0  ;;  %v1270_v19 = vpop.f32.mrb[28].mxu1 }
 0x133   : > { %v1064_v20 = vpop.f32.mrb[30].mxu0  ;;  %v6217_v21 = vpop.f32.mrb[29].mxu1  ;;  %6454 = vmatpush3.bf16.msra.mxu0 %v6953_v27 }
 0x134   : > { %v1099_v23 = vadd.f32 %v1064_v20, %v7727_v10  ;;  %v7815_v24 = vadd.f32 %v1270_v19, %v1098_v16  ;;  %v6182_v25 = vpop.f32.mrb[31].mxu0  ;;  %v1273_v26 = vpop.f32.mrb[30].mxu1  ;;  %6455 = vmatprep.subr.bf16.mxu0 %v7084_v1 }
 0x135   : > { %v6218_v29 = vpop.f32.mrb[31].mxu1 }
 0x136   : > { %v7821_v3 = vadd.f32 %v1273_v26, %v1099_v23 }
 0x137   : > { %6456 = vmatpush3.bf16.msra.mxu0 %v6954_v30 }
 0x138   : > { %6457 = vmatprep.subr.bf16.mxu0 %v7084_v1 }
 0x139   : > { %v1069_v10 = vpop.f32.mrb[32].mxu0 }
 0x13a   : > { %v1100_v31 = vadd.f32 %v1069_v10, %v7736_v17  ;;  %v6185_v32 = vpop.f32.mrb[33].mxu0  ;;  %v1278_v34 = vpop.f32.mrb[32].mxu1 }
 0x13b   : > { %v1072_v35 = vpop.f32.mrb[34].mxu0  ;;  %v6221_v37 = vpop.f32.mrb[33].mxu1  ;;  %6458 = vmatpush3.bf16.msra.mxu0 %v6957_v44 }
 0x13c   : > { %v1101_v38 = vadd.f32 %v1072_v35, %v7738_v22  ;;  %v1309_v39 = vadd.f32 %v1278_v34, %v1100_v31  ;;  %v6186_v42 = vpop.f32.mrb[35].mxu0  ;;  %v1281_v43 = vpop.f32.mrb[34].mxu1  ;;  %6515 = vmatprep.subr.bf16.mxu0 %v7084_v1 }
 0x13d   : > { %v6222_v45 = vpop.f32.mrb[35].mxu1 }
 0x13e   : > { %v1310_v46 = vadd.f32 %v1281_v43, %v1101_v38 }
 0x141   : > { %v1077_v17 = vpop.f32.mrb[36].mxu0 }
 0x142   : > { %v1102_v48 = vadd.f32 %v1077_v17, %v7745_v28  ;;  %v6189_v49 = vpop.f32.mrb[37].mxu0  ;;  %v1286_v22 = vpop.f32.mrb[36].mxu1 }
 0x143   : > { %v1080_v51 = vpop.f32.mrb[38].mxu0  ;;  %v6225_v52 = vpop.f32.mrb[37].mxu1 }
 0x144   : > { %v1103_v50 = vadd.f32 %v1080_v51, %v7747_v33  ;;  %v1311_v54 = vadd.f32 %v1286_v22, %v1102_v48  ;;  %v6190_v41 = vpop.f32.mrb[39].mxu0  ;;  %v1289_v56 = vpop.f32.mrb[38].mxu1 }
 0x145   : > { %v6226_v57 = vpop.f32.mrb[39].mxu1 }
 0x146   : > { %v1312_v55 = vadd.f32 %v1289_v56, %v1103_v50 }
 0x149   : > { %v1463_v47 = vpop.f32.mrb[40].mxu0 }
 0x14a   : > { %v1512_v60 = vadd.f32 %v1463_v47, %v7774_v53  ;;  %v6245_v63 = vpop.f32.mrb[41].mxu0  ;;  %v1719_v0 = vpop.f32.mrb[40].mxu1 }
 0x14b   : > { %v1466_v2 = vpop.f32.mrb[42].mxu0  ;;  %v6281_v4 = vpop.f32.mrb[41].mxu1 }
 0x14c   : > { %v1513_v28 = vadd.f32 %v1466_v2, %v7780_v58  ;;  %v1768_v5 = vadd.f32 %v1719_v0, %v1512_v60  ;;  %v6246_v62 = vpop.f32.mrb[43].mxu0  ;;  %v1722_v6 = vpop.f32.mrb[42].mxu1 }
 0x14d   : > { %v6282_v7 = vpop.f32.mrb[43].mxu1  ;;  %v280_v62 = vlaneseq }
 0x14e   : > { %v1769_v9 = vadd.f32 %v1722_v6, %v1513_v28 }
 0x151   : > { %v1471_v33 = vpop.f32.mrb[44].mxu0 }
 0x152   : > { %v1514_v59 = vadd.f32 %v1471_v33, %v7796_v8  ;;  %v6249_v11 = vpop.f32.mrb[45].mxu0  ;;  %v1727_v61 = vpop.f32.mrb[44].mxu1 }
 0x153   : > { %v1474_v13 = vpop.f32.mrb[46].mxu0  ;;  %v6285_v14 = vpop.f32.mrb[45].mxu1  ;;  %v7858_v11 = vshrl.u32 %v280_v62, 7 }
 0x154   : > { %v1515_v53 = vadd.f32 %v1474_v13, %v7802_v12  ;;  %v1770_v15 = vadd.f32 %v1727_v61, %v1514_v59  ;;  %v6250_v16 = vpop.f32.mrb[47].mxu0  ;;  %v1730_v18 = vpop.f32.mrb[46].mxu1 }
 0x155   : > { %v6286_v19 = vpop.f32.mrb[47].mxu1  ;;  %v7908_v62 = vadd.s32 48, %v7858_v11 }
 0x156   : > { %v1771_v20 = vadd.f32 %v1730_v18, %v1515_v53  ;;  %v7861_v18 = vmul.u32.u64.low 3435973837, %v7858_v11  ;;  %v7862_v19 = vmul.u32.u64.high 3435973837, %v7858_v11, %v7861_v18 }
 0x157   : > { %v7916_v18 = vadd.s32 56, %v7858_v11 }
 0x159   : > { %v1479_v58 = vpop.f32.mrb[48].mxu0 }
 0x15a   : > { %v1516_v21 = vadd.f32 %v1479_v58, %v7815_v24  ;;  %v6253_v23 = vpop.f32.mrb[49].mxu0  ;;  %v1735_v25 = vpop.f32.mrb[48].mxu1 }
 0x15b   : > { %v1482_v26 = vpop.f32.mrb[50].mxu0  ;;  %v6289_v27 = vpop.f32.mrb[49].mxu1 }
 0x15c   : > { %v1517_v8 = vadd.f32 %v1482_v26, %v7821_v3  ;;  %v7842_v29 = vadd.f32 %v1735_v25, %v1516_v21  ;;  %v6254_v30 = vpop.f32.mrb[51].mxu0  ;;  %v1738_v10 = vpop.f32.mrb[50].mxu1  ;;  %v282_v26 = vadd.s32 8, %v7858_v11  ;;  %v283_v27 = vadd.s32 16, %v7858_v11 }
 0x15d   : > { %v6290_v31 = vpop.f32.mrb[51].mxu1 }
 0x15e   : > { %v7844_v12 = vadd.f32 %v1738_v10, %v1517_v8  ;;  %v7873_v10 = vmul.u32.u64.low 3435973837, %v282_v26  ;;  %v7874_v31 = vmul.u32.u64.high 3435973837, %v282_v26, %v7873_v10 }
 0x161   : > { %v1487_v32 = vpop.f32.mrb[52].mxu0 }
 0x162   : > { %v1518_v34 = vadd.f32 %v1487_v32, %v1309_v39  ;;  %v6257_v35 = vpop.f32.mrb[53].mxu0  ;;  %v1743_v37 = vpop.f32.mrb[52].mxu1 }
 0x163   : > { %v1490_v38 = vpop.f32.mrb[54].mxu0  ;;  %v6293_v42 = vpop.f32.mrb[53].mxu1 }
 0x164   : > { %v1519_v24 = vadd.f32 %v1490_v38, %v1310_v46  ;;  %v7846_v43 = vadd.f32 %v1743_v37, %v1518_v34  ;;  %v6258_v44 = vpop.f32.mrb[55].mxu0  ;;  %v1746_v45 = vpop.f32.mrb[54].mxu1  ;;  %v7881_v38 = vadd.s32 32, %v7858_v11 }
 0x165   : > { %v6294_v17 = vpop.f32.mrb[55].mxu1  ;;  %v297_v44 = vshrl.u32 %v7862_v19, 3 }
 0x166   : > { %v7848_v3 = vadd.f32 %v1746_v45, %v1519_v24 }
 0x169   : > { %v1495_v48 = vpop.f32.mrb[56].mxu0 }
 0x16a   : > { %v1520_v49 = vadd.f32 %v1495_v48, %v1311_v54  ;;  %v6261_v22 = vpop.f32.mrb[57].mxu0  ;;  %v1751_v51 = vpop.f32.mrb[56].mxu1  ;;  %v7889_v48 = vadd.s32 40, %v7858_v11 }
 0x16b   : > { %v1498_v52 = vpop.f32.mrb[58].mxu0  ;;  %v6297_v50 = vpop.f32.mrb[57].mxu1 }
 0x16c   : > { %v1521_v41 = vadd.f32 %v1498_v52, %v1312_v55  ;;  %v7850_v39 = vadd.f32 %v1751_v51, %v1520_v49  ;;  %v6262_v56 = vpop.f32.mrb[59].mxu0  ;;  %v1754_v57 = vpop.f32.mrb[58].mxu1 }
 0x16d   : > { %v6298_v47 = vpop.f32.mrb[59].mxu1 }
 0x16e   : > { %v7852_v46 = vadd.f32 %v1754_v57, %v1521_v41  ;;  %v7897_v41 = vmul.u32.u64.low 3435973837, %v7881_v38  ;;  %v7898_v56 = vmul.u32.u64.high 3435973837, %v7881_v38, %v7897_v41  ;;  %v298_v57 = vmul.u32 10, %v297_v44 }
 0x171   : > { %v1943_v60 = vpop.f32.mrb[60].mxu0 }
 0x172   : > { %v1992_v63 = vadd.f32 %v1943_v60, %v1768_v5  ;;  %v6317_v0 = vpop.f32.mrb[61].mxu0  ;;  %v2166_v2 = vpop.f32.mrb[60].mxu1  ;;  %v7901_v47 = vmul.u32.u64.low 3435973837, %v7889_v48  ;;  %v7902_v60 = vmul.u32.u64.high 3435973837, %v7889_v48, %v7901_v47 }
 0x173   : > { %v1946_v4 = vpop.f32.mrb[62].mxu0  ;;  %v6353_v28 = vpop.f32.mrb[61].mxu1  ;;  %v308_v0 = vshrl.u32 %v7874_v31, 3 }
 0x174   : > { %v1993_v54 = vadd.f32 %v1946_v4, %v1769_v9  ;;  %v7854_v6 = vadd.f32 %v2166_v2, %v1992_v63  ;;  %v6318_v7 = vpop.f32.mrb[63].mxu0  ;;  %v2169_v33 = vpop.f32.mrb[62].mxu1 }
 0x175   : > { %v6354_v55 = vpop.f32.mrb[63].mxu1 }
 0x176   : > { %v7856_v59 = vadd.f32 %v2169_v33, %v1993_v54  ;;  %v299_v33 = vsub.s32 %v7858_v11, %v298_v57 }
 0x178   : > { %vm401_vm10 = vcmp.ne.s32.totalorder %v299_v33, 0  ;;  %vm411_vm11 = vcmp.lt.s32.totalorder %v299_v33, 0 }
 0x179   : > { %v1951_v61 = vpop.f32.mrb[64].mxu0  ;;  %vm7935_vm12 = vmand %vm411_vm11, %vm401_vm10 }
 0x17a   : > { %v1994_v13 = vadd.f32 %v1951_v61, %v1770_v15  ;;  %v6321_v14 = vpop.f32.mrb[65].mxu0  ;;  %v2174_v53 = vpop.f32.mrb[64].mxu1  ;;  %v7871_v15 = vadd.s32 24, %v7858_v11 }
 0x17b   : > { %v1954_v5 = vpop.f32.mrb[66].mxu0  ;;  %v6357_v16 = vpop.f32.mrb[65].mxu1 }
 0x17c   : > { %v1995_v9 = vadd.f32 %v1954_v5, %v1771_v20  ;;  %v7864_v58 = vadd.f32 %v2174_v53, %v1994_v13  ;;  %v6322_v21 = vpop.f32.mrb[67].mxu0  ;;  %v2177_v23 = vpop.f32.mrb[66].mxu1  ;;  %v7876_v32 = vmul.u32.u64.low 3435973837, %v283_v27  ;;  %v7877_v20 = vmul.u32.u64.high 3435973837, %v283_v27, %v7876_v32 }
 0x17d   : > { %v6358_v25 = vpop.f32.mrb[67].mxu1  ;;  %v7885_v45 = vmul.u32.u64.low 3435973837, %v7871_v15  ;;  %v7886_v17 = vmul.u32.u64.high 3435973837, %v7871_v15, %v7885_v45  ;;  %v309_v16 = vmul.u32 10, %v308_v0 }
 0x17e   : > { %v7868_v8 = vadd.f32 %v2177_v23, %v1995_v9  ;;  %v341_v9 = vshrl.u32 %v7898_v56, 3  ;;  %v7922_v21 = vmul.u32.u64.low 3435973837, %v7908_v62  ;;  %v7923_v23 = vmul.u32.u64.high 3435973837, %v7908_v62, %v7922_v21 }
 0x17f   : > { %v330_v55 = vshrl.u32 %v7886_v17, 3  ;;  %v352_v25 = vshrl.u32 %v7902_v60, 3  ;;  %v7926_v31 = vsub.s32 %v282_v26, %v309_v16  ;;  %v7962_v60 = vadd.s32 72, %v7858_v11 }
 0x180   : > { %v342_v44 = vmul.u32 10, %v341_v9  ;;  %v363_v57 = vshrl.u32 %v7923_v23, 3 }
 0x181   : > { %v1959_v30 = vpop.f32.mrb[68].mxu0  ;;  %vm402_vm13 = vcmp.ne.s32.totalorder %v7926_v31, 0  ;;  %vm412_vm14 = vcmp.lt.s32.totalorder %v7926_v31, 0  ;;  %v432_v0 = vadd.s32 10, %v7926_v31 }
 0x182   : > { %v1996_v34 = vadd.f32 %v1959_v30, %v7842_v29  ;;  %v6325_v35 = vpop.f32.mrb[69].mxu0  ;;  %v2182_v37 = vpop.f32.mrb[68].mxu1  ;;  %v431_v30 = vadd.s32 10, %v299_v33  ;;  %vm7964_vm10 = vmand %vm412_vm14, %vm402_vm13 }
 0x183   : > { %v1962_v42 = vpop.f32.mrb[70].mxu0  ;;  %v6361_v24 = vpop.f32.mrb[69].mxu1 }
 0x184   : > { %v1997_v49 = vadd.f32 %v1962_v42, %v7844_v12  ;;  %v7892_v22 = vadd.f32 %v2182_v37, %v1996_v34  ;;  %v6326_v29 = vpop.f32.mrb[71].mxu0  ;;  %v2185_v51 = vpop.f32.mrb[70].mxu1  ;;  %v319_v12 = vshrl.u32 %v7877_v20, 3  ;;  %v441_v41 = vsel %vm7935_vm12, %v431_v30, %v299_v33 }
 0x185   : > { %v6362_v52 = vpop.f32.mrb[71].mxu1  ;;  %v7931_v20 = vmul.u32.u64.low 3435973837, %v7916_v18  ;;  %v7932_v34 = vmul.u32.u64.high 3435973837, %v7916_v18, %v7931_v20  ;;  %vm7974_vm11 = vcmp.lt.s32.totalorder %v441_v41, 8 }
 0x186   : > { %v7894_v50 = vadd.f32 %v2185_v51, %v1997_v49  ;;  %v353_v49 = vmul.u32 10, %v352_v25 }
 0x188   : > { %v7959_v47 = vsub.s32 %v7889_v48, %v353_v49 }
 0x189   : > { %v1967_v63 = vpop.f32.mrb[72].mxu0 }
 0x18a   : > { %v1998_v2 = vadd.f32 %v1967_v63, %v7846_v43  ;;  %v6329_v4 = vpop.f32.mrb[73].mxu0  ;;  %v2190_v28 = vpop.f32.mrb[72].mxu1  ;;  %v320_v43 = vmul.u32 10, %v319_v12 }
 0x18b   : > { %v1970_v54 = vpop.f32.mrb[74].mxu0  ;;  %v6365_v7 = vpop.f32.mrb[73].mxu1 }
 0x18c   : > { %v1999_v61 = vadd.f32 %v1970_v54, %v7848_v3  ;;  %v7913_v13 = vadd.f32 %v2190_v28, %v1998_v2  ;;  %v6330_v14 = vpop.f32.mrb[75].mxu0  ;;  %v2193_v53 = vpop.f32.mrb[74].mxu1  ;;  %v331_v3 = vmul.u32 10, %v330_v55  ;;  %v7928_v32 = vsub.s32 %v283_v27, %v320_v43 }
 0x18d   : > { %v6366_v5 = vpop.f32.mrb[75].mxu1  ;;  %v374_v7 = vshrl.u32 %v7932_v34, 3  ;;  %v364_v14 = vmul.u32 10, %v363_v57  ;;  %v442_v43 = vsel %vm7964_vm10, %v432_v0, %v7926_v31 }
 0x18e   : > { %v7918_v19 = vadd.f32 %v2193_v53, %v1999_v61  ;;  %v332_v26 = vsub.s32 %v7871_v15, %v331_v3  ;;  %vm403_vm15 = vcmp.ne.s32.totalorder %v7928_v32, 0  ;;  %vm413_vm4 = vcmp.lt.s32.totalorder %v7928_v32, 0 }
 0x18f   : > { %v433_v12 = vadd.s32 10, %v7928_v32  ;;  %vm7985_vm12 = vmand %vm413_vm4, %vm403_vm15  ;;  %vm406_vm15 = vcmp.ne.s32.totalorder %v7959_v47, 0  ;;  %vm416_vm4 = vcmp.lt.s32.totalorder %v7959_v47, 0  ;;  %v375_v31 = vmul.u32 10, %v374_v7 }
 0x190   : > { %vm404_vm7 = vcmp.ne.s32.totalorder %v332_v26, 0  ;;  %vm414_vm8 = vcmp.lt.s32.totalorder %v332_v26, 0  ;;  %v434_v54 = vadd.s32 10, %v332_v26  ;;  %v8033_v34 = vsub.s32 %v7908_v62, %v364_v14 }
 0x191   : > { %v1975_v10 = vpop.f32.mrb[76].mxu0  ;;  %vm7993_vm13 = vmand %vm414_vm8, %vm404_vm7  ;;  %v443_v23 = vsel %vm7985_vm12, %v433_v12, %v7928_v32  ;;  %vm452_vm10 = vcmp.lt.s32.totalorder %v442_v43, 8  ;;  %v8054_v49 = vsub.s32 %v7916_v18, %v375_v31 }
 0x192   : > { %v2000_v35 = vadd.f32 %v1975_v10, %v7850_v39  ;;  %v6333_v37 = vpop.f32.mrb[77].mxu0  ;;  %v2198_v42 = vpop.f32.mrb[76].mxu1  ;;  %v7944_v39 = vadd.s32 64, %v7858_v11  ;;  %v7981_v11 = vld [vmem:[%s8680_s2] ss:$0 sm:$0xff]  ;;  %v444_v3 = vsel %vm7993_vm13, %v434_v54, %v332_v26  ;;  %v8021_v10 = vadd.s32 10, %v7959_v47  ;;  %vm8028_vm8 = vmand %vm416_vm4, %vm406_vm15 }
 0x193   : > { %v1978_v45 = vpop.f32.mrb[78].mxu0  ;;  %v6369_v17 = vpop.f32.mrb[77].mxu1  ;;  %vm8035_vm12 = vcmp.lt.s32.totalorder %v443_v23, 8  ;;  %vm8041_vm13 = vcmp.lt.s32.totalorder %v444_v3, 8  ;;  %v437_v12 = vadd.s32 10, %v8033_v34  ;;  %vm408_vm4 = vcmp.ne.s32.totalorder %v8054_v49, 0 }
 0x194   : > { %v2001_v27 = vadd.f32 %v1978_v45, %v7852_v46  ;;  %v7941_v29 = vadd.f32 %v2198_v42, %v2000_v35  ;;  %v6334_v51 = vpop.f32.mrb[79].mxu0  ;;  %v2201_v52 = vpop.f32.mrb[78].mxu1  ;;  %v7955_v46 = vsub.s32 %v7881_v38, %v342_v44  ;;  %v446_v26 = vsel %vm8028_vm8, %v8021_v10, %v7959_v47  ;;  %v2725_v54 = vld [vmem:[#allocation2 + $0x4] sm:$0xe] }
 0x195   : > { %v6370_v15 = vpop.f32.mrb[79].mxu1  ;;  %v7971_v38 = vmul.u32.u64.low 3435973837, %v7944_v39  ;;  %v7972_v2 = vmul.u32.u64.high 3435973837, %v7944_v39, %v7971_v38  ;;  %v438_v43 = vadd.s32 10, %v8054_v49 }
 0x196   : > { %v7951_v56 = vadd.f32 %v2201_v52, %v2001_v27  ;;  %vm405_vm14 = vcmp.ne.s32.totalorder %v7955_v46, 0  ;;  %vm415_vm3 = vcmp.lt.s32.totalorder %v7955_v46, 0  ;;  %v435_v30 = vadd.s32 10, %v7955_v46 }
 0x197   : > { %vm8015_vm7 = vmand %vm415_vm3, %vm405_vm14  ;;  %vm2613_vm3 = vsmask.f32 5392  ;;  %v385_v44 = vshrl.u32 %v7972_v2, 3  ;;  %vm417_vm14 = vcmp.lt.s32.totalorder %v8033_v34, 0 }
 0x198   : > { %v445_v62 = vsel %vm8015_vm7, %v435_v30, %v7955_v46  ;;  %vm418_vm7 = vcmp.lt.s32.totalorder %v8054_v49, 0 }
 0x199   : > { %v2432_v48 = vpop.f32.mrb[80].mxu0  ;;  %v386_v38 = vmul.u32 10, %v385_v44  ;;  %vm8063_vm15 = vcmp.lt.s32.totalorder %v445_v62, 8 }
 0x19a   : > { %v2481_v33 = vadd.f32 %v2432_v48, %v7854_v6  ;;  %v6389_v55 = vpop.f32.mrb[81].mxu0  ;;  %v8002_v5 = vmul.u32.u64.low 3435973837, %v7962_v60  ;;  %v8003_v6 = vmul.u32.u64.high 3435973837, %v7962_v60, %v8002_v5 }
 0x19b   : > { %v2435_v53 = vpop.f32.mrb[82].mxu0 }
 0x19c   : > { %v2518_v16 = vadd.f32 %v7981_v11, %v2481_v33  ;;  %v2482_v9 = vadd.f32 %v2435_v53, %v7856_v59  ;;  %v6390_v21 = vpop.f32.mrb[83].mxu0  ;;  %v396_v63 = vshrl.u32 %v8003_v6, 3 }
 0x19e   : > { %v2528_v20 = vmax.f32 %v2518_v16, 0.0  ;;  %v2519_v59 = vadd.f32 %v7981_v11, %v2482_v9  ;;  %v397_v53 = vmul.u32 10, %v396_v63  ;;  %v8088_v9 = vsub.s32 %v7944_v39, %v386_v38 }
 0x1a0   : > { %v2558_v37 = vsel %vm7974_vm11, %v2528_v20, 0.0  ;;  %v2529_v42 = vmax.f32 %v2519_v59, 0.0  ;;  %vm407_vm11 = vcmp.ne.s32.totalorder %v8033_v34, 0  ;;  %v8113_v24 = vsub.s32 %v7962_v60, %v397_v53 }
 0x1a1   : > { %v5787_v45 = vpack.c.bf16 %v2558_v37, %v2558_v37  ;;  %v2440_v17 = vpop.f32.mrb[84].mxu0  ;;  %vm8074_vm8 = vmand %vm417_vm14, %vm407_vm11 }
 0x1a2   : > { %v2559_v27 = vsel %vm452_vm10, %v2529_v42, 0.0  ;;  %v2483_v51 = vadd.f32 %v2440_v17, %v7864_v58  ;;  %v6393_v52 = vpop.f32.mrb[85].mxu0  ;;  %vm8080_vm10 = vmor %vm2575_vm5, %vm2613_vm3  ;;  %vm8103_vm3 = vcmp.lt.s32.totalorder %v446_v26, 8  ;;  %v447_v59 = vsel %vm8074_vm8, %v437_v12, %v8033_v34 }
 0x1a3   : > { %v2616_v41 = vshrl.u32 %v5787_v45, 16  ;;  %v2619_v15 = vshll.u32 %v5787_v45, 16  ;;  %v5788_v57 = vpack.c.bf16 %v2559_v27, %v2559_v27  ;;  %v2443_v46 = vpop.f32.mrb[86].mxu0  ;;  %vm8096_vm5 = vmand %vm418_vm7, %vm408_vm4  ;;  %vm410_vm14 = vcmp.ne.s32.totalorder %v8113_v24, 0 }
 0x1a4   : > { %v2520_v0 = vadd.f32 %v7981_v11, %v2483_v51  ;;  %v2484_v47 = vadd.f32 %v2443_v46, %v7868_v8  ;;  %v6394_v18 = vpop.f32.mrb[87].mxu0  ;;  %v448_v34 = vsel %vm8096_vm5, %v438_v43, %v8054_v49  ;;  %v439_v49 = vadd.s32 10, %v8088_v9 }
 0x1a5   : > { %v2618_v58 = vrot.slane %v2616_v41, 6  ;;  %v2621_v2 = vrot.slane %v2619_v15, 7  ;;  %v2625_v4 = vshrl.u32 %v5788_v57, 16  ;;  %v2628_v48 = vshll.u32 %v5788_v57, 16  ;;  %v6952_v18 = vld [vmem:[%s8681_s3 + $0x80] sm:$0xff]   ;;  %v6962_v57 = vld [vmem:[%s8681_s3 + $0x98] sm:$0xff]  }
 0x1a6   : > { %v2530_v7 = vmax.f32 %v2520_v0, 0.0  ;;  %v2521_v33 = vadd.f32 %v7981_v11, %v2484_v47  ;;  %vm8127_vm11 = vcmp.lt.s32.totalorder %v448_v34, 8 }
 0x1a7   : > { %v2622_v8 = vor.u32 %v2621_v2, %v2618_v58  ;;  %v2627_v55 = vrot.slane %v2625_v4, 6  ;;  %v2630_v61 = vrot.slane %v2628_v48, 7 }
 0x1a8   : > { %v2560_v6 = vsel %vm8035_vm12, %v2530_v7, 0.0  ;;  %v2531_v16 = vmax.f32 %v2521_v33, 0.0  ;;  %vm409_vm12 = vcmp.ne.s32.totalorder %v8088_v9, 0 }
 0x1a9   : > { %v2623_v21 = vrot.slane %v2622_v8, 4  ;;  %v2726_v23 = vsel %vm7759_vm9, %v2622_v8, %v2725_v54  ;;  %v2631_v3 = vor.u32 %v2630_v61, %v2627_v55  ;;  %v5789_v25 = vpack.c.bf16 %v2560_v6, %v2560_v6  ;;  %v2448_v30 = vpop.f32.mrb[88].mxu0  ;;  %v6955_v8 = vld [vmem:[%s8681_s3 + $0x88] sm:$0xff]  }
 0x1aa   : > { %2727 = vst [vmem:[#allocation2 + $0x4] sm:$0xe] %v2726_v23  ;;  %v2561_v39 = vsel %vm8041_vm13, %v2531_v16, 0.0  ;;  %v2485_v31 = vadd.f32 %v2448_v30, %v7892_v22  ;;  %v6397_v20 = vpop.f32.mrb[89].mxu0  ;;  %vm8120_vm9 = vcmp.lt.s32.totalorder %v447_v59, 8  ;;  %vm419_vm13 = vcmp.lt.s32.totalorder %v8088_v9, 0 }
 0x1ab   : > { %v2632_v32 = vsel %vm8080_vm10, %v2623_v21, %v2631_v3  ;;  %v2635_v35 = vshrl.u32 %v5789_v25, 16  ;;  %v2638_v37 = vshll.u32 %v5789_v25, 16  ;;  %v2451_v42 = vpop.f32.mrb[90].mxu0  ;;  %v5790_v22 = vpack.c.bf16 %v2561_v39, %v2561_v39  ;;  %vm8142_vm4 = vmand %vm419_vm13, %vm409_vm12 }
 0x1ac   : > { %2728 = vst [vmem:[#allocation2 + $0x8] sm:$0xf] %v2632_v32  ;;  %v2522_v44 = vadd.f32 %v7981_v11, %v2485_v31  ;;  %v2486_v45 = vadd.f32 %v2451_v42, %v7894_v50  ;;  %v6398_v17 = vpop.f32.mrb[91].mxu0  ;;  %v2633_v41 = vrot.slane %v2631_v3, 4  ;;  %v449_v6 = vsel %vm8142_vm4, %v439_v49, %v8088_v9  ;;  %v6968_v32 = vld [vmem:[%s8681_s3 + $0xc8] sm:$0xff]  }
 0x1ad   : > { %v2637_v62 = vrot.slane %v2635_v35, 6  ;;  %v2640_v26 = vrot.slane %v2638_v37, 7  ;;  %v2645_v60 = vshrl.u32 %v5790_v22, 16  ;;  %v2648_v51 = vshll.u32 %v5790_v22, 16 }
 0x1ae   : > { %v2532_v52 = vmax.f32 %v2522_v44, 0.0  ;;  %v2523_v50 = vadd.f32 %v7981_v11, %v2486_v45  ;;  %v440_v3 = vadd.s32 10, %v8113_v24  ;;  %vm8180_vm8 = vcmp.lt.s32.totalorder %v449_v6, 8  ;;  %v6958_v44 = vld [vmem:[%s8681_s3 + $0x90] sm:$0xff]  }
 0x1af   : > { %v2641_v15 = vor.u32 %v2640_v26, %v2637_v62  ;;  %v2647_v46 = vrot.slane %v2645_v60, 6  ;;  %v2650_v63 = vrot.slane %v2648_v51, 7  ;;  %vm4397_vm12 = vsmask.f32 5376 }
 0x1b0   : > { %v2562_v0 = vsel %vm8063_vm15, %v2532_v52, 0.0  ;;  %v2533_v47 = vmax.f32 %v2523_v50, 0.0  ;;  %vm420_vm15 = vcmp.lt.s32.totalorder %v8113_v24, 0  ;;  %vm4663_vm13 = vcmask 1044480  }
 0x1b1   : > { %v2642_v38 = vsel %vm8080_vm10, %v2633_v41, %v2641_v15  ;;  %v2643_v58 = vrot.slane %v2641_v15, 4  ;;  %v5791_v2 = vpack.c.bf16 %v2562_v0, %v2562_v0  ;;  %v2456_v4 = vpop.f32.mrb[92].mxu0  ;;  %v6951_v48 = vld [vmem:[#allocation2] sm:$0xff]   ;;  %v2651_v28 = vor.u32 %v2650_v63, %v2647_v46  ;;  %vm8173_vm7 = vmand %vm420_vm15, %vm410_vm14 }
 0x1b2   : > { %2729 = vst [vmem:[#allocation2 + $0xc] sm:$0xf] %v2642_v38  ;;  %v2563_v54 = vsel %vm8103_vm3, %v2533_v47, 0.0  ;;  %v2487_v7 = vadd.f32 %v2456_v4, %v7913_v13  ;;  %v6401_v33 = vpop.f32.mrb[93].mxu0  ;;  %6424 = vmatmul.mubr.bf16.vlgmr.msra.gmra.mrb[80].mxu1 %v6951_v48  ;;  %v8158_v16 = vld [vmem:[#allocation2] sm:$0xff]   ;;  %v450_v41 = vsel %vm8173_vm7, %v440_v3, %v8113_v24 }
 0x1b3   : > { %v2655_v55 = vshrl.u32 %v5791_v2, 16  ;;  %v2658_v61 = vshll.u32 %v5791_v2, 16  ;;  %v5792_v14 = vpack.c.bf16 %v2563_v54, %v2563_v54  ;;  %v2459_v53 = vpop.f32.mrb[94].mxu0  ;;  %v2652_v43 = vsel %vm8080_vm10, %v2643_v58, %v2651_v28  ;;  %6480 = vmatpush3.bf16.msra.mxu1 %v6952_v18  ;;  %6427 = vmatprep.mubr.msk.bf16.mxu1 %vm7085_vm0, %v7084_v1  ;;  %v6965_v33 = vld [vmem:[%s8681_s3 + $0xc0] sm:$0xff]  }
 0x1b4   : > { %v2524_v13 = vadd.f32 %v7981_v11, %v2487_v7  ;;  %v2488_v21 = vadd.f32 %v2459_v53, %v7918_v19  ;;  %v6402_v23 = vpop.f32.mrb[95].mxu0  ;;  %2730 = vst [vmem:[#allocation2 + $0x10] sm:$0xf] %v2652_v43  ;;  %6481 = vmatprep.subr.bf16.mxu1 %v7084_v1  ;;  %v2653_v39 = vrot.slane %v2651_v28, 4  ;;  %v2986_v35 = vshll.u32 %v8158_v16, 16  ;;  %v6964_v7 = vld [vmem:[%s8681_s3 + $0xa0] sm:$0xff]  }
 0x1b5   : > { %v2657_v25 = vrot.slane %v2655_v55, 6  ;;  %v2660_v30 = vrot.slane %v2658_v61, 7  ;;  %v2665_v9 = vshrl.u32 %v5792_v14, 16  ;;  %v2668_v10 = vshll.u32 %v5792_v14, 16 }
 0x1b6   : > { %v2534_v31 = vmax.f32 %v2524_v13, 0.0  ;;  %v2525_v20 = vadd.f32 %v7981_v11, %v2488_v21  ;;  %v2988_v0 = vrot.slane %v2986_v35, 1  ;;  %vm8208_vm5 = vcmp.lt.s32.totalorder %v450_v41, 8 }
 0x1b7   : > { %v2661_v40 = vor.u32 %v2660_v30, %v2657_v25  ;;  %v2667_v19 = vrot.slane %v2665_v9, 6  ;;  %v2670_v59 = vrot.slane %v2668_v10, 7  ;;  %6482 = vmatpush3.bf16.msra.mxu1 %v6955_v8  ;;  %v2984_v4 = vshrl.u32 %v8158_v16, 16 }
 0x1b8   : > { %v2564_v37 = vsel %vm8120_vm9, %v2534_v31, 0.0  ;;  %v2535_v42 = vmax.f32 %v2525_v20, 0.0  ;;  %6483 = vmatprep.subr.bf16.mxu1 %v7084_v1 }
 0x1b9   : > { %v2662_v45 = vsel %vm8080_vm10, %v2653_v39, %v2661_v40  ;;  %v2663_v17 = vrot.slane %v2661_v40, 4  ;;  %v2671_v34 = vor.u32 %v2670_v59, %v2667_v19  ;;  %v5793_v62 = vpack.c.bf16 %v2564_v37, %v2564_v37  ;;  %v2464_v26 = vpop.f32.mrb[96].mxu0  ;;  %v6956_v60 = vld [vmem:[#allocation2 + $0x8] sm:$0xff]  }
 0x1ba   : > { %v8190_v27 = vld [vmem:[#allocation2 + $0x8] sm:$0xff]   ;;  %2731 = vst [vmem:[#allocation2 + $0x14] sm:$0xf] %v2662_v45  ;;  %v2565_v51 = vsel %vm8127_vm11, %v2535_v42, 0.0  ;;  %v2489_v52 = vadd.f32 %v2464_v26, %v7941_v29  ;;  %v6405_v50 = vpop.f32.mrb[97].mxu0  ;;  %6428 = vmatmul.mubr.bf16.gmra.mrb[84].mxu1 %v6956_v60  ;;  %v2989_v61 = vor.u32 %v2988_v0, %v2984_v4  ;;  %v6970_v60 = vld [vmem:[%s8681_s3 + $0xd0] sm:$0xff]  }
 0x1bb   : > { %v2672_v15 = vsel %vm8080_vm10, %v2663_v17, %v2671_v34  ;;  %v2675_v49 = vshrl.u32 %v5793_v62, 16  ;;  %v2678_v46 = vshll.u32 %v5793_v62, 16  ;;  %v2467_v63 = vpop.f32.mrb[98].mxu0  ;;  %v5794_v47 = vpack.c.bf16 %v2565_v51, %v2565_v51  ;;  %6484 = vmatpush3.bf16.msra.mxu1 %v6958_v44  ;;  %6431 = vmatprep.mubr.msk.bf16.mxu1 %vm7085_vm0, %v7084_v1  ;;  %v6967_v59 = vld [vmem:[%s8681_s3 + $0xa8] sm:$0xff]   ;;  %v6971_v51 = vld [vmem:[%s8681_s3 + $0xb0] sm:$0xff]  }
 0x1bc   : > { %2732 = vst [vmem:[#allocation2 + $0x18] sm:$0xf] %v2672_v15  ;;  %v2526_v29 = vadd.f32 %v7981_v11, %v2489_v52  ;;  %v2490_v18 = vadd.f32 %v2467_v63, %v7951_v56  ;;  %v6406_v12 = vpop.f32.mrb[99].mxu0  ;;  %v2991_v24 = vshll.u32 %v8190_v27, 16  ;;  %6485 = vmatprep.subr.bf16.mxu1 %v7084_v1  ;;  %v2673_v8 = vrot.slane %v2671_v34, 4  ;;  %v6978_v4 = vld [vmem:[#allocation2 + $0x8] sm:$0xff]  }
 0x1bd   : > { %v2677_v38 = vrot.slane %v2675_v49, 6  ;;  %v2680_v58 = vrot.slane %v2678_v46, 7  ;;  %v2685_v48 = vshrl.u32 %v5794_v47, 16  ;;  %v2688_v28 = vshll.u32 %v5794_v47, 16  ;;  %v2737_v49 = vld [vmem:[#allocation2 + $0x2c] sm:$0x3] }
 0x1be   : > { %v2536_v56 = vmax.f32 %v2526_v29, 0.0  ;;  %v2527_v54 = vadd.f32 %v7981_v11, %v2490_v18  ;;  %v2993_v14 = vrot.slane %v2991_v24, 1  ;;  %v2995_v40 = vshrl.u32 %v8190_v27, 16  ;;  %v6974_v18 = vld [vmem:[%s8681_s3 + $0xb8] sm:$0xff]  }
 0x1bf   : > { %v2681_v55 = vor.u32 %v2680_v58, %v2677_v38  ;;  %v2687_v53 = vrot.slane %v2685_v48, 6  ;;  %v2690_v6 = vrot.slane %v2688_v28, 7  ;;  %6486 = vmatpush3.bf16.msra.mxu1 %v6962_v57  ;;  %v6973_v57 = vld [vmem:[%s8681_s3 + $0xd8] sm:$0xff]   ;;  %v6980_v48 = vld [vmem:[%s8681_s3 + $0xe8] sm:$0xff]  }
 0x1c0   : > { %v2566_v16 = vsel %vm8180_vm8, %v2536_v56, 0.0  ;;  %v2537_v43 = vmax.f32 %v2527_v54, 0.0  ;;  %v2994_v23 = vsel %vm913_vm1, %v2989_v61, %v2993_v14  ;;  %6487 = vmatprep.subr.bf16.mxu1 %v7084_v1  ;;  %v2997_v44 = vor.u32 %v2995_v40, %v2993_v14  ;;  %v6977_v54 = vld [vmem:[#allocation2] sm:$0xfe]  }
 0x1c1   : > { %v2682_v11 = vsel %vm8080_vm10, %v2673_v8, %v2681_v55  ;;  %v2683_v13 = vrot.slane %v2681_v55, 4  ;;  %v5795_v21 = vpack.c.bf16 %v2566_v16, %v2566_v16  ;;  %v6961_v3 = vld [vmem:[#allocation2 + $0x10] sm:$0xff]   ;;  %v2691_v25 = vor.u32 %v2690_v6, %v2687_v53  ;;  %6460 = vmatmul.mubr.bf16.vlgmr.msra.gmra.mrb[100].mxu0 %v2994_v23  ;;  %v6979_v61 = vld [vmem:[%s8681_s3 + $0x100] sm:$0xff]   ;;  %v6985_v23 = vld [vmem:[%s8681_s3 + $0xf8] sm:$0xff]  }
 0x1c2   : > { %2733 = vst [vmem:[#allocation2 + $0x1c] sm:$0xf] %v2682_v11  ;;  %v2567_v30 = vsel %vm8208_vm5, %v2537_v43, 0.0  ;;  %v6963_v9 = vld [vmem:[#allocation2 + $0x10] sm:$0xff]   ;;  %6432 = vmatmul.mubr.bf16.gmra.mrb[88].mxu1 %v6961_v3  ;;  %6463 = vmatprep.mubr.msk.bf16.mxu0 %vm7085_vm0, %v7084_v1  ;;  %v3240_v55 = vrot.slane %v6978_v4, 1  ;;  %v3239_v53 = vrot.slane %v6977_v54, 1 }
 0x1c3   : > { %v2695_v10 = vshrl.u32 %v5795_v21, 16  ;;  %v2698_v39 = vshll.u32 %v5795_v21, 16  ;;  %v5796_v31 = vpack.c.bf16 %v2567_v30, %v2567_v30  ;;  %v2692_v20 = vsel %vm8080_vm10, %v2683_v13, %v2691_v25  ;;  %6488 = vmatpush3.bf16.msra.mxu1 %v6964_v7  ;;  %6516 = vmatpush3.bf16.msra.mxu0 %v6965_v33  ;;  %v6982_v6 = vld [vmem:[%s8681_s3 + $0xf0] sm:$0xff]   ;;  %v6983_v21 = vld [vmem:[%s8681_s3 + $0x108] sm:$0xff]  }
 0x1c4   : > { %v2999_v19 = vshll.u32 %v6963_v9, 16  ;;  %2734 = vst [vmem:[#allocation2 + $0x20] sm:$0xf] %v2692_v20  ;;  %6435 = vmatprep.mubr.msk.bf16.mxu1 %vm7085_vm0, %v7084_v1  ;;  %6489 = vmatprep.subr.bf16.mxu1 %v7084_v1  ;;  %v2693_v17 = vrot.slane %v2691_v25, 4  ;;  %v3003_v47 = vshrl.u32 %v6963_v9, 16  ;;  %v3241_v43 = vsel %vm1844_vm2, %v3239_v53, %v3240_v55  ;;  %v6984_v11 = vld [vmem:[#allocation2 + $0x10] sm:$0xff]  }
 0x1c5   : > { %v2697_v35 = vrot.slane %v2695_v10, 6  ;;  %v2700_v37 = vrot.slane %v2698_v39, 7  ;;  %v2705_v42 = vshrl.u32 %v5796_v31, 16  ;;  %v2708_v22 = vshll.u32 %v5796_v31, 16  ;;  %6517 = vmatprep.subr.bf16.mxu0 %v7084_v1  ;;  %v6986_v9 = vld [vmem:[%s8681_s3 + $0x110] sm:$0xff]   ;;  %v7008_v54 = vld [vmem:[%s8681_s3 + $0x168] sm:$0xff]  }
 0x1c6   : > { %v3001_v45 = vrot.slane %v2999_v19, 1  ;;  %v3242_v30 = vrot.slane %v6984_v11, 1  ;;  %v6988_v39 = vld [vmem:[#allocation2 + $0xc] sm:$0xff]   ;;  %v6987_v40 = vld [vmem:[#allocation2 + $0x4] sm:$0xfe]   ;;  %v6990_v19 = vld [vmem:[%s8681_s3 + $0x118] sm:$0xff]  }
 0x1c7   : > { %v2701_v34 = vor.u32 %v2700_v37, %v2697_v35  ;;  %v2707_v62 = vrot.slane %v2705_v42, 6  ;;  %v2710_v26 = vrot.slane %v2708_v22, 7  ;;  %6490 = vmatpush3.bf16.msra.mxu1 %v6967_v59  ;;  %6518 = vmatpush3.bf16.msra.mxu0 %v6968_v32  ;;  %v3463_v59 = vrot.slane %v6988_v39, 1  ;;  %v6992_v37 = vld [vmem:[%s8681_s3 + $0x120] sm:$0xff]   ;;  %v7010_v53 = vld [vmem:[%s8681_s3 + $0x170] sm:$0xff]  }
 0x1c8   : > { %v3002_v27 = vsel %vm913_vm1, %v2997_v44, %v3001_v45  ;;  %6519 = vmatprep.subr.bf16.mxu0 %v7084_v1  ;;  %6491 = vmatprep.subr.bf16.mxu1 %v7084_v1  ;;  %v3005_v12 = vor.u32 %v3003_v47, %v3001_v45  ;;  %v3243_v31 = vsel %vm1844_vm2, %v3240_v55, %v3242_v30  ;;  %v3462_v35 = vrot.slane %v6987_v40, 1  ;;  %v6993_v42 = vld [vmem:[%s8681_s3 + $0x140] sm:$0xff]   ;;  %v6991_v44 = vld [vmem:[#allocation2 + $0x14] sm:$0xff]  }
 0x1c9   : > { %v2702_v52 = vsel %vm8080_vm10, %v2693_v17, %v2701_v34  ;;  %v2703_v50 = vrot.slane %v2701_v34, 4  ;;  %v2711_v41 = vor.u32 %v2710_v26, %v2707_v62  ;;  %v6966_v15 = vld [vmem:[#allocation2 + $0x18] sm:$0xff]   ;;  %6464 = vmatmul.mubr.bf16.gmra.mrb[104].mxu0 %v3002_v27  ;;  %v6995_v34 = vld [vmem:[%s8681_s3 + $0x128] sm:$0xff]   ;;  %v3465_v26 = vrot.slane %v6991_v44, 1  ;;  %v6998_v27 = vld [vmem:[%s8681_s3 + $0x150] sm:$0xff]  }
 0x1ca   : > { %2735 = vst [vmem:[#allocation2 + $0x24] sm:$0xf] %v2702_v52  ;;  %v6969_v46 = vld [vmem:[#allocation2 + $0x18] sm:$0xff]   ;;  %6436 = vmatmul.mubr.bf16.gmra.mrb[92].mxu1 %v6966_v15  ;;  %6467 = vmatprep.mubr.msk.bf16.mxu0 %vm7085_vm0, %v7084_v1  ;;  %v3464_v22 = vsel %vm1844_vm2, %v3462_v35, %v3463_v59  ;;  %v6996_v62 = vld [vmem:[%s8681_s3 + $0x148] sm:$0xff]   ;;  %v7014_v39 = vld [vmem:[%s8681_s3 + $0x190] sm:$0xff]  }
 0x1cb   : > { %v2712_v63 = vsel %vm8080_vm10, %v2703_v50, %v2711_v41  ;;  %v2713_v0 = vrot.slane %v2711_v41, 4  ;;  %v3007_v29 = vshll.u32 %v6969_v46, 16  ;;  %6520 = vmatpush3.bf16.msra.mxu0 %v6970_v60  ;;  %6439 = vmatprep.mubr.msk.bf16.mxu1 %vm7085_vm0, %v7084_v1  ;;  %v3011_v28 = vshrl.u32 %v6969_v46, 16  ;;  %v6989_v20 = vld [vmem:[#allocation2 + $0x18] sm:$0xff]   ;;  %v7006_v41 = vld [vmem:[#allocation2 + $0xc] sm:$0xff]  }
 0x1cc   : > { %2736 = vst [vmem:[#allocation2 + $0x28] sm:$0xf] %v2712_v63  ;;  %6492 = vmatpush3.bf16.msra.mxu1 %v6971_v51  ;;  %6521 = vmatprep.subr.bf16.mxu0 %v7084_v1  ;;  %v3244_v32 = vrot.slane %v6989_v20, 1  ;;  %v6999_v51 = vld [vmem:[%s8681_s3 + $0x130] sm:$0xff]   ;;  %v3466_v52 = vsel %vm1844_vm2, %v3463_v59, %v3465_v26  ;;  %v6997_v50 = vld [vmem:[#allocation2 + $0x1c] sm:$0xff]   ;;  %v3694_v47 = vshrl.u32 %v7006_v41, 16 }
 0x1cd   : > { %v2738_v5 = vsel %vm7753_vm6, %v2713_v0, %v2737_v49  ;;  %v3009_v24 = vrot.slane %v3007_v29, 1  ;;  %6493 = vmatprep.subr.bf16.mxu1 %v7084_v1  ;;  %v7001_v46 = vld [vmem:[%s8681_s3 + $0x158] sm:$0xff]   ;;  %v7005_v0 = vld [vmem:[#allocation2 + $0x4] sm:$0xfe]   ;;  %v7016_v20 = vld [vmem:[#allocation2 + $0xc] sm:$0xff]  }
 0x1ce   : > { %2739 = vst [vmem:[#allocation2 + $0x2c] sm:$0x3] %v2738_v5  ;;  %v3245_v45 = vsel %vm1844_vm2, %v3242_v30, %v3244_v32  ;;  %v7002_v63 = vld [vmem:[%s8681_s3 + $0x138] sm:$0xff]   ;;  %v3697_v5 = vshll.u32 %v7006_v41, 16  ;;  %v7015_v35 = vld [vmem:[#allocation2 + $0x4] sm:$0xfc]  }
 0x1cf   : > { %v3010_v38 = vsel %vm913_vm1, %v3005_v12, %v3009_v24  ;;  %6522 = vmatpush3.bf16.msra.mxu0 %v6973_v57  ;;  %v3013_v33 = vor.u32 %v3011_v28, %v3009_v24  ;;  %v3467_v57 = vrot.slane %v6997_v50, 1  ;;  %v3686_v12 = vshrl.u32 %v7005_v0, 16  ;;  %v7023_v41 = vld [vmem:[%s8681_s3 + $0x1a8] sm:$0xff]  }
 0x1d0   : > { %6494 = vmatpush3.bf16.msra.mxu1 %v6974_v18  ;;  %6523 = vmatprep.subr.bf16.mxu0 %v7084_v1  ;;  %v7004_v18 = vld [vmem:[%s8681_s3 + $0x160] sm:$0xff]   ;;  %v3689_v24 = vshll.u32 %v7005_v0, 16  ;;  %v3699_v4 = vrot.slane %v3697_v5, 2  ;;  %v7027_v5 = vld [vmem:[%s8681_s3 + $0x1b0] sm:$0xff]  }
 0x1d1   : > { %v6972_v58 = vld [vmem:[#allocation2 + $0x20] sm:$0xff]   ;;  %6468 = vmatmul.mubr.bf16.gmra.mrb[108].mxu0 %v3010_v38  ;;  %6551 = vmatprep.subr.bf16.mxu1 %v7084_v1  ;;  %v3468_v38 = vsel %vm1844_vm2, %v3465_v26, %v3467_v57  ;;  %v3688_v28 = vrot.slane %v3686_v12, 1 }
 0x1d2   : > { %v6975_v2 = vld [vmem:[#allocation2 + $0x20] sm:$0xff]   ;;  %6440 = vmatmul.mubr.bf16.gmra.mrb[96].mxu1 %v6972_v58  ;;  %6471 = vmatprep.mubr.msk.bf16.mxu0 %vm7085_vm0, %v7084_v1 }
 0x1d3   : > { %v3015_v56 = vshll.u32 %v6975_v2, 16  ;;  %6524 = vmatpush3.bf16.msra.mxu0 %v6976_v36  ;;  %6495 = vmatprep.mubr.msk.bf16.mxu1 %vm7085_vm0, %v7084_v1  ;;  %v6981_v7 = vld [vmem:[#allocation2 + $0x28] ss:$0 sps:$4 sm:$0x11]   ;;  %v3019_v13 = vshrl.u32 %v6975_v2, 16  ;;  %v6994_v17 = vld [vmem:[#allocation2 + $0x20] sm:$0xff]  }
 0x1d4   : > { %6525 = vmatprep.subr.bf16.mxu0 %v7084_v1  ;;  %v3023_v16 = vshll.u32 %v6981_v7, 16  ;;  %v3246_v60 = vrot.slane %v6994_v17, 1  ;;  %v7000_v49 = vld [vmem:[#allocation2 + $0x28] ss:$0 sps:$4 sm:$0x11]   ;;  %v3696_v2 = vrot.slane %v3694_v47, 1 }
 0x1d5   : > { %v3017_v8 = vrot.slane %v3015_v56, 1  ;;  %v3248_v29 = vrot.slane %v7000_v49, 1  ;;  %v7003_v36 = vld [vmem:[#allocation2 + $0x24] sm:$0xff]   ;;  %v3691_v56 = vrot.slane %v3689_v24, 2  ;;  %v3951_v17 = vrot.slane %v7015_v35, 2 }
 0x1d6   : > { %v3025_v25 = vrot.slane %v3023_v16, 1  ;;  %v3247_v15 = vsel %vm1844_vm2, %v3244_v32, %v3246_v60  ;;  %v3469_v7 = vrot.slane %v7003_v36, 1  ;;  %v7009_v16 = vld [vmem:[#allocation2 + $0x2c] ss:$0 sps:$4 sm:$0x11]   ;;  %v7022_v32 = vld [vmem:[#allocation2 + $0x24] sm:$0xff]  }
 0x1d7   : > { %v3018_v14 = vsel %vm913_vm1, %v3013_v33, %v3017_v8  ;;  %6526 = vmatpush3.bf16.msra.mxu0 %v6980_v48  ;;  %v3021_v3 = vor.u32 %v3019_v13, %v3017_v8  ;;  %v3249_v58 = vsel %vm1844_vm2, %v3246_v60, %v3248_v29  ;;  %v7012_v48 = vld [vmem:[#allocation2 + $0x14] sm:$0xff]   ;;  %v3700_v33 = vor.u32 %v3699_v4, %v3696_v2  ;;  %v7028_v50 = vld [vmem:[#allocation2 + $0x2c] ss:$0 sps:$4 sm:$0x33]   ;;  %v7025_v29 = vld [vmem:[#allocation2 + $0x1c] sm:$0xff]  }
 0x1d8   : > { %6527 = vmatprep.subr.bf16.mxu0 %v7084_v1  ;;  %v3703_v8 = vshrl.u32 %v7012_v48, 16  ;;  %v3706_v55 = vshll.u32 %v7012_v48, 16  ;;  %v3721_v44 = vshrl.u32 %v7022_v32, 16  ;;  %v7019_v60 = vld [vmem:[#allocation2 + $0x14] sm:$0xff]   ;;  %v3733_v0 = vshll.u32 %v7028_v50, 16  ;;  %v7032_v4 = vld [vmem:[%s8681_s3 + $0x1e0] sm:$0xff]  }
 0x1d9   : > { %6472 = vmatmul.mubr.bf16.gmra.mrb[112].mxu0 %v3018_v14  ;;  %v3026_v10 = vsel %vm913_vm1, %v3021_v3, %v3025_v25  ;;  %v7007_v14 = vld [vmem:[%s8681_s3 + $0x180] sm:$0xff]   ;;  %vm8731_vm1 = vsmask.f32 6400  ;;  %v7013_v3 = vld [vmem:[%s8681_s3 + $0x178] sm:$0xff]   ;;  %v3471_v25 = vrot.slane %v7009_v16, 1  ;;  %v3954_v49 = vrot.slane %v7019_v60, 2 }
 0x1da   : > { %6496 = vmatmul.mubr.bf16.vlgmr.msra.gmra.mrb[100].mxu1 %v3241_v43  ;;  %6475 = vmatprep.mubr.msk.bf16.mxu0 %vm7085_vm0, %v7084_v1  ;;  %v3705_v11 = vrot.slane %v3703_v8, 1  ;;  %v3708_v13 = vrot.slane %v3706_v55, 2  ;;  %vm8732_vm6 = vmmov %vm8731_vm1  ;;  %v3735_v24 = vrot.slane %v3733_v0, 2  ;;  %v3956_v36 = vrot.slane %v7025_v29, 2  ;;  %v7048_v60 = vld [vmem:[%s8681_s3 + $0x220] sm:$0xff]  }
 0x1db   : > { %6552 = vmatpush3.bf16.msra.mxu1 %v6979_v61  ;;  %6528 = vmatpush3.bf16.msra.mxu0 %v6982_v6  ;;  %v3692_v61 = vor.u32 %v3691_v56, %v3688_v28  ;;  %v3470_v6 = vsel %vm1844_vm2, %v3467_v57, %v3469_v7  ;;  %vm8733_vm10 = vmmov %vm8731_vm1  ;;  %v7026_v57 = vld [vmem:[%s8681_s3 + $0x1d0] sm:$0xff]   ;;  %v7031_v28 = vld [vmem:[#allocation2 + $0x24] sm:$0xff]  }
 0x1dc   : > { %6553 = vmatprep.subr.bf16.mxu1 %v7084_v1  ;;  %6499 = vmatprep.mubr.msk.bf16.mxu1 %vm7085_vm0, %v7084_v1  ;;  %v3709_v30 = vor.u32 %v3708_v13, %v3705_v11  ;;  %vm8734_vm3 = vmmov %vm8731_vm1  ;;  %v3958_v8 = vrot.slane %v7031_v28, 2  ;;  %v7037_v16 = vld [vmem:[#allocation2 + $0x2c] ss:$0 sps:$4 sm:$0x33]   ;;  %v7040_v13 = vld [vmem:[#allocation2 + $0x18] sm:$0xff]  }
 0x1dd   : > { %6529 = vmatprep.subr.bf16.mxu0 %v7084_v1  ;;  %v3701_v43 = vsel %vm8731_vm1, %v3692_v61, %v3700_v33  ;;  %vm8735_vm9 = vmmov %vm8731_vm1  ;;  %v7058_v28 = vld [vmem:[%s8681_s3 + $0x238] sm:$0xff]  }
 0x1de   : > { %v3710_v40 = vsel %vm8732_vm6, %v3700_v33, %v3709_v30  ;;  %v7036_v33 = vld [vmem:[%s8681_s3 + $0x1e8] sm:$0xff]  }
 0x1df   : > { %6554 = vmatpush3.bf16.msra.mxu1 %v6983_v21  ;;  %6530 = vmatpush3.bf16.msra.mxu0 %v6985_v23  ;;  %v7017_v21 = vld [vmem:[#allocation2 + $0x1c] sm:$0xff]   ;;  %v7011_v23 = vld [vmem:[%s8681_s3 + $0x188] sm:$0xff]  }
 0x1e0   : > { %6555 = vmatprep.subr.bf16.mxu1 %v7084_v1  ;;  %6587 = vmatprep.subr.bf16.mxu0 %v7084_v1 }
 0x1e1   : > { %6476 = vmatmul.mubr.bf16.gmra.mrb[116].mxu0 %v3026_v10  ;;  %v3715_v10 = vshll.u32 %v7017_v21, 16 }
 0x1e2   : > { %6500 = vmatmul.mubr.bf16.gmra.mrb[104].mxu1 %v3243_v31  ;;  %6531 = vmatprep.mubr.msk.bf16.mxu0 %vm7085_vm0, %v7084_v1  ;;  %v3472_v31 = vsel %vm1844_vm2, %v3469_v7, %v3471_v25  ;;  %vm3950_vm2 = vcmask 1045504   ;;  %v7033_v7 = vld [vmem:[#allocation2 + $0x8] sm:$0xfc]   ;;  %v3960_v25 = vrot.slane %v7037_v16, 2 }
 0x1e3   : > { %6556 = vmatpush3.bf16.msra.mxu1 %v6986_v9  ;;  %6503 = vmatprep.mubr.msk.bf16.mxu1 %vm7085_vm0, %v7084_v1  ;;  %v3712_v9 = vshrl.u32 %v7017_v21, 16  ;;  %v3717_v59 = vrot.slane %v3715_v10, 2  ;;  %v3957_v48 = vsel %vm3950_vm2, %v3954_v49, %v3956_v36  ;;  %v4174_v61 = vrot.slane %v7033_v7, 2  ;;  %v7043_v21 = vld [vmem:[#allocation2 + $0x8] sm:$0xfc]  }
 0x1e4   : > { %6557 = vmatprep.subr.bf16.mxu1 %v7084_v1  ;;  %v4177_v10 = vrot.slane %v7040_v13, 2  ;;  %v7061_v16 = vld [vmem:[#allocation2 + $0x8] sm:$0xf8]  }
 0x1e7   : > { %6558 = vmatpush3.bf16.msra.mxu1 %v6990_v19  ;;  %v3714_v19 = vrot.slane %v3712_v9, 1 }
 0x1e8   : > { %6559 = vmatprep.subr.bf16.mxu1 %v7084_v1 }
 0x1e9   : > { %6532 = vmatmul.mubr.bf16.vlgmr.msra.gmra.mrb[120].mxu0 %v3464_v22  ;;  %v3718_v22 = vor.u32 %v3717_v59, %v3714_v19 }
 0x1ea   : > { %6504 = vmatmul.mubr.bf16.gmra.mrb[108].mxu1 %v3245_v45  ;;  %6535 = vmatprep.mubr.msk.bf16.mxu0 %vm7085_vm0, %v7084_v1  ;;  %v3724_v45 = vshll.u32 %v7022_v32, 16  ;;  %v7047_v32 = vld [vmem:[#allocation2 + $0x18] sm:$0xff]  }
 0x1eb   : > { %6560 = vmatpush3.bf16.msra.mxu1 %v6992_v37  ;;  %6588 = vmatpush3.bf16.msra.mxu0 %v6993_v42  ;;  %v7018_v37 = vld [vmem:[%s8681_s3 + $0x198] sm:$0xff]   ;;  %v3952_v42 = vrot.slane %v7016_v20, 2  ;;  %v7042_v20 = vld [vmem:[%s8681_s3 + $0x210] sm:$0xff]  }
 0x1ec   : > { %6507 = vmatprep.mubr.msk.bf16.mxu1 %vm7085_vm0, %v7084_v1  ;;  %6561 = vmatprep.subr.bf16.mxu1 %v7084_v1 }
 0x1ed   : > { %6589 = vmatprep.subr.bf16.mxu0 %v7084_v1  ;;  %v3953_v26 = vsel %vm3950_vm2, %v3951_v17, %v3952_v42  ;;  %v3955_v47 = vsel %vm3950_vm2, %v3952_v42, %v3954_v49  ;;  %v4416_v17 = vshrl.u32 %v7047_v32, 16  ;;  %v7050_v49 = vld [vmem:[#allocation2 + $0x28] sm:$0xff]  }
 0x1ee   : > { %v4181_v29 = vrot.slane %v7050_v49, 2 }
 0x1ef   : > { %6562 = vmatpush3.bf16.msra.mxu1 %v6995_v34  ;;  %6590 = vmatpush3.bf16.msra.mxu0 %v6996_v62  ;;  %v7020_v34 = vld [vmem:[%s8681_s3 + $0x1a0] sm:$0xff]  }
 0x1f0   : > { %6591 = vmatprep.subr.bf16.mxu0 %v7084_v1  ;;  %6563 = vmatprep.subr.bf16.mxu1 %v7084_v1  ;;  %v7021_v62 = vld [vmem:[%s8681_s3 + $0x1c0] sm:$0xff]  }
 0x1f1   : > { %6536 = vmatmul.mubr.bf16.gmra.mrb[124].mxu0 %v3466_v52  ;;  %v3726_v52 = vrot.slane %v3724_v45, 2 }
 0x1f2   : > { %6508 = vmatmul.mubr.bf16.gmra.mrb[112].mxu1 %v3247_v15  ;;  %6539 = vmatprep.mubr.msk.bf16.mxu0 %vm7085_vm0, %v7084_v1  ;;  %v7024_v15 = vld [vmem:[%s8681_s3 + $0x1c8] sm:$0xff]  }
 0x1f3   : > { %6592 = vmatpush3.bf16.msra.mxu0 %v6998_v27  ;;  %6511 = vmatprep.mubr.msk.bf16.mxu1 %vm7085_vm0, %v7084_v1  ;;  %v3719_v27 = vsel %vm8733_vm10, %v3709_v30, %v3718_v22 }
 0x1f4   : > { %6564 = vmatpush3.bf16.msra.mxu1 %v6999_v51  ;;  %6593 = vmatprep.subr.bf16.mxu0 %v7084_v1  ;;  %v3723_v51 = vrot.slane %v3721_v44, 1  ;;  %v7046_v44 = vld [vmem:[%s8681_s3 + $0x218] sm:$0xff]  }
 0x1f5   : > { %6565 = vmatprep.subr.bf16.mxu1 %v7084_v1 }
 0x1f7   : > { %6594 = vmatpush3.bf16.msra.mxu0 %v7001_v46  ;;  %v3727_v46 = vor.u32 %v3726_v52, %v3723_v51  ;;  %v4418_v52 = vrot.slane %v4416_v17, 2 }
 0x1f8   : > { %6566 = vmatpush3.bf16.msra.mxu1 %v7002_v63  ;;  %6595 = vmatprep.subr.bf16.mxu0 %v7084_v1  ;;  %v3730_v63 = vshrl.u32 %v7028_v50, 16 }
 0x1f9   : > { %6540 = vmatmul.mubr.bf16.gmra.mrb[128].mxu0 %v3468_v38  ;;  %6623 = vmatprep.subr.bf16.mxu1 %v7084_v1  ;;  %v7029_v38 = vld [vmem:[%s8681_s3 + $0x1d8] sm:$0xff]  }
 0x1fa   : > { %6512 = vmatmul.mubr.bf16.gmra.mrb[116].mxu1 %v3249_v58  ;;  %6543 = vmatprep.mubr.msk.bf16.mxu0 %vm7085_vm0, %v7084_v1  ;;  %v3732_v12 = vrot.slane %v3730_v63, 1  ;;  %v7030_v58 = vld [vmem:[%s8681_s3 + $0x1b8] sm:$0xff]   ;;  %v8529_v63 = vld [vmem:[%s8683_s5 + $0x8] sm:$0xff]  }
 0x1fb   : > { %6596 = vmatpush3.bf16.msra.mxu0 %v7004_v18  ;;  %6567 = vmatprep.mubr.msk.bf16.mxu1 %vm7085_vm0, %v7084_v1  ;;  %v3728_v18 = vsel %vm8734_vm3, %v3718_v22, %v3727_v46 }
 0x1fc   : > { %6597 = vmatprep.subr.bf16.mxu0 %v7084_v1  ;;  %v3736_v2 = vor.u32 %v3735_v24, %v3732_v12 }
 0x1fe   : > { %v3737_v56 = vsel %vm8735_vm9, %v3727_v46, %v3736_v2  ;;  %v7051_v46 = vld [vmem:[%s8681_s3 + $0x228] sm:$0xff]   ;;  %v7056_v2 = vld [vmem:[#allocation2 + $0x30] ss:$0 sps:$4 sm:$0x33]  }
 0x1ff   : > { %6598 = vmatpush3.bf16.msra.mxu0 %v7008_v54  ;;  %v7034_v54 = vld [vmem:[#allocation2 + $0x10] sm:$0xff]   ;;  %v4183_v7 = vrot.slane %v7056_v2, 2 }
 0x200   : > { %6599 = vmatprep.subr.bf16.mxu0 %v7084_v1  ;;  %v4175_v55 = vrot.slane %v7034_v54, 2 }
 0x201   : > { %6544 = vmatmul.mubr.bf16.gmra.mrb[132].mxu0 %v3470_v6  ;;  %v3959_v6 = vsel %vm3950_vm2, %v3956_v36, %v3958_v8  ;;  %v7059_v36 = vld [vmem:[#allocation2 + $0x28] sm:$0xff]  }
 0x202   : > { %6568 = vmatmul.mubr.bf16.vlgmr.msra.gmra.mrb[120].mxu1 %v3701_v43  ;;  %6547 = vmatprep.mubr.msk.bf16.mxu0 %vm7085_vm0, %v7084_v1  ;;  %v7044_v43 = vld [vmem:[#allocation2 + $0x10] sm:$0xff]   ;;  %v4176_v11 = vsel %vm3950_vm2, %v4174_v61, %v4175_v55  ;;  %v4178_v35 = vsel %vm3950_vm2, %v4175_v55, %v4177_v10  ;;  %v4437_v54 = vshll.u32 %v7059_v36, 16 }
 0x203   : > { %6624 = vmatpush3.bf16.msra.mxu1 %v7007_v14  ;;  %6600 = vmatpush3.bf16.msra.mxu0 %v7010_v53  ;;  %v7035_v14 = vld [vmem:[%s8681_s3 + $0x200] sm:$0xff]   ;;  %v7038_v53 = vld [vmem:[%s8681_s3 + $0x1f0] sm:$0xff]   ;;  %v4407_v30 = vshrl.u32 %v7044_v43, 16  ;;  %v4410_v9 = vshll.u32 %v7044_v43, 16  ;;  %v7063_v43 = vld [vmem:[%s8683_s5 + $0x28] sm:$0xff]  }
 0x204   : > { %6625 = vmatprep.subr.bf16.mxu1 %v7084_v1  ;;  %6571 = vmatprep.mubr.msk.bf16.mxu1 %vm7085_vm0, %v7084_v1  ;;  %v4439_v61 = vrot.slane %v4437_v54, 3 }
 0x205   : > { %6601 = vmatprep.subr.bf16.mxu0 %v7084_v1  ;;  %v4409_v19 = vrot.slane %v4407_v30, 2  ;;  %v4412_v59 = vrot.slane %v4410_v9, 3 }
 0x207   : > { %6626 = vmatpush3.bf16.msra.mxu1 %v7011_v23  ;;  %6602 = vmatpush3.bf16.msra.mxu0 %v7013_v3  ;;  %v7039_v23 = vld [vmem:[%s8681_s3 + $0x208] sm:$0xff]   ;;  %v7041_v3 = vld [vmem:[%s8681_s3 + $0x1f8] sm:$0xff]   ;;  %v4413_v45 = vor.u32 %v4412_v59, %v4409_v19 }
 0x208   : > { %6627 = vmatprep.subr.bf16.mxu1 %v7084_v1  ;;  %6659 = vmatprep.subr.bf16.mxu0 %v7084_v1 }
 0x209   : > { %6548 = vmatmul.mubr.bf16.gmra.mrb[136].mxu0 %v3472_v31  ;;  %v4402_v31 = vshll.u32 %v7043_v21, 16 }
 0x20a   : > { %6572 = vmatmul.mubr.bf16.gmra.mrb[124].mxu1 %v3710_v40  ;;  %6603 = vmatprep.mubr.msk.bf16.mxu0 %vm7085_vm0, %v7084_v1  ;;  %v3961_v40 = vsel %vm3950_vm2, %v3958_v8, %v3960_v25  ;;  %v7065_v25 = vld [vmem:[%s8683_s5 + $0x30] sm:$0xff]  }
 0x20b   : > { %6628 = vmatpush3.bf16.msra.mxu1 %v7014_v39  ;;  %6575 = vmatprep.mubr.msk.bf16.mxu1 %vm7085_vm0, %v7084_v1  ;;  %v4399_v39 = vshrl.u32 %v7043_v21, 16  ;;  %v4404_v22 = vrot.slane %v4402_v31, 3  ;;  %v7066_v31 = vld [vmem:[#allocation2 + $0x18] sm:$0xff]  }
 0x20c   : > { %6629 = vmatprep.subr.bf16.mxu1 %v7084_v1  ;;  %v4667_v19 = vrot.slane %v7066_v31, 3 }
 0x20d   : > { %v4401_v42 = vrot.slane %v4399_v39, 2 }
 0x20f   : > { %6630 = vmatpush3.bf16.msra.mxu1 %v7018_v37  ;;  %v7045_v37 = vld [vmem:[#allocation2 + $0x20] sm:$0xff]  }
 0x210   : > { %6631 = vmatprep.subr.bf16.mxu1 %v7084_v1 }
 0x211   : > { %6604 = vmatmul.mubr.bf16.vlgmr.msra.gmra.mrb[140].mxu0 %v3953_v26  ;;  %v4405_v26 = vor.u32 %v4404_v22, %v4401_v42 }
 0x212   : > { %6576 = vmatmul.mubr.bf16.gmra.mrb[128].mxu1 %v3719_v27  ;;  %6607 = vmatprep.mubr.msk.bf16.mxu0 %vm7085_vm0, %v7084_v1  ;;  %v8515_v27 = vld [vmem:[%s8683_s5] sm:$0xff]  }
 0x213   : > { %6632 = vmatpush3.bf16.msra.mxu1 %v7020_v34  ;;  %6660 = vmatpush3.bf16.msra.mxu0 %v7021_v62  ;;  %v4419_v34 = vshll.u32 %v7047_v32, 16  ;;  %v4179_v62 = vrot.slane %v7045_v37, 2  ;;  %v4414_v51 = vsel %vm4397_vm12, %v4405_v26, %v4413_v45  ;;  %v7068_v37 = vld [vmem:[%s7184_s28 + $0xa8] sm:$0xff]   ;;  %v7072_v26 = vld [vmem:[%s7184_s28 + $0xb8] sm:$0xff]  }
 0x214   : > { %6579 = vmatprep.mubr.msk.bf16.mxu1 %vm7085_vm0, %v7084_v1  ;;  %6633 = vmatprep.subr.bf16.mxu1 %v7084_v1 }
 0x215   : > { %6661 = vmatprep.subr.bf16.mxu0 %v7084_v1  ;;  %v4421_v50 = vrot.slane %v4419_v34, 3 }
 0x217   : > { %6634 = vmatpush3.bf16.msra.mxu1 %v7023_v41  ;;  %6662 = vmatpush3.bf16.msra.mxu0 %v7024_v15  ;;  %v7053_v41 = vld [vmem:[#allocation2 + $0x20] sm:$0xff]   ;;  %v4180_v15 = vsel %vm3950_vm2, %v4177_v10, %v4179_v62  ;;  %v4422_v0 = vor.u32 %v4421_v50, %v4418_v52  ;;  %v7075_v52 = vld [vmem:[%s7184_s28 + $0xc8] sm:$0xff]  }
 0x218   : > { %6663 = vmatprep.subr.bf16.mxu0 %v7084_v1  ;;  %6635 = vmatprep.subr.bf16.mxu1 %v7084_v1 }
 0x219   : > { %6608 = vmatmul.mubr.bf16.gmra.mrb[144].mxu0 %v3955_v47  ;;  %v4428_v47 = vshll.u32 %v7053_v41, 16 }
 0x21a   : > { %6580 = vmatmul.mubr.bf16.gmra.mrb[132].mxu1 %v3728_v18  ;;  %6611 = vmatprep.mubr.msk.bf16.mxu0 %vm7085_vm0, %v7084_v1  ;;  %v4423_v18 = vsel %vm4397_vm12, %v4413_v45, %v4422_v0  ;;  %v7070_v45 = vld [vmem:[%s7184_s28 + $0xb0] sm:$0xff]  }
 0x21b   : > { %6664 = vmatpush3.bf16.msra.mxu0 %v7026_v57  ;;  %6583 = vmatprep.mubr.msk.bf16.mxu1 %vm7085_vm0, %v7084_v1  ;;  %v4425_v57 = vshrl.u32 %v7053_v41, 16  ;;  %v4430_v24 = vrot.slane %v4428_v47, 3 }
 0x21c   : > { %6636 = vmatpush3.bf16.msra.mxu1 %v7027_v5  ;;  %6665 = vmatprep.subr.bf16.mxu0 %v7084_v1  ;;  %v8539_v5 = vld [vmem:[%s8683_s5 + $0x10] sm:$0xff]  }
 0x21d   : > { %6637 = vmatprep.subr.bf16.mxu1 %v7084_v1  ;;  %v4427_v12 = vrot.slane %v4425_v57, 2 }
 0x21f   : > { %6666 = vmatpush3.bf16.msra.mxu0 %v7029_v38  ;;  %v7055_v38 = vld [vmem:[%s8681_s3 + $0x230] sm:$0xff]  }
 0x220   : > { %6638 = vmatpush3.bf16.msra.mxu1 %v7030_v58  ;;  %6667 = vmatprep.subr.bf16.mxu0 %v7084_v1  ;;  %v4182_v58 = vsel %vm3950_vm2, %v4179_v62, %v4181_v29  ;;  %v7073_v62 = vld [vmem:[#allocation2 + $0x30] ss:$0 sps:$4 sm:$0x77]  }
 0x221   : > { %6612 = vmatmul.mubr.bf16.gmra.mrb[148].mxu0 %v3957_v48  ;;  %6695 = vmatprep.subr.bf16.mxu1 %v7084_v1  ;;  %v4431_v48 = vor.u32 %v4430_v24, %v4427_v12 }
 0x222   : > { %6584 = vmatmul.mubr.bf16.gmra.mrb[136].mxu1 %v3737_v56  ;;  %6615 = vmatprep.mubr.msk.bf16.mxu0 %vm7085_vm0, %v7084_v1  ;;  %v4434_v56 = vshrl.u32 %v7059_v36, 16 }
 0x223   : > { %6668 = vmatpush3.bf16.msra.mxu0 %v7032_v4  ;;  %6639 = vmatprep.mubr.msk.bf16.mxu1 %vm7085_vm0, %v7084_v1  ;;  %v8556_v4 = vld [vmem:[%s8683_s5 + $0x18] sm:$0xff]   ;;  %v4432_v8 = vsel %vm4397_vm12, %v4422_v0, %v4431_v48 }
 0x224   : > { %6669 = vmatprep.subr.bf16.mxu0 %v7084_v1  ;;  %v4436_v55 = vrot.slane %v4434_v56, 2 }
 0x227   : > { %6670 = vmatpush3.bf16.msra.mxu0 %v7036_v33  ;;  %v8567_v33 = vld [vmem:[%s8683_s5 + $0x20] sm:$0xff]  }
 0x228   : > { %6671 = vmatprep.subr.bf16.mxu0 %v7084_v1 }
 0x229   : > { %6616 = vmatmul.mubr.bf16.gmra.mrb[152].mxu0 %v3959_v6  ;;  %v7062_v6 = vld [vmem:[#allocation2 + $0x10] sm:$0xff]  }
 0x22a   : > { %6640 = vmatmul.mubr.bf16.vlgmr.msra.gmra.mrb[140].mxu1 %v4176_v11  ;;  %6619 = vmatprep.mubr.msk.bf16.mxu0 %vm7085_vm0, %v7084_v1  ;;  %v4440_v11 = vor.u32 %v4439_v61, %v4436_v55 }
 0x22b   : > { %6696 = vmatpush3.bf16.msra.mxu1 %v7035_v14  ;;  %6672 = vmatpush3.bf16.msra.mxu0 %v7038_v53  ;;  %v7064_v14 = vld [vmem:[#allocation2 + $0x30] ss:$0 sps:$4 sm:$0x77]   ;;  %v4184_v53 = vsel %vm3950_vm2, %v4181_v29, %v4183_v7 }
 0x22c   : > { %6697 = vmatprep.subr.bf16.mxu1 %v7084_v1  ;;  %6643 = vmatprep.mubr.msk.bf16.mxu1 %vm7085_vm0, %v7084_v1  ;;  %v4443_v13 = vshrl.u32 %v7064_v14, 16  ;;  %v4446_v21 = vshll.u32 %v7064_v14, 16  ;;  %v4441_v30 = vsel %vm4397_vm12, %v4431_v48, %v4440_v11 }
 0x22d   : > { %6673 = vmatprep.subr.bf16.mxu0 %v7084_v1 }
 0x22e   : > { %v4445_v9 = vrot.slane %v4443_v13, 2  ;;  %v4448_v10 = vrot.slane %v4446_v21, 3 }
 0x22f   : > { %6698 = vmatpush3.bf16.msra.mxu1 %v7039_v23  ;;  %6674 = vmatpush3.bf16.msra.mxu0 %v7041_v3  ;;  %v4665_v23 = vrot.slane %v7062_v6, 3  ;;  %v4664_v3 = vrot.slane %v7061_v16, 3 }
 0x230   : > { %6699 = vmatprep.subr.bf16.mxu1 %v7084_v1  ;;  %6731 = vmatprep.subr.bf16.mxu0 %v7084_v1 }
 0x231   : > { %6620 = vmatmul.mubr.bf16.gmra.mrb[156].mxu0 %v3961_v40  ;;  %v4666_v39 = vsel %vm4663_vm13, %v4664_v3, %v4665_v23  ;;  %v4449_v40 = vor.u32 %v4448_v10, %v4445_v9  ;;  %v4668_v32 = vsel %vm4663_vm13, %v4665_v23, %v4667_v19 }
 0x232   : > { %6644 = vmatmul.mubr.bf16.gmra.mrb[144].mxu1 %v4178_v35  ;;  %6675 = vmatprep.mubr.msk.bf16.mxu0 %vm7085_vm0, %v7084_v1  ;;  %v7069_v35 = vld [vmem:[#allocation2 + $0x20] sm:$0xff]  }
 0x233   : > { %6700 = vmatpush3.bf16.msra.mxu1 %v7042_v20  ;;  %6647 = vmatprep.mubr.msk.bf16.mxu1 %vm7085_vm0, %v7084_v1  ;;  %v7067_v20 = vld [vmem:[%s8683_s5 + $0x38] sm:$0xff]   ;;  %v4450_v59 = vsel %vm4397_vm12, %v4440_v11, %v4449_v40  ;;  %v4669_v42 = vrot.slane %v7069_v35, 3 }
 0x234   : > { %6701 = vmatprep.subr.bf16.mxu1 %v7084_v1 }
 0x235   : > { %v4670_v22 = vsel %vm4663_vm13, %v4667_v19, %v4669_v42 }
 0x237   : > { %6702 = vmatpush3.bf16.msra.mxu1 %v7046_v44  ;;  %v7071_v44 = vld [vmem:[#allocation2 + $0x28] sm:$0xff]  }
 0x238   : > { %6703 = vmatprep.subr.bf16.mxu1 %v7084_v1  ;;  %v4671_v17 = vrot.slane %v7071_v44, 3 }
 0x239   : > { %6676 = vmatmul.mubr.bf16.vlgmr.msra.gmra.mrb[160].mxu0 %v4414_v51  ;;  %v7074_v51 = vld [vmem:[%s7184_s28 + $0xc0] sm:$0xff]  }
 0x23a   : > { %6648 = vmatmul.mubr.bf16.gmra.mrb[148].mxu1 %v4180_v15  ;;  %6679 = vmatprep.mubr.msk.bf16.mxu0 %vm7085_vm0, %v7084_v1  ;;  %v4672_v34 = vsel %vm4663_vm13, %v4669_v42, %v4671_v17 }
 0x23b   : > { %6704 = vmatpush3.bf16.msra.mxu1 %v7048_v60  ;;  %6732 = vmatpush3.bf16.msra.mxu0 %v8515_v27  ;;  %v4673_v60 = vrot.slane %v7073_v62, 3 }
 0x23c   : > { %6651 = vmatprep.mubr.msk.bf16.mxu1 %vm7085_vm0, %v7084_v1  ;;  %6705 = vmatprep.subr.bf16.mxu1 %v7084_v1 }
 0x23d   : > { %6733 = vmatprep.subr.bf16.mxu0 %v7084_v1 }
 0x23f   : > { %6706 = vmatpush3.bf16.msra.mxu1 %v7051_v46  ;;  %6734 = vmatpush3.bf16.msra.mxu0 %v8529_v63 }
 0x240   : > { %6735 = vmatprep.subr.bf16.mxu0 %v7084_v1  ;;  %6707 = vmatprep.subr.bf16.mxu1 %v7084_v1 }
 0x241   : > { %6680 = vmatmul.mubr.bf16.gmra.mrb[164].mxu0 %v4423_v18 }
 0x242   : > { %6652 = vmatmul.mubr.bf16.gmra.mrb[152].mxu1 %v4182_v58  ;;  %6683 = vmatprep.mubr.msk.bf16.mxu0 %vm7085_vm0, %v7084_v1 }
 0x243   : > { %6736 = vmatpush3.bf16.msra.mxu0 %v8539_v5  ;;  %6655 = vmatprep.mubr.msk.bf16.mxu1 %vm7085_vm0, %v7084_v1 }
 0x244   : > { %6708 = vmatpush3.bf16.msra.mxu1 %v7055_v38  ;;  %6737 = vmatprep.subr.bf16.mxu0 %v7084_v1 }
 0x245   : > { %6709 = vmatprep.subr.bf16.mxu1 %v7084_v1 }
 0x247   : > { %6738 = vmatpush3.bf16.msra.mxu0 %v8556_v4 }
 0x248   : > { %6710 = vmatpush3.bf16.msra.mxu1 %v7058_v28  ;;  %6739 = vmatprep.subr.bf16.mxu0 %v7084_v1 }
 0x249   : > { %6684 = vmatmul.mubr.bf16.gmra.mrb[168].mxu0 %v4432_v8  ;;  %6767 = vmatprep.subr.bf16.mxu1 %v7084_v1 }
 0x24a   : > { %6656 = vmatmul.mubr.bf16.gmra.mrb[156].mxu1 %v4184_v53  ;;  %6687 = vmatprep.mubr.msk.bf16.mxu0 %vm7085_vm0, %v7084_v1 }
 0x24b   : > { %6740 = vmatpush3.bf16.msra.mxu0 %v8567_v33  ;;  %6711 = vmatprep.mubr.msk.bf16.mxu1 %vm7085_vm0, %v7084_v1 }
 0x24c   : > { %6741 = vmatprep.subr.bf16.mxu0 %v7084_v1 }
 0x24f   : > { %6742 = vmatpush3.bf16.msra.mxu0 %v7063_v43 }
 0x250   : > { %6743 = vmatprep.subr.bf16.mxu0 %v7084_v1 }
 0x251   : > { %6688 = vmatmul.mubr.bf16.gmra.mrb[172].mxu0 %v4441_v30 }
 0x252   : > { %6712 = vmatmul.mubr.bf16.vlgmr.msra.gmra.mrb[160].mxu1 %v4666_v39  ;;  %6691 = vmatprep.mubr.msk.bf16.mxu0 %vm7085_vm0, %v7084_v1 }
 0x253   : > { %6775 = vmatpush3.bf16.msra.mxu1 %v8515_v27  ;;  %6744 = vmatpush3.bf16.msra.mxu0 %v7065_v25  ;;  %v4674_v27 = vsel %vm4663_vm13, %v4671_v17, %v4673_v60 }
 0x254   : > { %6768 = vmatprep.subr.bf16.mxu1 %v7084_v1  ;;  %6715 = vmatprep.mubr.msk.bf16.mxu1 %vm7085_vm0, %v7084_v1 }
 0x255   : > { %6745 = vmatprep.subr.bf16.mxu0 %v7084_v1 }
 0x257   : > { %6776 = vmatpush3.bf16.msra.mxu1 %v8529_v63  ;;  %6746 = vmatpush3.bf16.msra.mxu0 %v7067_v20 }
 0x258   : > { %6769 = vmatprep.subr.bf16.mxu1 %v7084_v1 }
 0x259   : > { %6692 = vmatmul.mubr.bf16.gmra.mrb[176].mxu0 %v4450_v59 }
 0x25a   : > { %6716 = vmatmul.mubr.bf16.gmra.mrb[164].mxu1 %v4668_v32  ;;  %6747 = vmatprep.mubr.msk.bf16.mxu0 %vm7085_vm0, %v7084_v1 }
 0x25b   : > { %6777 = vmatpush3.bf16.msra.mxu1 %v8539_v5  ;;  %6719 = vmatprep.mubr.msk.bf16.mxu1 %vm7085_vm0, %v7084_v1 }
 0x25c   : > { %6770 = vmatprep.subr.bf16.mxu1 %v7084_v1 }
 0x25f   : > { %6778 = vmatpush3.bf16.msra.mxu1 %v8556_v4 }
 0x260   : > { %6771 = vmatprep.subr.bf16.mxu1 %v7084_v1 }
 0x261   : > { %6748 = vmatmul.mubr.bf16.vlgmr.msra.gmra.mrb[180].mxu0 %v7068_v37 }
 0x262   : > { %6720 = vmatmul.mubr.bf16.gmra.mrb[168].mxu1 %v4670_v22  ;;  %6751 = vmatprep.mubr.msk.bf16.mxu0 %vm7085_vm0, %v7084_v1 }
 0x263   : > { %6779 = vmatpush3.bf16.msra.mxu1 %v8567_v33  ;;  %6723 = vmatprep.mubr.msk.bf16.mxu1 %vm7085_vm0, %v7084_v1 }
 0x264   : > { %6772 = vmatprep.subr.bf16.mxu1 %v7084_v1 }
 0x267   : > { %6780 = vmatpush3.bf16.msra.mxu1 %v7063_v43 }
 0x268   : > { %6773 = vmatprep.subr.bf16.mxu1 %v7084_v1 }
 0x269   : > { %6752 = vmatmul.mubr.bf16.gmra.mrb[184].mxu0 %v7070_v45 }
 0x26a   : > { %6724 = vmatmul.mubr.bf16.gmra.mrb[172].mxu1 %v4672_v34  ;;  %6755 = vmatprep.mubr.msk.bf16.mxu0 %vm7085_vm0, %v7084_v1 }
 0x26b   : > { %6727 = vmatprep.mubr.msk.bf16.mxu1 %vm7085_vm0, %v7084_v1  ;;  %6781 = vmatpush3.bf16.msra.mxu1 %v7065_v25 }
 0x26c   : > { %6774 = vmatprep.subr.bf16.mxu1 %v7084_v1 }
 0x26f   : > { %6782 = vmatpush3.bf16.msra.mxu1 %v7067_v20 }
 0x271   : > { %6756 = vmatmul.mubr.bf16.gmra.mrb[188].mxu0 %v7072_v26 }
 0x272   : > { %6728 = vmatmul.mubr.bf16.gmra.mrb[176].mxu1 %v4674_v27 }
 0x273   : > { %6759 = vmatprep.mubr.msk.bf16.mxu1 %vm7085_vm0, %v7084_v1 }
 0x27a   : > { %6760 = vmatmul.mubr.bf16.vlgmr.msra.gmra.mrb[180].mxu1 %v7074_v51 }
 0x27b   : > { %6763 = vmatprep.mubr.msk.bf16.mxu1 %vm7085_vm0, %v7084_v1 }
 0x282   : > { %6764 = vmatmul.mubr.bf16.gmra.mrb[184].mxu1 %v7075_v52 }
 0x285   : > { %v2878_v50 = vpop.f32.mrb[80].mxu1 }
 0x286   : > { %v6425_v41 = vpop.f32.mrb[81].mxu1 }
 0x287   : > { %v2881_v15 = vpop.f32.mrb[82].mxu1 }
 0x288   : > { %v6426_v49 = vpop.f32.mrb[83].mxu1 }
 0x28d   : > { %v2886_v46 = vpop.f32.mrb[84].mxu1 }
 0x28e   : > { %v6429_v63 = vpop.f32.mrb[85].mxu1 }
 0x28f   : > { %v2889_v0 = vpop.f32.mrb[86].mxu1 }
 0x290   : > { %v6430_v57 = vpop.f32.mrb[87].mxu1 }
 0x294   : > { %v3114_v47 = vpop.f32.mrb[100].mxu0 }
 0x295   : > { %v3163_v29 = vadd.f32 %v3114_v47, %v2878_v50  ;;  %v6461_v5 = vpop.f32.mrb[101].mxu0  ;;  %v2894_v18 = vpop.f32.mrb[88].mxu1 }
 0x296   : > { %v3117_v12 = vpop.f32.mrb[102].mxu0  ;;  %v6433_v24 = vpop.f32.mrb[89].mxu1 }
 0x297   : > { %v3164_v38 = vadd.f32 %v3117_v12, %v2881_v15  ;;  %v6462_v36 = vpop.f32.mrb[103].mxu0  ;;  %v2897_v58 = vpop.f32.mrb[90].mxu1 }
 0x298   : > { %v6434_v1 = vpop.f32.mrb[91].mxu1 }
 0x29c   : > { %v3122_v2 = vpop.f32.mrb[104].mxu0 }
 0x29d   : > { %v3165_v4 = vadd.f32 %v3122_v2, %v2886_v46  ;;  %v6465_v48 = vpop.f32.mrb[105].mxu0  ;;  %v2902_v28 = vpop.f32.mrb[92].mxu1 }
 0x29e   : > { %v3125_v56 = vpop.f32.mrb[106].mxu0  ;;  %v6437_v54 = vpop.f32.mrb[93].mxu1 }
 0x29f   : > { %v3166_v7 = vadd.f32 %v3125_v56, %v2889_v0  ;;  %v6466_v33 = vpop.f32.mrb[107].mxu0  ;;  %v2905_v8 = vpop.f32.mrb[94].mxu1 }
 0x2a0   : > { %v6438_v55 = vpop.f32.mrb[95].mxu1 }
 0x2a4   : > { %v3130_v61 = vpop.f32.mrb[108].mxu0 }
 0x2a5   : > { %v3167_v14 = vadd.f32 %v3130_v61, %v2894_v18  ;;  %v6469_v53 = vpop.f32.mrb[109].mxu0  ;;  %v2910_v6 = vpop.f32.mrb[96].mxu1 }
 0x2a6   : > { %v3133_v16 = vpop.f32.mrb[110].mxu0  ;;  %v6441_v43 = vpop.f32.mrb[97].mxu1 }
 0x2a7   : > { %v3168_v11 = vadd.f32 %v3133_v16, %v2897_v58  ;;  %v6470_v13 = vpop.f32.mrb[111].mxu0  ;;  %v2913_v21 = vpop.f32.mrb[98].mxu1 }
 0x2a8   : > { %v6442_v23 = vpop.f32.mrb[99].mxu1 }
 0x2ac   : > { %v3138_v3 = vpop.f32.mrb[112].mxu0 }
 0x2ad   : > { %v3169_v25 = vadd.f32 %v3138_v3, %v2902_v28  ;;  %v6473_v30 = vpop.f32.mrb[113].mxu0  ;;  %v3337_v9 = vpop.f32.mrb[100].mxu1 }
 0x2ae   : > { %v3141_v10 = vpop.f32.mrb[114].mxu0  ;;  %v3386_v39 = vadd.f32 %v3337_v9, %v3163_v29  ;;  %v6497_v31 = vpop.f32.mrb[101].mxu1 }
 0x2af   : > { %v3170_v20 = vadd.f32 %v3141_v10, %v2905_v8  ;;  %v6474_v40 = vpop.f32.mrb[115].mxu0  ;;  %v3340_v19 = vpop.f32.mrb[102].mxu1 }
 0x2b0   : > { %v3387_v59 = vadd.f32 %v3340_v19, %v3164_v38  ;;  %v6498_v32 = vpop.f32.mrb[103].mxu1 }
 0x2b4   : > { %v3146_v35 = vpop.f32.mrb[116].mxu0 }
 0x2b5   : > { %v3171_v37 = vadd.f32 %v3146_v35, %v2910_v6  ;;  %v6477_v42 = vpop.f32.mrb[117].mxu0  ;;  %v3345_v22 = vpop.f32.mrb[104].mxu1 }
 0x2b6   : > { %v3149_v44 = vpop.f32.mrb[118].mxu0  ;;  %v3388_v45 = vadd.f32 %v3345_v22, %v3165_v4  ;;  %v6501_v17 = vpop.f32.mrb[105].mxu1 }
 0x2b7   : > { %v3172_v34 = vadd.f32 %v3149_v44, %v2913_v21  ;;  %v6478_v62 = vpop.f32.mrb[119].mxu0  ;;  %v3348_v26 = vpop.f32.mrb[106].mxu1 }
 0x2b8   : > { %v3389_v60 = vadd.f32 %v3348_v26, %v3166_v7  ;;  %v6502_v27 = vpop.f32.mrb[107].mxu1 }
 0x2bc   : > { %v3560_v51 = vpop.f32.mrb[120].mxu0 }
 0x2bd   : > { %v3609_v52 = vadd.f32 %v3560_v51, %v3386_v39  ;;  %v6533_v50 = vpop.f32.mrb[121].mxu0  ;;  %v3353_v41 = vpop.f32.mrb[108].mxu1 }
 0x2be   : > { %v3563_v15 = vpop.f32.mrb[122].mxu0  ;;  %v3390_v49 = vadd.f32 %v3353_v41, %v3167_v14  ;;  %v6505_v46 = vpop.f32.mrb[109].mxu1 }
 0x2bf   : > { %v3610_v63 = vadd.f32 %v3563_v15, %v3387_v59  ;;  %v6534_v0 = vpop.f32.mrb[123].mxu0  ;;  %v3356_v57 = vpop.f32.mrb[110].mxu1 }
 0x2c0   : > { %v3391_v47 = vadd.f32 %v3356_v57, %v3168_v11  ;;  %v6506_v29 = vpop.f32.mrb[111].mxu1 }
 0x2c4   : > { %v3568_v5 = vpop.f32.mrb[124].mxu0 }
 0x2c5   : > { %v3611_v18 = vadd.f32 %v3568_v5, %v3388_v45  ;;  %v6537_v12 = vpop.f32.mrb[125].mxu0  ;;  %v3361_v24 = vpop.f32.mrb[112].mxu1 }
 0x2c6   : > { %v3571_v38 = vpop.f32.mrb[126].mxu0  ;;  %v3392_v36 = vadd.f32 %v3361_v24, %v3169_v25  ;;  %v6509_v58 = vpop.f32.mrb[113].mxu1 }
 0x2c7   : > { %v3612_v1 = vadd.f32 %v3571_v38, %v3389_v60  ;;  %v6538_v2 = vpop.f32.mrb[127].mxu0  ;;  %v3364_v4 = vpop.f32.mrb[114].mxu1 }
 0x2c8   : > { %v3393_v48 = vadd.f32 %v3364_v4, %v3170_v20  ;;  %v6510_v28 = vpop.f32.mrb[115].mxu1 }
 0x2cc   : > { %v3576_v56 = vpop.f32.mrb[128].mxu0 }
 0x2cd   : > { %v3613_v54 = vadd.f32 %v3576_v56, %v3390_v49  ;;  %v6541_v7 = vpop.f32.mrb[129].mxu0  ;;  %v3369_v33 = vpop.f32.mrb[116].mxu1 }
 0x2ce   : > { %v3579_v8 = vpop.f32.mrb[130].mxu0  ;;  %v3394_v55 = vadd.f32 %v3369_v33, %v3171_v37  ;;  %v6513_v61 = vpop.f32.mrb[117].mxu1 }
 0x2cf   : > { %v3614_v14 = vadd.f32 %v3579_v8, %v3391_v47  ;;  %v6542_v53 = vpop.f32.mrb[131].mxu0  ;;  %v3372_v6 = vpop.f32.mrb[118].mxu1 }
 0x2d0   : > { %v3395_v16 = vadd.f32 %v3372_v6, %v3172_v34  ;;  %v6514_v43 = vpop.f32.mrb[119].mxu1 }
 0x2d4   : > { %v3584_v11 = vpop.f32.mrb[132].mxu0 }
 0x2d5   : > { %v3615_v13 = vadd.f32 %v3584_v11, %v3392_v36  ;;  %v6545_v21 = vpop.f32.mrb[133].mxu0  ;;  %v3825_v23 = vpop.f32.mrb[120].mxu1 }
 0x2d6   : > { %v3587_v3 = vpop.f32.mrb[134].mxu0  ;;  %v3874_v25 = vadd.f32 %v3825_v23, %v3609_v52  ;;  %v6569_v30 = vpop.f32.mrb[121].mxu1 }
 0x2d7   : > { %v3616_v9 = vadd.f32 %v3587_v3, %v3393_v48  ;;  %v6546_v10 = vpop.f32.mrb[135].mxu0  ;;  %v3828_v39 = vpop.f32.mrb[122].mxu1 }
 0x2d8   : > { %v3875_v31 = vadd.f32 %v3828_v39, %v3610_v63  ;;  %v6570_v20 = vpop.f32.mrb[123].mxu1 }
 0x2dc   : > { %v3592_v40 = vpop.f32.mrb[136].mxu0 }
 0x2dd   : > { %v3617_v19 = vadd.f32 %v3592_v40, %v3394_v55  ;;  %v6549_v59 = vpop.f32.mrb[137].mxu0  ;;  %v3833_v32 = vpop.f32.mrb[124].mxu1 }
 0x2de   : > { %v3595_v35 = vpop.f32.mrb[138].mxu0  ;;  %v3876_v37 = vadd.f32 %v3833_v32, %v3611_v18  ;;  %v6573_v42 = vpop.f32.mrb[125].mxu1 }
 0x2df   : > { %v3618_v22 = vadd.f32 %v3595_v35, %v3395_v16  ;;  %v6550_v44 = vpop.f32.mrb[139].mxu0  ;;  %v3836_v45 = vpop.f32.mrb[126].mxu1 }
 0x2e0   : > { %v3877_v17 = vadd.f32 %v3836_v45, %v3612_v1  ;;  %v6574_v34 = vpop.f32.mrb[127].mxu1 }
 0x2e4   : > { %v4049_v62 = vpop.f32.mrb[140].mxu0 }
 0x2e5   : > { %v4098_v26 = vadd.f32 %v4049_v62, %v3874_v25  ;;  %v6605_v60 = vpop.f32.mrb[141].mxu0  ;;  %v3841_v27 = vpop.f32.mrb[128].mxu1 }
 0x2e6   : > { %v4052_v51 = vpop.f32.mrb[142].mxu0  ;;  %v3878_v52 = vadd.f32 %v3841_v27, %v3613_v54  ;;  %v6577_v50 = vpop.f32.mrb[129].mxu1 }
 0x2e7   : > { %v4099_v41 = vadd.f32 %v4052_v51, %v3875_v31  ;;  %v6606_v15 = vpop.f32.mrb[143].mxu0  ;;  %v3844_v49 = vpop.f32.mrb[130].mxu1 }
 0x2e8   : > { %v3879_v46 = vadd.f32 %v3844_v49, %v3614_v14  ;;  %v6578_v63 = vpop.f32.mrb[131].mxu1 }
 0x2ec   : > { %v4057_v0 = vpop.f32.mrb[144].mxu0 }
 0x2ed   : > { %v4100_v57 = vadd.f32 %v4057_v0, %v3876_v37  ;;  %v6609_v47 = vpop.f32.mrb[145].mxu0  ;;  %v3849_v29 = vpop.f32.mrb[132].mxu1 }
 0x2ee   : > { %v4060_v5 = vpop.f32.mrb[146].mxu0  ;;  %v3880_v18 = vadd.f32 %v3849_v29, %v3615_v13  ;;  %v6581_v12 = vpop.f32.mrb[133].mxu1 }
 0x2ef   : > { %v4101_v24 = vadd.f32 %v4060_v5, %v3877_v17  ;;  %v6610_v38 = vpop.f32.mrb[147].mxu0  ;;  %v3852_v36 = vpop.f32.mrb[134].mxu1 }
 0x2f0   : > { %v3881_v58 = vadd.f32 %v3852_v36, %v3616_v9  ;;  %v6582_v1 = vpop.f32.mrb[135].mxu1 }
 0x2f4   : > { %v4065_v2 = vpop.f32.mrb[148].mxu0 }
 0x2f5   : > { %v4102_v4 = vadd.f32 %v4065_v2, %v3878_v52  ;;  %v6613_v48 = vpop.f32.mrb[149].mxu0  ;;  %v3857_v28 = vpop.f32.mrb[136].mxu1 }
 0x2f6   : > { %v4068_v56 = vpop.f32.mrb[150].mxu0  ;;  %v3882_v54 = vadd.f32 %v3857_v28, %v3617_v19  ;;  %v6585_v7 = vpop.f32.mrb[137].mxu1 }
 0x2f7   : > { %v4103_v33 = vadd.f32 %v4068_v56, %v3879_v46  ;;  %v6614_v8 = vpop.f32.mrb[151].mxu0  ;;  %v3860_v55 = vpop.f32.mrb[138].mxu1 }
 0x2f8   : > { %v3883_v61 = vadd.f32 %v3860_v55, %v3618_v22  ;;  %v6586_v14 = vpop.f32.mrb[139].mxu1 }
 0x2fc   : > { %v4073_v53 = vpop.f32.mrb[152].mxu0 }
 0x2fd   : > { %v4104_v6 = vadd.f32 %v4073_v53, %v3880_v18  ;;  %v6617_v16 = vpop.f32.mrb[153].mxu0  ;;  %v4272_v43 = vpop.f32.mrb[140].mxu1 }
 0x2fe   : > { %v4076_v11 = vpop.f32.mrb[154].mxu0  ;;  %v4321_v13 = vadd.f32 %v4272_v43, %v4098_v26  ;;  %v6641_v21 = vpop.f32.mrb[141].mxu1 }
 0x2ff   : > { %v4105_v23 = vadd.f32 %v4076_v11, %v3881_v58  ;;  %v6618_v3 = vpop.f32.mrb[155].mxu0  ;;  %v4275_v25 = vpop.f32.mrb[142].mxu1 }
 0x300   : > { %v4322_v30 = vadd.f32 %v4275_v25, %v4099_v41  ;;  %v6642_v9 = vpop.f32.mrb[143].mxu1 }
 0x304   : > { %v4081_v10 = vpop.f32.mrb[156].mxu0 }
 0x305   : > { %v4106_v39 = vadd.f32 %v4081_v10, %v3882_v54  ;;  %v6621_v31 = vpop.f32.mrb[157].mxu0  ;;  %v4280_v20 = vpop.f32.mrb[144].mxu1 }
 0x306   : > { %v4084_v40 = vpop.f32.mrb[158].mxu0  ;;  %v4323_v19 = vadd.f32 %v4280_v20, %v4100_v57  ;;  %v6645_v59 = vpop.f32.mrb[145].mxu1 }
 0x307   : > { %v4107_v32 = vadd.f32 %v4084_v40, %v3883_v61  ;;  %v6622_v35 = vpop.f32.mrb[159].mxu0  ;;  %v4283_v37 = vpop.f32.mrb[146].mxu1 }
 0x308   : > { %v4324_v42 = vadd.f32 %v4283_v37, %v4101_v24  ;;  %v6646_v22 = vpop.f32.mrb[147].mxu1  ;;  %v8637_v35 = vld [vmem:[%s8682_s4] ss:$0 sm:$0xff] }
 0x309   : > { %v8643_v22 = vld [vmem:[%s8684_s6] ss:$0 sm:$0xff] }
 0x30c   : > { %v4538_v44 = vpop.f32.mrb[160].mxu0 }
 0x30d   : > { %v4587_v45 = vadd.f32 %v4538_v44, %v4321_v13  ;;  %v6677_v17 = vpop.f32.mrb[161].mxu0  ;;  %v4288_v34 = vpop.f32.mrb[148].mxu1 }
 0x30e   : > { %v4541_v62 = vpop.f32.mrb[162].mxu0  ;;  %v4325_v26 = vadd.f32 %v4288_v34, %v4102_v4  ;;  %v6649_v60 = vpop.f32.mrb[149].mxu1 }
 0x30f   : > { %v4588_v27 = vadd.f32 %v4541_v62, %v4322_v30  ;;  %v6678_v51 = vpop.f32.mrb[163].mxu0  ;;  %v4291_v52 = vpop.f32.mrb[150].mxu1 }
 0x310   : > { %v4326_v50 = vadd.f32 %v4291_v52, %v4103_v33  ;;  %v6650_v41 = vpop.f32.mrb[151].mxu1 }
 0x314   : > { %v4546_v15 = vpop.f32.mrb[164].mxu0 }
 0x315   : > { %v4589_v49 = vadd.f32 %v4546_v15, %v4323_v19  ;;  %v6681_v46 = vpop.f32.mrb[165].mxu0  ;;  %v4296_v63 = vpop.f32.mrb[152].mxu1 }
 0x316   : > { %v4549_v0 = vpop.f32.mrb[166].mxu0  ;;  %v4327_v57 = vadd.f32 %v4296_v63, %v4104_v6  ;;  %v6653_v47 = vpop.f32.mrb[153].mxu1 }
 0x317   : > { %v4590_v29 = vadd.f32 %v4549_v0, %v4324_v42  ;;  %v6682_v5 = vpop.f32.mrb[167].mxu0  ;;  %v4299_v18 = vpop.f32.mrb[154].mxu1 }
 0x318   : > { %v4328_v12 = vadd.f32 %v4299_v18, %v4105_v23  ;;  %v6654_v24 = vpop.f32.mrb[155].mxu1 }
 0x31c   : > { %v4554_v38 = vpop.f32.mrb[168].mxu0 }
 0x31d   : > { %v4591_v36 = vadd.f32 %v4554_v38, %v4325_v26  ;;  %v6685_v58 = vpop.f32.mrb[169].mxu0  ;;  %v4304_v1 = vpop.f32.mrb[156].mxu1 }
 0x31e   : > { %v4557_v2 = vpop.f32.mrb[170].mxu0  ;;  %v4329_v4 = vadd.f32 %v4304_v1, %v4106_v39  ;;  %v6657_v48 = vpop.f32.mrb[157].mxu1 }
 0x31f   : > { %v4592_v28 = vadd.f32 %v4557_v2, %v4326_v50  ;;  %v6686_v56 = vpop.f32.mrb[171].mxu0  ;;  %v4307_v54 = vpop.f32.mrb[158].mxu1 }
 0x320   : > { %v4330_v7 = vadd.f32 %v4307_v54, %v4107_v32  ;;  %v6658_v33 = vpop.f32.mrb[159].mxu1 }
 0x324   : > { %v4562_v8 = vpop.f32.mrb[172].mxu0 }
 0x325   : > { %v4593_v55 = vadd.f32 %v4562_v8, %v4327_v57  ;;  %v6689_v61 = vpop.f32.mrb[173].mxu0  ;;  %v4762_v14 = vpop.f32.mrb[160].mxu1 }
 0x326   : > { %v4565_v53 = vpop.f32.mrb[174].mxu0  ;;  %v4811_v6 = vadd.f32 %v4762_v14, %v4587_v45  ;;  %v6713_v16 = vpop.f32.mrb[161].mxu1 }
 0x327   : > { %v4594_v43 = vadd.f32 %v4565_v53, %v4328_v12  ;;  %v6690_v11 = vpop.f32.mrb[175].mxu0  ;;  %v4765_v13 = vpop.f32.mrb[162].mxu1 }
 0x328   : > { %v4812_v21 = vadd.f32 %v4765_v13, %v4588_v27  ;;  %v6714_v23 = vpop.f32.mrb[163].mxu1  ;;  %v4848_v37 = vadd.f32 %v8637_v35, %v4811_v6 }
 0x32a   : > { %v4849_v17 = vadd.f32 %v8637_v35, %v4812_v21 }
 0x32c   : > { %v4570_v3 = vpop.f32.mrb[176].mxu0 }
 0x32d   : > { %v4595_v25 = vadd.f32 %v4570_v3, %v4329_v4  ;;  %v6693_v30 = vpop.f32.mrb[177].mxu0  ;;  %v4770_v9 = vpop.f32.mrb[164].mxu1 }
 0x32e   : > { %v4573_v10 = vpop.f32.mrb[178].mxu0  ;;  %v4813_v39 = vadd.f32 %v4770_v9, %v4589_v49  ;;  %v6717_v31 = vpop.f32.mrb[165].mxu1 }
 0x32f   : > { %v4596_v20 = vadd.f32 %v4573_v10, %v4330_v7  ;;  %v6694_v40 = vpop.f32.mrb[179].mxu0  ;;  %v4773_v19 = vpop.f32.mrb[166].mxu1 }
 0x330   : > { %v4814_v59 = vadd.f32 %v4773_v19, %v4590_v29  ;;  %v6718_v32 = vpop.f32.mrb[167].mxu1  ;;  %v4850_v0 = vadd.f32 %v8637_v35, %v4813_v39 }
 0x332   : > { %v4851_v18 = vadd.f32 %v8637_v35, %v4814_v59 }
 0x334   : > { %v4996_v42 = vpop.f32.mrb[180].mxu0 }
 0x335   : > { %v5035_v44 = vadd.f32 %v4996_v42, %v4848_v37  ;;  %v6749_v45 = vpop.f32.mrb[181].mxu0  ;;  %v4778_v34 = vpop.f32.mrb[168].mxu1 }
 0x336   : > { %v4999_v62 = vpop.f32.mrb[182].mxu0  ;;  %v4815_v26 = vadd.f32 %v4778_v34, %v4591_v36  ;;  %v6721_v60 = vpop.f32.mrb[169].mxu1 }
 0x337   : > { %v5052_v27 = vadd.f32 %v8643_v22, %v5035_v44  ;;  %v5036_v51 = vadd.f32 %v4999_v62, %v4849_v17  ;;  %v4781_v52 = vpop.f32.mrb[170].mxu1  ;;  %v6750_v50 = vpop.f32.mrb[183].mxu0 }
 0x338   : > { %v4816_v41 = vadd.f32 %v4781_v52, %v4592_v28  ;;  %v6722_v15 = vpop.f32.mrb[171].mxu1  ;;  %v4852_v33 = vadd.f32 %v8637_v35, %v4815_v26 }
 0x339   : > { %v5053_v49 = vadd.f32 %v8643_v22, %v5036_v51  ;;  %v5062_v46 = vmax.f32 %v5052_v27, 0.0 }
 0x33a   : > { %v4853_v53 = vadd.f32 %v8637_v35, %v4816_v41 }
 0x33b   : > { %v5063_v63 = vmax.f32 %v5053_v49, 0.0 }
 0x33c   : > { %v5004_v57 = vpop.f32.mrb[184].mxu0 }
 0x33d   : > { %v5810_v47 = vpack.c.bf16 %v5063_v63, %v5062_v46  ;;  %v5037_v29 = vadd.f32 %v5004_v57, %v4850_v0  ;;  %v6753_v5 = vpop.f32.mrb[185].mxu0  ;;  %v4786_v12 = vpop.f32.mrb[172].mxu1 }
 0x33e   : > { %v5007_v24 = vpop.f32.mrb[186].mxu0  ;;  %v4817_v38 = vadd.f32 %v4786_v12, %v4593_v55  ;;  %v6725_v36 = vpop.f32.mrb[173].mxu1 }
 0x33f   : > { %5811 = vst [vmem:[%s8653_s18] sm:$0xff] %v5810_v47   ;;  %v5054_v58 = vadd.f32 %v8643_v22, %v5037_v29  ;;  %v5038_v1 = vadd.f32 %v5007_v24, %v4851_v18  ;;  %v4789_v2 = vpop.f32.mrb[174].mxu1  ;;  %v6754_v4 = vpop.f32.mrb[187].mxu0 }
 0x340   : > { %v4818_v48 = vadd.f32 %v4789_v2, %v4594_v43  ;;  %v6726_v28 = vpop.f32.mrb[175].mxu1  ;;  %v4854_v40 = vadd.f32 %v8637_v35, %v4817_v38 }
 0x341   : > { %v5055_v56 = vadd.f32 %v8643_v22, %v5038_v1  ;;  %v5064_v54 = vmax.f32 %v5054_v58, 0.0 }
 0x342   : > { %v4855_v37 = vadd.f32 %v8637_v35, %v4818_v48 }
 0x343   : > { %v5065_v7 = vmax.f32 %v5055_v56, 0.0 }
 0x344   : > { %v5012_v8 = vpop.f32.mrb[188].mxu0 }
 0x345   : > { %v5815_v61 = vpack.c.bf16 %v5065_v7, %v5064_v54  ;;  %v5039_v14 = vadd.f32 %v5012_v8, %v4852_v33  ;;  %v6757_v55 = vpop.f32.mrb[189].mxu0  ;;  %v4794_v6 = vpop.f32.mrb[176].mxu1 }
 0x346   : > { %v5015_v16 = vpop.f32.mrb[190].mxu0  ;;  %v4819_v11 = vadd.f32 %v4794_v6, %v4595_v25  ;;  %v6729_v13 = vpop.f32.mrb[177].mxu1 }
 0x347   : > { %5832 = vst [vmem:[%s8653_s18 + $0x8] sm:$0xff] %v5815_v61   ;;  %v5056_v43 = vadd.f32 %v8643_v22, %v5039_v14  ;;  %v5040_v21 = vadd.f32 %v5015_v16, %v4853_v53  ;;  %v4797_v23 = vpop.f32.mrb[178].mxu1  ;;  %v6758_v3 = vpop.f32.mrb[191].mxu0 }
 0x348   : > { %v4820_v30 = vadd.f32 %v4797_v23, %v4596_v20  ;;  %v6730_v9 = vpop.f32.mrb[179].mxu1  ;;  %v4856_v26 = vadd.f32 %v8637_v35, %v4819_v11 }
 0x349   : > { %v5057_v10 = vadd.f32 %v8643_v22, %v5040_v21  ;;  %v5066_v39 = vmax.f32 %v5056_v43, 0.0 }
 0x34a   : > { %v4857_v50 = vadd.f32 %v8637_v35, %v4820_v30 }
 0x34b   : > { %v5067_v31 = vmax.f32 %v5057_v10, 0.0 }
 0x34d   : > { %v5820_v19 = vpack.c.bf16 %v5067_v31, %v5066_v39  ;;  %v5020_v59 = vpop.f32.mrb[180].mxu1 }
 0x34e   : > { %v5041_v32 = vadd.f32 %v5020_v59, %v4854_v40  ;;  %v6761_v25 = vpop.f32.mrb[181].mxu1 }
 0x34f   : > { %5833 = vst [vmem:[%s8653_s18 + $0x10] sm:$0xff] %v5820_v19   ;;  %v5023_v42 = vpop.f32.mrb[182].mxu1 }
 0x350   : > { %v5058_v44 = vadd.f32 %v8643_v22, %v5041_v32  ;;  %v5042_v45 = vadd.f32 %v5023_v42, %v4855_v37  ;;  %v6762_v20 = vpop.f32.mrb[183].mxu1 }
 0x352   : > { %v5059_v17 = vadd.f32 %v8643_v22, %v5042_v45  ;;  %v5068_v34 = vmax.f32 %v5058_v44, 0.0 }
 0x354   : > { %v5069_v62 = vmax.f32 %v5059_v17, 0.0 }
 0x355   : > { %v5028_v60 = vpop.f32.mrb[184].mxu1 }
 0x356   : > { %v5825_v27 = vpack.c.bf16 %v5069_v62, %v5068_v34  ;;  %v5043_v51 = vadd.f32 %v5028_v60, %v4856_v26  ;;  %v6765_v52 = vpop.f32.mrb[185].mxu1 }
 0x357   : > { %v5031_v41 = vpop.f32.mrb[186].mxu1 }
 0x358   : > { %5834 = vst [vmem:[%s8653_s18 + $0x18] sm:$0xff] %v5825_v27   ;;  %v5060_v15 = vadd.f32 %v8643_v22, %v5043_v51  ;;  %v5044_v49 = vadd.f32 %v5031_v41, %v4857_v50  ;;  %v6766_v46 = vpop.f32.mrb[187].mxu1 }
 0x35a   : > { %v5061_v63 = vadd.f32 %v8643_v22, %v5044_v49  ;;  %v5070_v0 = vmax.f32 %v5060_v15, 0.0 }
 0x35c   : > { %v5071_v57 = vmax.f32 %v5061_v63, 0.0 }
 0x35e   : > { %v5830_v47 = vpack.c.bf16 %v5071_v57, %v5070_v0 }
 0x360   : > { %5835 = vst [vmem:[%s8653_s18 + $0x20] sm:$0xff] %v5830_v47  }
 0x361 PF: > { %s17_s24 = sadd.s32 1, %s7082_s24  }
 0x362   : > { %p14_p4 = scmp.ge.s32.totalorder %s17_s24, 4  }
 0x364   :  { %16 = sbr.rel (!%p14_p4) target bundleno = 1 (0x1), region = 97 }

</bundles_post_ra>
